<compile_context>
chip_gen: v7x
topology: tpu7x:2x2x1
jax: 0.10.0
libtpu: 0.0.40
codegen_flags: <defaults>
</compile_context>

<pallas_src>
import jax
import jax.numpy as jnp
from jax.experimental import pallas as pl
from jax.experimental.pallas import tpu as pltpu


# ---------------------------------------------------------------------------
# in-kernel helpers
# ---------------------------------------------------------------------------
def _silu(h):
    # x * sigmoid(x); the reciprocal runs on the EUP slot (separate VLIW slot).
    return h * pl.reciprocal(1.0 + jnp.exp(-h), approx=True)


def _im2col_patches(frames, h, w):
    """frames: 3 arrays (Hp, Wp, Cin) bf16 (temporal taps kt=0,1,2), with zeros
    in every padding position.  Returns a (h*w, 27*Cin) bf16 patch matrix whose
    column order is (kt, kh, kw, cin) -- matching weight.reshape(27*Cin, Cout).

    The 3 W-shifted views (sublane relayouts) are built once per frame and
    reused across the 9 (kt, kh) taps; the per-(kt, kh) slices only index
    leading dims, so they are cheap.
    """
    cols = []
    for f in frames:                                   # kt = 0, 1, 2
        cin = f.shape[-1]
        # Fold kw into the lane/contraction dimension: (Hp, w, 3*Cin).
        xw = jnp.concatenate([f[:, kw:kw + w, :] for kw in range(3)], axis=-1)
        for kh in range(3):
            cols.append(xw[kh:kh + h, :, :].reshape(h * w, 3 * cin))
    return jnp.concatenate(cols, axis=-1)              # (h*w, 27*Cin)


# ---------------------------------------------------------------------------
# Kernel 1: fused bn1 + SiLU prologue -> causal conv1 -> bias + bn2 + SiLU
# ---------------------------------------------------------------------------
def _conv1_kernel(f0_ref, f1_ref, f2_ref, w_ref, b_ref,
                  s1_ref, t1_ref, s2_ref, t2_ref, o_ref):
    h, w, cout = o_ref.shape
    hp, wp, cin = f0_ref.shape

    # Interior mask over the padded H/W frame (padding rows/cols must stay 0
    # after the bn1+SiLU prologue is applied to the zero-padded input).
    ih = jax.lax.broadcasted_iota(jnp.int32, (hp, wp, cin), 0)
    iw = jax.lax.broadcasted_iota(jnp.int32, (hp, wp, cin), 1)
    interior = (ih >= 1) & (ih <= h) & (iw >= 1) & (iw <= w)

    s1 = s1_ref[...].reshape(1, 1, cin)
    t1 = t1_ref[...].reshape(1, 1, cin)
    t_idx = pl.program_id(1)

    frames = []
    for kt, f_ref in enumerate((f0_ref, f1_ref, f2_ref)):
        a = f_ref[...] * s1 + t1                       # eval-mode BatchNorm1
        a = _silu(a)
        valid = interior
        if kt < 2:                                     # causal T padding frames -> 0
            valid = jnp.logical_and(interior, t_idx >= 2 - kt)
        a = jnp.where(valid, a, 0.0)
        frames.append(a.astype(jnp.bfloat16))

    patches = _im2col_patches(frames, h, w)            # (h*w, 27*cin) bf16
    acc = jnp.dot(patches, w_ref[...],                 # single big-K MXU matmul
                  preferred_element_type=jnp.float32)
    acc = acc + b_ref[...]                             # conv1 bias
    acc = acc * s2_ref[...] + t2_ref[...]              # eval-mode BatchNorm2
    acc = _silu(acc)                                   # dropout p=0.0 -> identity
    o_ref[...] = acc.reshape(h, w, cout).astype(o_ref.dtype)


# ---------------------------------------------------------------------------
# Kernel 2: causal conv2 -> bias + residual add
# ---------------------------------------------------------------------------
def _conv2_kernel(f0_ref, f1_ref, f2_ref, w_ref, b_ref, res_ref, o_ref):
    h, w, cout = o_ref.shape
    # Input is already genuinely zero-padded bf16 -> no prologue / masking.
    frames = [f0_ref[...], f1_ref[...], f2_ref[...]]
    patches = _im2col_patches(frames, h, w)
    acc = jnp.dot(patches, w_ref[...], preferred_element_type=jnp.float32)
    acc = acc + b_ref[...]                             # conv2 bias
    out = acc.reshape(h, w, cout) + res_ref[...].astype(jnp.float32)
    o_ref[...] = out.astype(o_ref.dtype)


# ---------------------------------------------------------------------------
# Full forward pass of Emu3VisionVQResnetTemporalBlock
# ---------------------------------------------------------------------------
def emu3_resnet_temporal_block(x, params, *, eps=1e-5):
    """x: (B, C, T, H, W) float32 in PyTorch NCDHW layout; returns same layout."""
    b, c, t, h, w = x.shape
    cout = params["conv1_w"].shape[-1]
    assert c == cout, "demo covers in_channels == out_channels (identity shortcut)"
    # TODO(synk): nin_shortcut / conv_shortcut (in_channels != out_channels),
    # BatchNorm training-mode batch statistics, and dropout RNG are not
    # implemented; eval-mode BN (running-stat affine) and p=0.0 dropout are used.

    x_cl = jnp.transpose(x, (0, 2, 3, 4, 1)).astype(jnp.float32)  # (B,T,H,W,C)

    def bn_affine(g, beta, m, v):
        s = g / jnp.sqrt(v + eps)
        return (s.astype(jnp.float32).reshape(1, -1),
                (beta - m * s).astype(jnp.float32).reshape(1, -1))

    s1, t1 = bn_affine(params["bn1_gamma"], params["bn1_beta"],
                       params["bn1_mean"], params["bn1_var"])
    s2, t2 = bn_affine(params["bn2_gamma"], params["bn2_beta"],
                       params["bn2_mean"], params["bn2_var"])

    # im2col weights (K = 27*Cin), bf16 for the MXU; biases/affines in f32.
    w1 = params["conv1_w"].reshape(27 * c, cout).astype(jnp.bfloat16)
    w2 = params["conv2_w"].reshape(27 * cout, cout).astype(jnp.bfloat16)
    b1 = params["conv1_b"].astype(jnp.float32).reshape(1, cout)
    b2 = params["conv2_b"].astype(jnp.float32).reshape(1, cout)

    hp, wp = h + 2, w + 2
    pad_cfg = ((0, 0), (2, 0), (1, 1), (1, 1), (0, 0))  # causal T + symmetric H/W

    # Raw x padded once: conv1 applies bn1+SiLU in its prologue (with masking),
    # so the a1 intermediate never touches HBM.
    xp1 = jnp.pad(x_cl, pad_cfg)

    grid = (b, t)                                        # one output frame / step

    def frame_spec(cin_, kt):
        # Overlapping temporal halo expressed purely through the index_map.
        return pl.BlockSpec((None, None, hp, wp, cin_),
                            lambda bi, ti, kt=kt: (bi, ti + kt, 0, 0, 0))

    def vec_spec(n):
        return pl.BlockSpec((1, n), lambda bi, ti: (0, 0))

    def out_frame_spec(cc):
        return pl.BlockSpec((None, None, h, w, cc),
                            lambda bi, ti: (bi, ti, 0, 0, 0))

    cparams = pltpu.CompilerParams(
        dimension_semantics=("parallel", "parallel"),
        vmem_limit_bytes=48 * 1024 * 1024,   # explicit budget with v7x 64 MiB headroom
    )

    # Stage 1+2: a2 = silu(bn2(conv1(silu(bn1(x))) + b1)), stored in bf16.
    a2 = pl.pallas_call(
        _conv1_kernel,
        out_shape=jax.ShapeDtypeStruct((b, t, h, w, cout), jnp.bfloat16),
        grid_spec=pltpu.PrefetchScalarGridSpec(
            num_scalar_prefetch=0, grid=grid,
            in_specs=[frame_spec(c, 0), frame_spec(c, 1), frame_spec(c, 2),
                      pl.BlockSpec((27 * c, cout), lambda bi, ti: (0, 0)),
                      vec_spec(cout),           # conv1 bias
                      vec_spec(c), vec_spec(c),  # bn1 scale / shift
                      vec_spec(cout), vec_spec(cout)],  # bn2 scale / shift
            out_specs=out_frame_spec(cout)),
        compiler_params=cparams,
    )(xp1, xp1, xp1, w1, b1, s1, t1, s2, t2)

    # a2 padded with genuine zeros (bf16) -> conv2 needs no masking/prologue.
    a2p = jnp.pad(a2, pad_cfg)

    # Stage 3: out = x + conv2(a2) + b2 (residual fused into the epilogue).
    out_cl = pl.pallas_call(
        _conv2_kernel,
        out_shape=jax.ShapeDtypeStruct((b, t, h, w, cout), jnp.float32),
        grid_spec=pltpu.PrefetchScalarGridSpec(
            num_scalar_prefetch=0, grid=grid,
            in_specs=[frame_spec(cout, 0), frame_spec(cout, 1), frame_spec(cout, 2),
                      pl.BlockSpec((27 * cout, cout), lambda bi, ti: (0, 0)),
                      vec_spec(cout),            # conv2 bias
                      out_frame_spec(cout)],     # residual (x, channel-last)
            out_specs=out_frame_spec(cout)),
        compiler_params=cparams,
    )(a2p, a2p, a2p, w2, b2, x_cl)

    return jnp.transpose(out_cl, (0, 4, 1, 2, 3)).astype(x.dtype)


# ---------------------------------------------------------------------------
# Pure-JAX reference (independent path via lax.conv_general_dilated, f32)
# ---------------------------------------------------------------------------
def _reference(x, params, eps=1e-5):
    x_cl = jnp.transpose(x, (0, 2, 3, 4, 1)).astype(jnp.float32)

    def bn(hh, g, beta, m, v):
        s = g / jnp.sqrt(v + eps)
        return hh * s + (beta - m * s)

    def silu(hh):
        return hh * jax.nn.sigmoid(hh)

    def causal_conv3d(hh, wgt, bias):
        hp = jnp.pad(hh, ((0, 0), (2, 0), (1, 1), (1, 1), (0, 0)))
        y = jax.lax.conv_general_dilated(
            hp, wgt, window_strides=(1, 1, 1), padding="VALID",
            dimension_numbers=("NDHWC", "DHWIO", "NDHWC"))
        return y + bias

    h = silu(bn(x_cl, params["bn1_gamma"], params["bn1_beta"],
                params["bn1_mean"], params["bn1_var"]))
    h = causal_conv3d(h, params["conv1_w"], params["conv1_b"])
    h = silu(bn(h, params["bn2_gamma"], params["bn2_beta"],
                params["bn2_mean"], params["bn2_var"]))
    h = causal_conv3d(h, params["conv2_w"], params["conv2_b"])
    return jnp.transpose(x_cl + h, (0, 4, 1, 2, 3))


if __name__ == "__main__":
    B, C, T, H, W = 2, 64, 4, 8, 8

    key = jax.random.PRNGKey(0)
    ks = jax.random.split(key, 13)
    wscale = (27 * C) ** -0.5

    params = {
        "bn1_gamma": 1.0 + 0.1 * jax.random.normal(ks[0], (C,), jnp.float32),
        "bn1_beta": 0.1 * jax.random.normal(ks[1], (C,), jnp.float32),
        "bn1_mean": 0.1 * jax.random.normal(ks[2], (C,), jnp.float32),
        "bn1_var": jax.random.uniform(ks[3], (C,), jnp.float32, 0.5, 1.5),
        "conv1_w": wscale * jax.random.normal(ks[4], (3, 3, 3, C, C), jnp.float32),
        "conv1_b": 0.05 * jax.random.normal(ks[5], (C,), jnp.float32),
        "bn2_gamma": 1.0 + 0.1 * jax.random.normal(ks[6], (C,), jnp.float32),
        "bn2_beta": 0.1 * jax.random.normal(ks[7], (C,), jnp.float32),
        "bn2_mean": 0.1 * jax.random.normal(ks[8], (C,), jnp.float32),
        "bn2_var": jax.random.uniform(ks[9], (C,), jnp.float32, 0.5, 1.5),
        "conv2_w": wscale * jax.random.normal(ks[10], (3, 3, 3, C, C), jnp.float32),
        "conv2_b": 0.05 * jax.random.normal(ks[11], (C,), jnp.float32),
    }
    x = jax.random.normal(ks[12], (B, C, T, H, W), jnp.float32)

    out = jax.jit(emu3_resnet_temporal_block)(x, params)
    out = jax.block_until_ready(out)

    ref = _reference(x, params)
    assert out.shape == x.shape
    max_err = float(jnp.max(jnp.abs(out - ref)))
    # bf16 MXU operands, bf16 a2 intermediate and approx-reciprocal SiLU vs a
    # pure-f32 reference -> tolerance loosened (expected ~1e-2 max abs error).
    assert max_err < 5e-2, f"max abs error {max_err}"
    print("KERNEL_OK")
</pallas_src>

<mosaic_0001>
module attributes {stable_mosaic.version = 11 : i64} {
  func.func @_conv1_kernel(%arg0: i32, %arg1: i32, %arg2: memref<1x1x10x10x64xf32, #tpu.memory_space<vmem>>, %arg3: memref<1x1x10x10x64xf32, #tpu.memory_space<vmem>>, %arg4: memref<1x1x10x10x64xf32, #tpu.memory_space<vmem>>, %arg5: memref<1728x64xbf16, #tpu.memory_space<vmem>>, %arg6: memref<1x64xf32, #tpu.memory_space<vmem>>, %arg7: memref<1x64xf32, #tpu.memory_space<vmem>>, %arg8: memref<1x64xf32, #tpu.memory_space<vmem>>, %arg9: memref<1x64xf32, #tpu.memory_space<vmem>>, %arg10: memref<1x64xf32, #tpu.memory_space<vmem>>, %arg11: memref<1x1x8x8x64xbf16, #tpu.memory_space<vmem>>) attributes {dimension_semantics = [#tpu.dimension_semantics<parallel>, #tpu.dimension_semantics<parallel>], iteration_bounds = array<i64: 2, 4>, scalar_prefetch = 0 : i64, scratch_operands = 0 : i64, tpu.core_type = #tpu.core_type<tc>, window_params = [{transform_indices = @transform_0, window_bounds = array<i64: 1, 1, 10, 10, 64>}, {transform_indices = @transform_1, window_bounds = array<i64: 1, 1, 10, 10, 64>}, {transform_indices = @transform_2, window_bounds = array<i64: 1, 1, 10, 10, 64>}, {pipeline_mode = #tpu.pipeline_mode<synchronous>, transform_indices = @transform_3, window_bounds = array<i64: 1728, 64>}, {pipeline_mode = #tpu.pipeline_mode<synchronous>, transform_indices = @transform_4, window_bounds = array<i64: 1, 64>}, {pipeline_mode = #tpu.pipeline_mode<synchronous>, transform_indices = @transform_5, window_bounds = array<i64: 1, 64>}, {pipeline_mode = #tpu.pipeline_mode<synchronous>, transform_indices = @transform_6, window_bounds = array<i64: 1, 64>}, {pipeline_mode = #tpu.pipeline_mode<synchronous>, transform_indices = @transform_7, window_bounds = array<i64: 1, 64>}, {pipeline_mode = #tpu.pipeline_mode<synchronous>, transform_indices = @transform_8, window_bounds = array<i64: 1, 64>}, {transform_indices = @transform_9, window_bounds = array<i64: 1, 1, 8, 8, 64>}]} {
    %0 = tpu.iota {dimensions = array<i32: 0>} : vector<10x10x64xi32>
    %1 = tpu.iota {dimensions = array<i32: 1>} : vector<10x10x64xi32>
    %c1_i32 = arith.constant 1 : i32
    %2 = vector.broadcast %c1_i32 : i32 to vector<10x10x64xi32>
    %3 = arith.cmpi sge, %0, %2 : vector<10x10x64xi32>
    %c8_i32 = arith.constant 8 : i32
    %4 = vector.broadcast %c8_i32 : i32 to vector<10x10x64xi32>
    %5 = arith.cmpi sle, %0, %4 : vector<10x10x64xi32>
    %6 = arith.andi %3, %5 : vector<10x10x64xi1>
    %c1_i32_0 = arith.constant 1 : i32
    %7 = vector.broadcast %c1_i32_0 : i32 to vector<10x10x64xi32>
    %8 = arith.cmpi sge, %1, %7 : vector<10x10x64xi32>
    %9 = arith.andi %6, %8 : vector<10x10x64xi1>
    %c8_i32_1 = arith.constant 8 : i32
    %10 = vector.broadcast %c8_i32_1 : i32 to vector<10x10x64xi32>
    %11 = arith.cmpi sle, %1, %10 : vector<10x10x64xi32>
    %12 = arith.andi %9, %11 : vector<10x10x64xi1>
    %c0 = arith.constant 0 : index
    %c0_2 = arith.constant 0 : index
    %13 = vector.load %arg7[%c0, %c0_2] : memref<1x64xf32, #tpu.memory_space<vmem>>, vector<1x64xf32>
    %14 = vector.shape_cast %13 : vector<1x64xf32> to vector<1x1x64xf32>
    %c0_3 = arith.constant 0 : index
    %c0_4 = arith.constant 0 : index
    %15 = vector.load %arg8[%c0_3, %c0_4] : memref<1x64xf32, #tpu.memory_space<vmem>>, vector<1x64xf32>
    %16 = vector.shape_cast %15 : vector<1x64xf32> to vector<1x1x64xf32>
    %c0_5 = arith.constant 0 : index
    %c0_6 = arith.constant 0 : index
    %c0_7 = arith.constant 0 : index
    %c0_8 = arith.constant 0 : index
    %c0_9 = arith.constant 0 : index
    %17 = vector.load %arg2[%c0_5, %c0_6, %c0_7, %c0_8, %c0_9] : memref<1x1x10x10x64xf32, #tpu.memory_space<vmem>>, vector<1x1x10x10x64xf32>
    %18 = vector.shape_cast %17 : vector<1x1x10x10x64xf32> to vector<10x10x64xf32>
    %19 = vector.broadcast %14 : vector<1x1x64xf32> to vector<10x10x64xf32>
    %20 = arith.mulf %18, %19 : vector<10x10x64xf32>
    %21 = vector.broadcast %16 : vector<1x1x64xf32> to vector<10x10x64xf32>
    %22 = arith.addf %20, %21 : vector<10x10x64xf32>
    %cst = arith.constant 0.000000e+00 : f32
    %23 = vector.broadcast %cst : f32 to vector<10x10x64xf32>
    %24 = arith.subf %23, %22 : vector<10x10x64xf32>
    %25 = math.exp %24 : vector<10x10x64xf32>
    %cst_10 = arith.constant 1.000000e+00 : f32
    %26 = vector.broadcast %cst_10 : f32 to vector<10x10x64xf32>
    %27 = arith.addf %26, %25 : vector<10x10x64xf32>
    %28 = tpu.reciprocal %27 {approx = true} : vector<10x10x64xf32> -> vector<10x10x64xf32>
    %29 = arith.mulf %22, %28 : vector<10x10x64xf32>
    %c2_i32 = arith.constant 2 : i32
    %30 = arith.cmpi sge, %arg1, %c2_i32 : i32
    %31 = vector.broadcast %30 : i1 to vector<10x10x64xi1>
    %32 = arith.andi %12, %31 : vector<10x10x64xi1>
    %cst_11 = arith.constant 0.000000e+00 : f32
    %33 = vector.broadcast %cst_11 : f32 to vector<10x10x64xf32>
    %34 = arith.select %32, %29, %33 : vector<10x10x64xi1>, vector<10x10x64xf32>
    %35 = arith.truncf %34 : vector<10x10x64xf32> to vector<10x10x64xbf16>
    %c0_12 = arith.constant 0 : index
    %c0_13 = arith.constant 0 : index
    %c0_14 = arith.constant 0 : index
    %c0_15 = arith.constant 0 : index
    %c0_16 = arith.constant 0 : index
    %36 = vector.load %arg3[%c0_12, %c0_13, %c0_14, %c0_15, %c0_16] : memref<1x1x10x10x64xf32, #tpu.memory_space<vmem>>, vector<1x1x10x10x64xf32>
    %37 = vector.shape_cast %36 : vector<1x1x10x10x64xf32> to vector<10x10x64xf32>
    %38 = vector.broadcast %14 : vector<1x1x64xf32> to vector<10x10x64xf32>
    %39 = arith.mulf %37, %38 : vector<10x10x64xf32>
    %40 = vector.broadcast %16 : vector<1x1x64xf32> to vector<10x10x64xf32>
    %41 = arith.addf %39, %40 : vector<10x10x64xf32>
    %cst_17 = arith.constant 0.000000e+00 : f32
    %42 = vector.broadcast %cst_17 : f32 to vector<10x10x64xf32>
    %43 = arith.subf %42, %41 : vector<10x10x64xf32>
    %44 = math.exp %43 : vector<10x10x64xf32>
    %cst_18 = arith.constant 1.000000e+00 : f32
    %45 = vector.broadcast %cst_18 : f32 to vector<10x10x64xf32>
    %46 = arith.addf %45, %44 : vector<10x10x64xf32>
    %47 = tpu.reciprocal %46 {approx = true} : vector<10x10x64xf32> -> vector<10x10x64xf32>
    %48 = arith.mulf %41, %47 : vector<10x10x64xf32>
    %c1_i32_19 = arith.constant 1 : i32
    %49 = arith.cmpi sge, %arg1, %c1_i32_19 : i32
    %50 = vector.broadcast %49 : i1 to vector<10x10x64xi1>
    %51 = arith.andi %12, %50 : vector<10x10x64xi1>
    %cst_20 = arith.constant 0.000000e+00 : f32
    %52 = vector.broadcast %cst_20 : f32 to vector<10x10x64xf32>
    %53 = arith.select %51, %48, %52 : vector<10x10x64xi1>, vector<10x10x64xf32>
    %54 = arith.truncf %53 : vector<10x10x64xf32> to vector<10x10x64xbf16>
    %c0_21 = arith.constant 0 : index
    %c0_22 = arith.constant 0 : index
    %c0_23 = arith.constant 0 : index
    %c0_24 = arith.constant 0 : index
    %c0_25 = arith.constant 0 : index
    %55 = vector.load %arg4[%c0_21, %c0_22, %c0_23, %c0_24, %c0_25] : memref<1x1x10x10x64xf32, #tpu.memory_space<vmem>>, vector<1x1x10x10x64xf32>
    %56 = vector.shape_cast %55 : vector<1x1x10x10x64xf32> to vector<10x10x64xf32>
    %57 = vector.broadcast %14 : vector<1x1x64xf32> to vector<10x10x64xf32>
    %58 = arith.mulf %56, %57 : vector<10x10x64xf32>
    %59 = vector.broadcast %16 : vector<1x1x64xf32> to vector<10x10x64xf32>
    %60 = arith.addf %58, %59 : vector<10x10x64xf32>
    %cst_26 = arith.constant 0.000000e+00 : f32
    %61 = vector.broadcast %cst_26 : f32 to vector<10x10x64xf32>
    %62 = arith.subf %61, %60 : vector<10x10x64xf32>
    %63 = math.exp %62 : vector<10x10x64xf32>
    %cst_27 = arith.constant 1.000000e+00 : f32
    %64 = vector.broadcast %cst_27 : f32 to vector<10x10x64xf32>
    %65 = arith.addf %64, %63 : vector<10x10x64xf32>
    %66 = tpu.reciprocal %65 {approx = true} : vector<10x10x64xf32> -> vector<10x10x64xf32>
    %67 = arith.mulf %60, %66 : vector<10x10x64xf32>
    %cst_28 = arith.constant 0.000000e+00 : f32
    %68 = vector.broadcast %cst_28 : f32 to vector<10x10x64xf32>
    %69 = arith.select %12, %67, %68 : vector<10x10x64xi1>, vector<10x10x64xf32>
    %70 = arith.truncf %69 : vector<10x10x64xf32> to vector<10x10x64xbf16>
    %71 = vector.extract_strided_slice %35 {offsets = [0, 0, 0], sizes = [10, 8, 64], strides = [1, 1, 1]} : vector<10x10x64xbf16> to vector<10x8x64xbf16>
    %72 = vector.extract_strided_slice %35 {offsets = [0, 1, 0], sizes = [10, 8, 64], strides = [1, 1, 1]} : vector<10x10x64xbf16> to vector<10x8x64xbf16>
    %73 = vector.extract_strided_slice %35 {offsets = [0, 2, 0], sizes = [10, 8, 64], strides = [1, 1, 1]} : vector<10x10x64xbf16> to vector<10x8x64xbf16>
    %74 = tpu.concatenate %71, %72, %73 in 2 : vector<10x8x64xbf16>, vector<10x8x64xbf16>, vector<10x8x64xbf16> -> vector<10x8x192xbf16>
    %75 = vector.extract_strided_slice %74 {offsets = [0, 0, 0], sizes = [8, 8, 192], strides = [1, 1, 1]} : vector<10x8x192xbf16> to vector<8x8x192xbf16>
    %76 = vector.shape_cast %75 : vector<8x8x192xbf16> to vector<64x192xbf16>
    %77 = vector.extract_strided_slice %74 {offsets = [1, 0, 0], sizes = [8, 8, 192], strides = [1, 1, 1]} : vector<10x8x192xbf16> to vector<8x8x192xbf16>
    %78 = vector.shape_cast %77 : vector<8x8x192xbf16> to vector<64x192xbf16>
    %79 = vector.extract_strided_slice %74 {offsets = [2, 0, 0], sizes = [8, 8, 192], strides = [1, 1, 1]} : vector<10x8x192xbf16> to vector<8x8x192xbf16>
    %80 = vector.shape_cast %79 : vector<8x8x192xbf16> to vector<64x192xbf16>
    %81 = vector.extract_strided_slice %54 {offsets = [0, 0, 0], sizes = [10, 8, 64], strides = [1, 1, 1]} : vector<10x10x64xbf16> to vector<10x8x64xbf16>
    %82 = vector.extract_strided_slice %54 {offsets = [0, 1, 0], sizes = [10, 8, 64], strides = [1, 1, 1]} : vector<10x10x64xbf16> to vector<10x8x64xbf16>
    %83 = vector.extract_strided_slice %54 {offsets = [0, 2, 0], sizes = [10, 8, 64], strides = [1, 1, 1]} : vector<10x10x64xbf16> to vector<10x8x64xbf16>
    %84 = tpu.concatenate %81, %82, %83 in 2 : vector<10x8x64xbf16>, vector<10x8x64xbf16>, vector<10x8x64xbf16> -> vector<10x8x192xbf16>
    %85 = vector.extract_strided_slice %84 {offsets = [0, 0, 0], sizes = [8, 8, 192], strides = [1, 1, 1]} : vector<10x8x192xbf16> to vector<8x8x192xbf16>
    %86 = vector.shape_cast %85 : vector<8x8x192xbf16> to vector<64x192xbf16>
    %87 = vector.extract_strided_slice %84 {offsets = [1, 0, 0], sizes = [8, 8, 192], strides = [1, 1, 1]} : vector<10x8x192xbf16> to vector<8x8x192xbf16>
    %88 = vector.shape_cast %87 : vector<8x8x192xbf16> to vector<64x192xbf16>
    %89 = vector.extract_strided_slice %84 {offsets = [2, 0, 0], sizes = [8, 8, 192], strides = [1, 1, 1]} : vector<10x8x192xbf16> to vector<8x8x192xbf16>
    %90 = vector.shape_cast %89 : vector<8x8x192xbf16> to vector<64x192xbf16>
    %91 = vector.extract_strided_slice %70 {offsets = [0, 0, 0], sizes = [10, 8, 64], strides = [1, 1, 1]} : vector<10x10x64xbf16> to vector<10x8x64xbf16>
    %92 = vector.extract_strided_slice %70 {offsets = [0, 1, 0], sizes = [10, 8, 64], strides = [1, 1, 1]} : vector<10x10x64xbf16> to vector<10x8x64xbf16>
    %93 = vector.extract_strided_slice %70 {offsets = [0, 2, 0], sizes = [10, 8, 64], strides = [1, 1, 1]} : vector<10x10x64xbf16> to vector<10x8x64xbf16>
    %94 = tpu.concatenate %91, %92, %93 in 2 : vector<10x8x64xbf16>, vector<10x8x64xbf16>, vector<10x8x64xbf16> -> vector<10x8x192xbf16>
    %95 = vector.extract_strided_slice %94 {offsets = [0, 0, 0], sizes = [8, 8, 192], strides = [1, 1, 1]} : vector<10x8x192xbf16> to vector<8x8x192xbf16>
    %96 = vector.shape_cast %95 : vector<8x8x192xbf16> to vector<64x192xbf16>
    %97 = vector.extract_strided_slice %94 {offsets = [1, 0, 0], sizes = [8, 8, 192], strides = [1, 1, 1]} : vector<10x8x192xbf16> to vector<8x8x192xbf16>
    %98 = vector.shape_cast %97 : vector<8x8x192xbf16> to vector<64x192xbf16>
    %99 = vector.extract_strided_slice %94 {offsets = [2, 0, 0], sizes = [8, 8, 192], strides = [1, 1, 1]} : vector<10x8x192xbf16> to vector<8x8x192xbf16>
    %100 = vector.shape_cast %99 : vector<8x8x192xbf16> to vector<64x192xbf16>
    %101 = tpu.concatenate %76, %78, %80, %86, %88, %90, %96, %98, %100 in 1 : vector<64x192xbf16>, vector<64x192xbf16>, vector<64x192xbf16>, vector<64x192xbf16>, vector<64x192xbf16>, vector<64x192xbf16>, vector<64x192xbf16>, vector<64x192xbf16>, vector<64x192xbf16> -> vector<64x1728xbf16>
    %c0_29 = arith.constant 0 : index
    %c0_30 = arith.constant 0 : index
    %102 = vector.load %arg5[%c0_29, %c0_30] : memref<1728x64xbf16, #tpu.memory_space<vmem>>, vector<1728x64xbf16>
    %cst_31 = arith.constant dense<0.000000e+00> : vector<64x64xf32>
    %103 = tpu.matmul %101, %102, %cst_31 {dimension_numbers = #tpu.dot_dimension_numbers<[1], [0], [0], [1], [0, 0, 1, 1], [], []>} : vector<64x1728xbf16>, vector<1728x64xbf16>, vector<64x64xf32> -> vector<64x64xf32>
    %c0_32 = arith.constant 0 : index
    %c0_33 = arith.constant 0 : index
    %104 = vector.load %arg6[%c0_32, %c0_33] : memref<1x64xf32, #tpu.memory_space<vmem>>, vector<1x64xf32>
    %105 = vector.broadcast %104 : vector<1x64xf32> to vector<64x64xf32>
    %106 = arith.addf %103, %105 : vector<64x64xf32>
    %c0_34 = arith.constant 0 : index
    %c0_35 = arith.constant 0 : index
    %107 = vector.load %arg9[%c0_34, %c0_35] : memref<1x64xf32, #tpu.memory_space<vmem>>, vector<1x64xf32>
    %108 = vector.broadcast %107 : vector<1x64xf32> to vector<64x64xf32>
    %109 = arith.mulf %106, %108 : vector<64x64xf32>
    %c0_36 = arith.constant 0 : index
    %c0_37 = arith.constant 0 : index
    %110 = vector.load %arg10[%c0_36, %c0_37] : memref<1x64xf32, #tpu.memory_space<vmem>>, vector<1x64xf32>
    %111 = vector.broadcast %110 : vector<1x64xf32> to vector<64x64xf32>
    %112 = arith.addf %109, %111 : vector<64x64xf32>
    %cst_38 = arith.constant 0.000000e+00 : f32
    %113 = vector.broadcast %cst_38 : f32 to vector<64x64xf32>
    %114 = arith.subf %113, %112 : vector<64x64xf32>
    %115 = math.exp %114 : vector<64x64xf32>
    %cst_39 = arith.constant 1.000000e+00 : f32
    %116 = vector.broadcast %cst_39 : f32 to vector<64x64xf32>
    %117 = arith.addf %116, %115 : vector<64x64xf32>
    %118 = tpu.reciprocal %117 {approx = true} : vector<64x64xf32> -> vector<64x64xf32>
    %119 = arith.mulf %112, %118 : vector<64x64xf32>
    %120 = vector.shape_cast %119 : vector<64x64xf32> to vector<8x8x64xf32>
    %121 = arith.truncf %120 : vector<8x8x64xf32> to vector<8x8x64xbf16>
    %c0_40 = arith.constant 0 : index
    %c0_41 = arith.constant 0 : index
    %c0_42 = arith.constant 0 : index
    %c0_43 = arith.constant 0 : index
    %c0_44 = arith.constant 0 : index
    %122 = vector.load %arg11[%c0_40, %c0_41, %c0_42, %c0_43, %c0_44] : memref<1x1x8x8x64xbf16, #tpu.memory_space<vmem>>, vector<1x1x8x8x64xbf16>
    %123 = vector.shape_cast %122 : vector<1x1x8x8x64xbf16> to vector<8x8x64xbf16>
    %124 = vector.shape_cast %121 : vector<8x8x64xbf16> to vector<1x1x8x8x64xbf16>
    tpu.vector_store %arg11[%c0_40, %c0_41, %c0_42, %c0_43, %c0_44], %124 {strides = array<i32>} : memref<1x1x8x8x64xbf16, #tpu.memory_space<vmem>>, vector<1x1x8x8x64xbf16>,
    return
  }
  func.func @transform_0(%arg0: i32, %arg1: i32) -> (i32, i32, i32, i32, i32) {
    %c0_i32 = arith.constant 0 : i32
    %0 = arith.addi %arg1, %c0_i32 : i32
    %c0_i32_0 = arith.constant 0 : i32
    %c0_i32_1 = arith.constant 0 : i32
    %c0_i32_2 = arith.constant 0 : i32
    %c0_i32_3 = arith.constant 0 : i32
    return %arg0, %0, %c0_i32_0, %c0_i32_1, %c0_i32_2 : i32, i32, i32, i32, i32
  }
  func.func @transform_1(%arg0: i32, %arg1: i32) -> (i32, i32, i32, i32, i32) {
    %c1_i32 = arith.constant 1 : i32
    %0 = arith.addi %arg1, %c1_i32 : i32
    %c0_i32 = arith.constant 0 : i32
    %c0_i32_0 = arith.constant 0 : i32
    %c0_i32_1 = arith.constant 0 : i32
    %c0_i32_2 = arith.constant 0 : i32
    return %arg0, %0, %c0_i32, %c0_i32_0, %c0_i32_1 : i32, i32, i32, i32, i32
  }
  func.func @transform_2(%arg0: i32, %arg1: i32) -> (i32, i32, i32, i32, i32) {
    %c2_i32 = arith.constant 2 : i32
    %0 = arith.addi %arg1, %c2_i32 : i32
    %c0_i32 = arith.constant 0 : i32
    %c0_i32_0 = arith.constant 0 : i32
    %c0_i32_1 = arith.constant 0 : i32
    %c0_i32_2 = arith.constant 0 : i32
    return %arg0, %0, %c0_i32, %c0_i32_0, %c0_i32_1 : i32, i32, i32, i32, i32
  }
  func.func @transform_3(%arg0: i32, %arg1: i32) -> (i32, i32) {
    %c0_i32 = arith.constant 0 : i32
    %c0_i32_0 = arith.constant 0 : i32
    %c0_i32_1 = arith.constant 0 : i32
    return %c0_i32, %c0_i32_0 : i32, i32
  }
  func.func @transform_4(%arg0: i32, %arg1: i32) -> (i32, i32) {
    %c0_i32 = arith.constant 0 : i32
    %c0_i32_0 = arith.constant 0 : i32
    %c0_i32_1 = arith.constant 0 : i32
    return %c0_i32, %c0_i32_0 : i32, i32
  }
  func.func @transform_5(%arg0: i32, %arg1: i32) -> (i32, i32) {
    %c0_i32 = arith.constant 0 : i32
    %c0_i32_0 = arith.constant 0 : i32
    %c0_i32_1 = arith.constant 0 : i32
    return %c0_i32, %c0_i32_0 : i32, i32
  }
  func.func @transform_6(%arg0: i32, %arg1: i32) -> (i32, i32) {
    %c0_i32 = arith.constant 0 : i32
    %c0_i32_0 = arith.constant 0 : i32
    %c0_i32_1 = arith.constant 0 : i32
    return %c0_i32, %c0_i32_0 : i32, i32
  }
  func.func @transform_7(%arg0: i32, %arg1: i32) -> (i32, i32) {
    %c0_i32 = arith.constant 0 : i32
    %c0_i32_0 = arith.constant 0 : i32
    %c0_i32_1 = arith.constant 0 : i32
    return %c0_i32, %c0_i32_0 : i32, i32
  }
  func.func @transform_8(%arg0: i32, %arg1: i32) -> (i32, i32) {
    %c0_i32 = arith.constant 0 : i32
    %c0_i32_0 = arith.constant 0 : i32
    %c0_i32_1 = arith.constant 0 : i32
    return %c0_i32, %c0_i32_0 : i32, i32
  }
  func.func @transform_9(%arg0: i32, %arg1: i32) -> (i32, i32, i32, i32, i32) {
    %c0_i32 = arith.constant 0 : i32
    %c0_i32_0 = arith.constant 0 : i32
    %c0_i32_1 = arith.constant 0 : i32
    %c0_i32_2 = arith.constant 0 : i32
    return %arg0, %arg1, %c0_i32, %c0_i32_0, %c0_i32_1 : i32, i32, i32, i32, i32
  }
}

module attributes {stable_mosaic.version = 11 : i64} {
  func.func @_conv2_kernel(%arg0: i32, %arg1: i32, %arg2: memref<1x1x10x10x64xbf16, #tpu.memory_space<vmem>>, %arg3: memref<1x1x10x10x64xbf16, #tpu.memory_space<vmem>>, %arg4: memref<1x1x10x10x64xbf16, #tpu.memory_space<vmem>>, %arg5: memref<1728x64xbf16, #tpu.memory_space<vmem>>, %arg6: memref<1x64xf32, #tpu.memory_space<vmem>>, %arg7: memref<1x1x8x8x64xf32, #tpu.memory_space<vmem>>, %arg8: memref<1x1x8x8x64xf32, #tpu.memory_space<vmem>>) attributes {dimension_semantics = [#tpu.dimension_semantics<parallel>, #tpu.dimension_semantics<parallel>], iteration_bounds = array<i64: 2, 4>, scalar_prefetch = 0 : i64, scratch_operands = 0 : i64, tpu.core_type = #tpu.core_type<tc>, window_params = [{transform_indices = @transform_0, window_bounds = array<i64: 1, 1, 10, 10, 64>}, {transform_indices = @transform_1, window_bounds = array<i64: 1, 1, 10, 10, 64>}, {transform_indices = @transform_2, window_bounds = array<i64: 1, 1, 10, 10, 64>}, {pipeline_mode = #tpu.pipeline_mode<synchronous>, transform_indices = @transform_3, window_bounds = array<i64: 1728, 64>}, {pipeline_mode = #tpu.pipeline_mode<synchronous>, transform_indices = @transform_4, window_bounds = array<i64: 1, 64>}, {transform_indices = @transform_5, window_bounds = array<i64: 1, 1, 8, 8, 64>}, {transform_indices = @transform_6, window_bounds = array<i64: 1, 1, 8, 8, 64>}]} {
    %c0 = arith.constant 0 : index
    %c0_0 = arith.constant 0 : index
    %c0_1 = arith.constant 0 : index
    %c0_2 = arith.constant 0 : index
    %c0_3 = arith.constant 0 : index
    %0 = vector.load %arg2[%c0, %c0_0, %c0_1, %c0_2, %c0_3] : memref<1x1x10x10x64xbf16, #tpu.memory_space<vmem>>, vector<1x1x10x10x64xbf16>
    %1 = vector.shape_cast %0 : vector<1x1x10x10x64xbf16> to vector<10x10x64xbf16>
    %c0_4 = arith.constant 0 : index
    %c0_5 = arith.constant 0 : index
    %c0_6 = arith.constant 0 : index
    %c0_7 = arith.constant 0 : index
    %c0_8 = arith.constant 0 : index
    %2 = vector.load %arg3[%c0_4, %c0_5, %c0_6, %c0_7, %c0_8] : memref<1x1x10x10x64xbf16, #tpu.memory_space<vmem>>, vector<1x1x10x10x64xbf16>
    %3 = vector.shape_cast %2 : vector<1x1x10x10x64xbf16> to vector<10x10x64xbf16>
    %c0_9 = arith.constant 0 : index
    %c0_10 = arith.constant 0 : index
    %c0_11 = arith.constant 0 : index
    %c0_12 = arith.constant 0 : index
    %c0_13 = arith.constant 0 : index
    %4 = vector.load %arg4[%c0_9, %c0_10, %c0_11, %c0_12, %c0_13] : memref<1x1x10x10x64xbf16, #tpu.memory_space<vmem>>, vector<1x1x10x10x64xbf16>
    %5 = vector.shape_cast %4 : vector<1x1x10x10x64xbf16> to vector<10x10x64xbf16>
    %6 = vector.extract_strided_slice %1 {offsets = [0, 0, 0], sizes = [10, 8, 64], strides = [1, 1, 1]} : vector<10x10x64xbf16> to vector<10x8x64xbf16>
    %7 = vector.extract_strided_slice %1 {offsets = [0, 1, 0], sizes = [10, 8, 64], strides = [1, 1, 1]} : vector<10x10x64xbf16> to vector<10x8x64xbf16>
    %8 = vector.extract_strided_slice %1 {offsets = [0, 2, 0], sizes = [10, 8, 64], strides = [1, 1, 1]} : vector<10x10x64xbf16> to vector<10x8x64xbf16>
    %9 = tpu.concatenate %6, %7, %8 in 2 : vector<10x8x64xbf16>, vector<10x8x64xbf16>, vector<10x8x64xbf16> -> vector<10x8x192xbf16>
    %10 = vector.extract_strided_slice %9 {offsets = [0, 0, 0], sizes = [8, 8, 192], strides = [1, 1, 1]} : vector<10x8x192xbf16> to vector<8x8x192xbf16>
    %11 = vector.shape_cast %10 : vector<8x8x192xbf16> to vector<64x192xbf16>
    %12 = vector.extract_strided_slice %9 {offsets = [1, 0, 0], sizes = [8, 8, 192], strides = [1, 1, 1]} : vector<10x8x192xbf16> to vector<8x8x192xbf16>
    %13 = vector.shape_cast %12 : vector<8x8x192xbf16> to vector<64x192xbf16>
    %14 = vector.extract_strided_slice %9 {offsets = [2, 0, 0], sizes = [8, 8, 192], strides = [1, 1, 1]} : vector<10x8x192xbf16> to vector<8x8x192xbf16>
    %15 = vector.shape_cast %14 : vector<8x8x192xbf16> to vector<64x192xbf16>
    %16 = vector.extract_strided_slice %3 {offsets = [0, 0, 0], sizes = [10, 8, 64], strides = [1, 1, 1]} : vector<10x10x64xbf16> to vector<10x8x64xbf16>
    %17 = vector.extract_strided_slice %3 {offsets = [0, 1, 0], sizes = [10, 8, 64], strides = [1, 1, 1]} : vector<10x10x64xbf16> to vector<10x8x64xbf16>
    %18 = vector.extract_strided_slice %3 {offsets = [0, 2, 0], sizes = [10, 8, 64], strides = [1, 1, 1]} : vector<10x10x64xbf16> to vector<10x8x64xbf16>
    %19 = tpu.concatenate %16, %17, %18 in 2 : vector<10x8x64xbf16>, vector<10x8x64xbf16>, vector<10x8x64xbf16> -> vector<10x8x192xbf16>
    %20 = vector.extract_strided_slice %19 {offsets = [0, 0, 0], sizes = [8, 8, 192], strides = [1, 1, 1]} : vector<10x8x192xbf16> to vector<8x8x192xbf16>
    %21 = vector.shape_cast %20 : vector<8x8x192xbf16> to vector<64x192xbf16>
    %22 = vector.extract_strided_slice %19 {offsets = [1, 0, 0], sizes = [8, 8, 192], strides = [1, 1, 1]} : vector<10x8x192xbf16> to vector<8x8x192xbf16>
    %23 = vector.shape_cast %22 : vector<8x8x192xbf16> to vector<64x192xbf16>
    %24 = vector.extract_strided_slice %19 {offsets = [2, 0, 0], sizes = [8, 8, 192], strides = [1, 1, 1]} : vector<10x8x192xbf16> to vector<8x8x192xbf16>
    %25 = vector.shape_cast %24 : vector<8x8x192xbf16> to vector<64x192xbf16>
    %26 = vector.extract_strided_slice %5 {offsets = [0, 0, 0], sizes = [10, 8, 64], strides = [1, 1, 1]} : vector<10x10x64xbf16> to vector<10x8x64xbf16>
    %27 = vector.extract_strided_slice %5 {offsets = [0, 1, 0], sizes = [10, 8, 64], strides = [1, 1, 1]} : vector<10x10x64xbf16> to vector<10x8x64xbf16>
    %28 = vector.extract_strided_slice %5 {offsets = [0, 2, 0], sizes = [10, 8, 64], strides = [1, 1, 1]} : vector<10x10x64xbf16> to vector<10x8x64xbf16>
    %29 = tpu.concatenate %26, %27, %28 in 2 : vector<10x8x64xbf16>, vector<10x8x64xbf16>, vector<10x8x64xbf16> -> vector<10x8x192xbf16>
    %30 = vector.extract_strided_slice %29 {offsets = [0, 0, 0], sizes = [8, 8, 192], strides = [1, 1, 1]} : vector<10x8x192xbf16> to vector<8x8x192xbf16>
    %31 = vector.shape_cast %30 : vector<8x8x192xbf16> to vector<64x192xbf16>
    %32 = vector.extract_strided_slice %29 {offsets = [1, 0, 0], sizes = [8, 8, 192], strides = [1, 1, 1]} : vector<10x8x192xbf16> to vector<8x8x192xbf16>
    %33 = vector.shape_cast %32 : vector<8x8x192xbf16> to vector<64x192xbf16>
    %34 = vector.extract_strided_slice %29 {offsets = [2, 0, 0], sizes = [8, 8, 192], strides = [1, 1, 1]} : vector<10x8x192xbf16> to vector<8x8x192xbf16>
    %35 = vector.shape_cast %34 : vector<8x8x192xbf16> to vector<64x192xbf16>
    %36 = tpu.concatenate %11, %13, %15, %21, %23, %25, %31, %33, %35 in 1 : vector<64x192xbf16>, vector<64x192xbf16>, vector<64x192xbf16>, vector<64x192xbf16>, vector<64x192xbf16>, vector<64x192xbf16>, vector<64x192xbf16>, vector<64x192xbf16>, vector<64x192xbf16> -> vector<64x1728xbf16>
    %c0_14 = arith.constant 0 : index
    %c0_15 = arith.constant 0 : index
    %37 = vector.load %arg5[%c0_14, %c0_15] : memref<1728x64xbf16, #tpu.memory_space<vmem>>, vector<1728x64xbf16>
    %cst = arith.constant dense<0.000000e+00> : vector<64x64xf32>
    %38 = tpu.matmul %36, %37, %cst {dimension_numbers = #tpu.dot_dimension_numbers<[1], [0], [0], [1], [0, 0, 1, 1], [], []>} : vector<64x1728xbf16>, vector<1728x64xbf16>, vector<64x64xf32> -> vector<64x64xf32>
    %c0_16 = arith.constant 0 : index
    %c0_17 = arith.constant 0 : index
    %39 = vector.load %arg6[%c0_16, %c0_17] : memref<1x64xf32, #tpu.memory_space<vmem>>, vector<1x64xf32>
    %40 = vector.broadcast %39 : vector<1x64xf32> to vector<64x64xf32>
    %41 = arith.addf %38, %40 : vector<64x64xf32>
    %42 = vector.shape_cast %41 : vector<64x64xf32> to vector<8x8x64xf32>
    %c0_18 = arith.constant 0 : index
    %c0_19 = arith.constant 0 : index
    %c0_20 = arith.constant 0 : index
    %c0_21 = arith.constant 0 : index
    %c0_22 = arith.constant 0 : index
    %43 = vector.load %arg7[%c0_18, %c0_19, %c0_20, %c0_21, %c0_22] : memref<1x1x8x8x64xf32, #tpu.memory_space<vmem>>, vector<1x1x8x8x64xf32>
    %44 = vector.shape_cast %43 : vector<1x1x8x8x64xf32> to vector<8x8x64xf32>
    %45 = arith.addf %42, %44 : vector<8x8x64xf32>
    %c0_23 = arith.constant 0 : index
    %c0_24 = arith.constant 0 : index
    %c0_25 = arith.constant 0 : index
    %c0_26 = arith.constant 0 : index
    %c0_27 = arith.constant 0 : index
    %46 = vector.load %arg8[%c0_23, %c0_24, %c0_25, %c0_26, %c0_27] : memref<1x1x8x8x64xf32, #tpu.memory_space<vmem>>, vector<1x1x8x8x64xf32>
    %47 = vector.shape_cast %46 : vector<1x1x8x8x64xf32> to vector<8x8x64xf32>
    %48 = vector.shape_cast %45 : vector<8x8x64xf32> to vector<1x1x8x8x64xf32>
    tpu.vector_store %arg8[%c0_23, %c0_24, %c0_25, %c0_26, %c0_27], %48 {strides = array<i32>} : memref<1x1x8x8x64xf32, #tpu.memory_space<vmem>>, vector<1x1x8x8x64xf32>,
    return
  }
  func.func @transform_0(%arg0: i32, %arg1: i32) -> (i32, i32, i32, i32, i32) {
    %c0_i32 = arith.constant 0 : i32
    %0 = arith.addi %arg1, %c0_i32 : i32
    %c0_i32_0 = arith.constant 0 : i32
    %c0_i32_1 = arith.constant 0 : i32
    %c0_i32_2 = arith.constant 0 : i32
    %c0_i32_3 = arith.constant 0 : i32
    return %arg0, %0, %c0_i32_0, %c0_i32_1, %c0_i32_2 : i32, i32, i32, i32, i32
  }
  func.func @transform_1(%arg0: i32, %arg1: i32) -> (i32, i32, i32, i32, i32) {
    %c1_i32 = arith.constant 1 : i32
    %0 = arith.addi %arg1, %c1_i32 : i32
    %c0_i32 = arith.constant 0 : i32
    %c0_i32_0 = arith.constant 0 : i32
    %c0_i32_1 = arith.constant 0 : i32
    %c0_i32_2 = arith.constant 0 : i32
    return %arg0, %0, %c0_i32, %c0_i32_0, %c0_i32_1 : i32, i32, i32, i32, i32
  }
  func.func @transform_2(%arg0: i32, %arg1: i32) -> (i32, i32, i32, i32, i32) {
    %c2_i32 = arith.constant 2 : i32
    %0 = arith.addi %arg1, %c2_i32 : i32
    %c0_i32 = arith.constant 0 : i32
    %c0_i32_0 = arith.constant 0 : i32
    %c0_i32_1 = arith.constant 0 : i32
    %c0_i32_2 = arith.constant 0 : i32
    return %arg0, %0, %c0_i32, %c0_i32_0, %c0_i32_1 : i32, i32, i32, i32, i32
  }
  func.func @transform_3(%arg0: i32, %arg1: i32) -> (i32, i32) {
    %c0_i32 = arith.constant 0 : i32
    %c0_i32_0 = arith.constant 0 : i32
    %c0_i32_1 = arith.constant 0 : i32
    return %c0_i32, %c0_i32_0 : i32, i32
  }
  func.func @transform_4(%arg0: i32, %arg1: i32) -> (i32, i32) {
    %c0_i32 = arith.constant 0 : i32
    %c0_i32_0 = arith.constant 0 : i32
    %c0_i32_1 = arith.constant 0 : i32
    return %c0_i32, %c0_i32_0 : i32, i32
  }
  func.func @transform_5(%arg0: i32, %arg1: i32) -> (i32, i32, i32, i32, i32) {
    %c0_i32 = arith.constant 0 : i32
    %c0_i32_0 = arith.constant 0 : i32
    %c0_i32_1 = arith.constant 0 : i32
    %c0_i32_2 = arith.constant 0 : i32
    return %arg0, %arg1, %c0_i32, %c0_i32_0, %c0_i32_1 : i32, i32, i32, i32, i32
  }
  func.func @transform_6(%arg0: i32, %arg1: i32) -> (i32, i32, i32, i32, i32) {
    %c0_i32 = arith.constant 0 : i32
    %c0_i32_0 = arith.constant 0 : i32
    %c0_i32_1 = arith.constant 0 : i32
    %c0_i32_2 = arith.constant 0 : i32
    return %arg0, %arg1, %c0_i32, %c0_i32_0, %c0_i32_1 : i32, i32, i32, i32, i32
  }
}

</mosaic_0001>

<bundles_post_ra>
// kernel: emu3_resnet_temporal_block.2
= control target key start
LH: loop header
LB: loop body
LE: loop exit
PB: predicated region body
PF: predicated region fallthrough
CT: control target
= control target key end

     0   :  { %s4283_s30 = smov 0   ;;  %s4285_s10 = smov 0   ;;  %s5874_s0 = inlined_call_operand.vmem [shape: f32[2,6,10,10,64], index: 0, kind: input, shape index: {}, may-alias: {0,1,2}]   ;;  %s5875_s1 = inlined_call_operand.vmem [shape: f32[2,6,10,10,64], index: 1, kind: input, shape index: {}, may-alias: {0,1,2}]   ;;  %s5876_s2 = inlined_call_operand.vmem [shape: f32[2,6,10,10,64], index: 2, kind: input, shape index: {}, may-alias: {0,1,2}]   ;;  %s5877_s3 = inlined_call_operand.vmem [shape: bf16[1728,64], index: 3, kind: input, shape index: {}]   ;;  %s5878_s4 = inlined_call_operand.vmem [shape: f32[1,64], index: 4, kind: input, shape index: {}]   ;;  %s5879_s5 = inlined_call_operand.vmem [shape: f32[1,64], index: 5, kind: input, shape index: {}]   ;;  %s5880_s6 = inlined_call_operand.vmem [shape: f32[1,64], index: 6, kind: input, shape index: {}]   ;;  %s5881_s7 = inlined_call_operand.vmem [shape: f32[1,64], index: 7, kind: input, shape index: {}]   ;;  %s5882_s8 = inlined_call_operand.vmem [shape: f32[1,64], index: 8, kind: input, shape index: {}]   ;;  %s5883_s9 = inlined_call_operand.vmem [shape: bf16[2,4,8,8,64], index: 9, kind: output, shape index: {}]  }
   0x1   :  { %s4287_s11 = smov 0   ;;  %s4289_s12 = smov 0  }
   0x2   :  { %s4291_s13 = smov 0  }
   0x3 LB: > { %s28_s14 = sadd.s32 1, %s4220_s11  ;;  %s31_s15 = sadd.s32 1, %s4224_s12  ;;  %s4228_s13 = sphi %s4291_s13, %s19_s13   ;;  %s4224_s12 = sphi %s4289_s12, %s5919_s12   ;;  %s4220_s11 = sphi %s4287_s11, %s5918_s11   ;;  %s4216_s10 = sphi %s4285_s10, %s5917_s10   ;;  %s4212_s30 = sphi %s4283_s30, %s5916_s30  }
   0x4   : > { %p29_p0 = scmp.ge.s32.totalorder %s28_s14, 4  ;;  %p3384_p1 = scmp.ge.s32.totalorder %s4228_s13, 1 }
   0x5   : > { %p347_p2 = scmp.lt.s32.totalorder %s4228_s13, 9 }
   0x6   : > { %s5921_s14 = smov (%p29_p0, %s28_s14), 0  ;;  %s5923_s15 = smov (!%p29_p0, %s31_s15), %s4224_s12 }
   0x7   : > { %p348_p3 = pnand %p3384_p1, %p347_p2  ;;  %p33_p4 = scmp.ge.s32.totalorder %s5923_s15, 2 }
   0x8   : > { %p411_p5 = scmp.lt.s32.totalorder (!%p348_p3), %s4216_s10, 1  ;;  %p413_p6 = scmp.lt.s32.totalorder (!%p348_p3), %s4212_s30, 5  ;;  %v452_v0 = vlaneseq (!%p348_p3)  ;;  %v4326_v1 = vld [vmem:[%s5879_s5] ss:$0 sm:$0xff] (!%p348_p3)  ;;  %v5885_v10 = vmov (!%p348_p3), 0   ;;  %vm1237_vm8 = vcmask (!%p348_p3), 523264  }
   0x9   : > { %s5925_s15 = smov (%p33_p4, %s5923_s15), 0  ;;  %351 = sbr.rel (%p348_p3) target bundleno = 767 (0x2ff), region = 56 }
   0xa   : > { %s420_s18 = sadd.s32 (!%p348_p3), 1, %s4212_s30  ;;  %v4329_v2 = vshrl.u32 (!%p348_p3), %v452_v0, 7  ;;  %v4339_v3 = vld [vmem:[%s5880_s6] ss:$0 sm:$0xff] (!%p348_p3)  ;;  %v4348_v11 = vrot.slane (!%p348_p3), %v5885_v10, 1  ;;  %p661_p8 = scmp.ge.s32.totalorder (!%p348_p3), %s4212_s30, 2 }
   0xb   : > { %p423_p7 = scmp.lt.s32.totalorder (!%p348_p3), %s420_s18, 5  ;;  %p879_p9 = scmp.ge.s32.totalorder (!%p348_p3), %s4212_s30, 1  ;;  %vm3234_vm9 = vcmask (!%p348_p3), 519168  }
   0xc   : > { %v4351_v12 = vadd.s32 (!%p348_p3), 8, %v4329_v2  ;;  %vm455_vm0 = vcmp.ge.s32.totalorder (!%p348_p3), %v4329_v2, 1  ;;  %s4231_s24 = smov (!%p348_p3), 64   ;;  %s431_s25 = sadd.s32 (!%p348_p3), 2, %s4212_s30 }
   0xd   : > { %p434_p10 = scmp.lt.s32.totalorder (!%p348_p3), %s431_s25, 5  ;;  %p444_p11 = scmp.lt.s32.totalorder (!%p348_p3), %s4212_s30, 3 }
   0xe   : > { %vm462_vm2 = vcmp.le.s32.totalorder (!%p348_p3), %v4351_v12, 8 }
  0x10   : > { %s5927_s10 = smov (!%p411_p5, %s4216_s10), 1  ;;  %s5929_s18 = smov (!%p423_p7, %s420_s18), 5 }
  0x11   : > { %s414_s16 = scalar_select %p413_p6, %s4212_s30, 5 }
  0x12   : > { %s4320_s17 = smul.u32 120, %s5927_s10  ;;  %s5931_s25 = smov (!%p434_p10, %s431_s25), 5 }
  0x13   : > { %s3804_s19 = smul.u32 20, %s414_s16  ;;  %s5933_s30 = smov (!%p444_p11, %s4212_s30), 3 }
  0x14   : > { %s3806_s29 = smul.u32 20, %s5929_s18 }
  0x15   : > { %s417_s22 = sadd.s32 %s4320_s17, %s3804_s19 }
  0x16   : > { %s3385_s23 = sshll.u32 %s417_s22, 3  ;;  %s427_s16 = sadd.s32 %s3806_s29, %s4320_s17 }
  0x17   : > { %s4334_s26 = scalar_lea.vmem %s5874_s0, %s3385_s23  ;;  %s3386_s18 = sshll.u32 %s427_s16, 3 }
  0x18   : > { %v475_v4 = vld [vmem:[%s4334_s26 + $0x30] sm:$0xff]  ;;  %v476_v5 = vld [vmem:[%s4334_s26 + $0x38] sm:$0x3]  ;;  %v477_v15 = vld [vmem:[%s4334_s26 + $0x40] sm:$0xff]  ;;  %s4400_s21 = scalar_lea.vmem %s5875_s1, %s3386_s18 }
  0x19   : > { %v501_v6 = vmul.f32 %v4326_v1, %v475_v4  ;;  %v502_v7 = vmul.f32 %v4326_v1, %v476_v5  ;;  %v471_v8 = vld [vmem:[%s4334_s26 + $0x10] sm:$0xff]  ;;  %v472_v9 = vld [vmem:[%s4334_s26 + $0x18] sm:$0x3]  ;;  %v478_v16 = vld [vmem:[%s4334_s26 + $0x48] sm:$0x3]  ;;  %v503_v20 = vmul.f32 %v4326_v1, %v477_v15 }
  0x1a   : > { %v497_v13 = vmul.f32 %v4326_v1, %v471_v8  ;;  %v498_v14 = vmul.f32 %v4326_v1, %v472_v9  ;;  %v473_v17 = vld [vmem:[%s4334_s26 + $0x20] sm:$0xff]  ;;  %v504_v21 = vmul.f32 %v4326_v1, %v478_v16  ;;  %v474_v22 = vld [vmem:[%s4334_s26 + $0x28] sm:$0x3]  ;;  %v479_v37 = vld [vmem:[%s4334_s26 + $0x50] sm:$0xff]  ;;  %s4418_s22 = scalar_select %p661_p8, 1, 0 }
  0x1b   : > { %v4359_v18 = vadd.f32 %v4339_v3, %v501_v6  ;;  %v4362_v19 = vadd.f32 %v4339_v3, %v502_v7  ;;  %v499_v25 = vmul.f32 %v4326_v1, %v473_v17  ;;  %v500_v26 = vmul.f32 %v4326_v1, %v474_v22  ;;  %v481_v31 = vld [vmem:[%s4334_s26 + $0x60] sm:$0xff]  ;;  %v482_v32 = vld [vmem:[%s4334_s26 + $0x68] sm:$0x3]  ;;  %v480_v38 = vld [vmem:[%s4334_s26 + $0x58] sm:$0x3] }
  0x1c   : > { %v4369_v23 = vadd.f32 %v4339_v3, %v497_v13  ;;  %v4372_v24 = vadd.f32 %v4339_v3, %v498_v14  ;;  %v4380_v29 = vadd.f32 %v4339_v3, %v503_v20  ;;  %v4383_v30 = vadd.f32 %v4339_v3, %v504_v21  ;;  %v701_v50 = vld [vmem:[%s4400_s21 + $0x10] sm:$0xff]  ;;  %v702_v54 = vld [vmem:[%s4400_s21 + $0x18] sm:$0x3]  ;;  %s4434_s23 = scalar_select %p879_p9, 1, 0  ;;  %v485_v6 = vld [vmem:[%s4334_s26 + $0x80] sm:$0xff] }
  0x1d   : > { %v547_v27 = vsub.f32 0.0, %v4359_v18  ;;  %v548_v28 = vsub.f32 0.0, %v4362_v19  ;;  %v4390_v35 = vadd.f32 %v4339_v3, %v499_v25  ;;  %v4393_v36 = vadd.f32 %v4339_v3, %v500_v26  ;;  %v486_v7 = vld [vmem:[%s4334_s26 + $0x88] sm:$0x3]  ;;  %v483_v8 = vld [vmem:[%s4334_s26 + $0x70] sm:$0xff]  ;;  %v703_v16 = vld [vmem:[%s4400_s21 + $0x20] sm:$0xff] }
  0x1e   : > { %v543_v33 = vsub.f32 0.0, %v4369_v23  ;;  %v544_v34 = vsub.f32 0.0, %v4372_v24  ;;  %v549_v41 = vsub.f32 0.0, %v4380_v29  ;;  %v550_v42 = vsub.f32 0.0, %v4383_v30  ;;  %v484_v15 = vld [vmem:[%s4334_s26 + $0x78] sm:$0x3] }
  0x1f   : > { %v573_v39 = vmul.f32 1.442695, %v547_v27  ;;  %v575_v40 = vmul.f32 1.442695, %v548_v28  ;;  %v545_v45 = vsub.f32 0.0, %v4390_v35  ;;  %v546_v46 = vsub.f32 0.0, %v4393_v36 }
  0x20   : > { %v565_v43 = vmul.f32 1.442695, %v543_v33  ;;  %v567_v44 = vmul.f32 1.442695, %v544_v34  ;;  %v577_v47 = vmul.f32 1.442695, %v549_v41  ;;  %v507_v49 = vmul.f32 %v4326_v1, %v481_v31 }
  0x21   : > { %3964 = vpow2.f32 %v573_v39  ;;  %v579_v48 = vmul.f32 1.442695, %v550_v42  ;;  %v569_v51 = vmul.f32 1.442695, %v545_v45  ;;  %v571_v52 = vmul.f32 1.442695, %v546_v46 }
  0x22   : > { %3966 = vpow2.f32 %v575_v40  ;;  %v508_v53 = vmul.f32 %v4326_v1, %v482_v32  ;;  %v4412_v55 = vadd.f32 %v4339_v3, %v507_v49  ;;  %v505_v56 = vmul.f32 %v4326_v1, %v479_v37  ;;  %s3807_s26 = smul.u32 20, %s5931_s25 }
  0x23   : > { %3968 = vpow2.f32 %v565_v43  ;;  %v506_v57 = vmul.f32 %v4326_v1, %v480_v38  ;;  %v721_v59 = vmul.f32 %v4326_v1, %v701_v50  ;;  %v722_v60 = vmul.f32 %v4326_v1, %v702_v54 }
  0x24   : > { %3970 = vpow2.f32 %v567_v44  ;;  %v4421_v58 = vadd.f32 %v4339_v3, %v508_v53  ;;  %v553_v61 = vsub.f32 0.0, %v4412_v55  ;;  %v4427_v62 = vadd.f32 %v4339_v3, %v505_v56  ;;  %s438_s27 = sadd.s32 %s3807_s26, %s4320_s17  ;;  %s3389_s17 = sshll.u32 %s5927_s10, 5 }
  0x25   : > { %3972 = vpow2.f32 %v577_v47  ;;  %v4430_v63 = vadd.f32 %v4339_v3, %v506_v57  ;;  %v4438_v4 = vadd.f32 %v4339_v3, %v721_v59  ;;  %v4441_v5 = vadd.f32 %v4339_v3, %v722_v60  ;;  %v706_v57 = vld [vmem:[%s4400_s21 + $0x38] sm:$0x3]  ;;  %s3387_s28 = sshll.u32 %s438_s27, 3 }
  0x26   : > { %3974 = vpow2.f32 %v579_v48  ;;  %v554_v0 = vsub.f32 0.0, %v4421_v58  ;;  %v585_v9 = vmul.f32 1.442695, %v553_v61  ;;  %v551_v13 = vsub.f32 0.0, %v4427_v62  ;;  %s4822_s25 = scalar_lea.vmem %s5876_s2, %s3387_s28 }
  0x27   : > { %3976 = vpow2.f32 %v569_v51  ;;  %v552_v14 = vsub.f32 0.0, %v4430_v63  ;;  %v761_v20 = vsub.f32 0.0, %v4438_v4  ;;  %v762_v21 = vsub.f32 0.0, %v4441_v5  ;;  %v704_v51 = vld [vmem:[%s4400_s21 + $0x28] sm:$0x3] }
  0x28   : > { %3978 = vpow2.f32 %v571_v52  ;;  %v587_v17 = vmul.f32 1.442695, %v554_v0  ;;  %v663_v22 = vstv %s4418_s22  ;;  %v581_v25 = vmul.f32 1.442695, %v551_v13  ;;  %v705_v13 = vld [vmem:[%s4400_s21 + $0x30] sm:$0xff] }
  0x29   : > { %3980 = vpow2.f32 %v585_v9  ;;  %v583_v26 = vmul.f32 1.442695, %v552_v14  ;;  %v783_v27 = vmul.f32 1.442695, %v761_v20  ;;  %v4453_v28 = vmul.f32 1.442695, %v762_v21 }
  0x2a   : > { %3982 = vpow2.f32 %v587_v17  ;;  %v881_v31 = vstv %s4434_s23  ;;  %v511_v33 = vmul.f32 %v4326_v1, %v485_v6  ;;  %v512_v34 = vmul.f32 %v4326_v1, %v486_v7 }
  0x2b   : > { %v3965_v32 = vpop.eup %3964  ;;  %3984 = vpow2.f32 %v581_v25  ;;  %v509_v37 = vmul.f32 %v4326_v1, %v483_v8  ;;  %v510_v40 = vmul.f32 %v4326_v1, %v484_v15  ;;  %v723_v41 = vmul.f32 %v4326_v1, %v703_v16 }
  0x2c   : > { %v3967_v38 = vpop.eup %3966  ;;  %v607_v39 = vadd.f32 1.0, %v3965_v32  ;;  %3986 = vpow2.f32 %v583_v26  ;;  %vm4462_vm1 = vcmp.eq.s32.totalorder %v663_v22, 1  ;;  %v4467_v45 = vadd.f32 %v4339_v3, %v511_v33 }
  0x2d   : > { %v3969_v42 = vpop.eup %3968  ;;  %v608_v43 = vadd.f32 1.0, %v3967_v38  ;;  %3988 = vpow2.f32 %v783_v27  ;;  %v4470_v46 = vadd.f32 %v4339_v3, %v512_v34  ;;  %v4474_v49 = vadd.f32 %v4339_v3, %v509_v37  ;;  %vm4517_vm3 = vmand %vm455_vm0, %vm4462_vm1 }
  0x2e   : > { %v3971_v47 = vpop.eup %3970  ;;  %3990 = vrcp.f32 %v607_v39  ;;  %v603_v48 = vadd.f32 1.0, %v3969_v42  ;;  %v4477_v50 = vadd.f32 %v4339_v3, %v510_v40  ;;  %v557_v54 = vsub.f32 0.0, %v4467_v45  ;;  %vm4528_vm4 = vmand %vm462_vm2, %vm4462_vm1 }
  0x2f   : > { %v3973_v52 = vpop.eup %3972  ;;  %3992 = vrcp.f32 %v608_v43  ;;  %v604_v53 = vadd.f32 1.0, %v3971_v47  ;;  %v558_v56 = vsub.f32 0.0, %v4470_v46  ;;  %v555_v61 = vsub.f32 0.0, %v4474_v49  ;;  %v707_v47 = vld [vmem:[%s4400_s21 + $0x40] sm:$0xff] }
  0x30   : > { %v3975_v59 = vpop.eup %3974  ;;  %3994 = vrcp.f32 %v603_v48  ;;  %v609_v60 = vadd.f32 1.0, %v3973_v52  ;;  %v556_v0 = vsub.f32 0.0, %v4477_v50  ;;  %v593_v8 = vmul.f32 1.442695, %v557_v54  ;;  %v708_v48 = vld [vmem:[%s4400_s21 + $0x48] sm:$0x3] }
  0x31   : > { %v3977_v6 = vpop.eup %3976  ;;  %3996 = vrcp.f32 %v604_v53  ;;  %v610_v7 = vadd.f32 1.0, %v3975_v59  ;;  %v4485_v9 = vmul.f32 1.442695, %v558_v56  ;;  %v4488_v16 = vmul.f32 1.442695, %v555_v61 }
  0x32   : > { %v3979_v14 = vpop.eup %3978  ;;  %3998 = vrcp.f32 %v609_v60  ;;  %v605_v15 = vadd.f32 1.0, %v3977_v6  ;;  %v4490_v17 = vmul.f32 1.442695, %v556_v0  ;;  %v724_v22 = vmul.f32 %v4326_v1, %v704_v51 }
  0x33   : > { %v3981_v20 = vpop.eup %3980  ;;  %4000 = vrcp.f32 %v610_v7  ;;  %v606_v21 = vadd.f32 1.0, %v3979_v14  ;;  %v4494_v25 = vadd.f32 %v4339_v3, %v723_v41  ;;  %v725_v32 = vmul.f32 %v4326_v1, %v705_v13 }
  0x34   : > { %v3983_v26 = vpop.eup %3982  ;;  %4002 = vrcp.f32 %v605_v15  ;;  %v613_v27 = vadd.f32 1.0, %v3981_v20  ;;  %v726_v33 = vmul.f32 %v4326_v1, %v706_v57  ;;  %v4499_v38 = vadd.f32 %v4339_v3, %v724_v22 }
  0x35   : > { %v3985_v34 = vpop.eup %3984  ;;  %4004 = vrcp.f32 %v606_v21  ;;  %v614_v37 = vadd.f32 1.0, %v3983_v26  ;;  %v763_v39 = vsub.f32 0.0, %v4494_v25  ;;  %v4503_v42 = vadd.f32 %v4339_v3, %v725_v32 }
  0x36   : > { %v3987_v40 = vpop.eup %3986  ;;  %4006 = vrcp.f32 %v613_v27  ;;  %v611_v41 = vadd.f32 1.0, %v3985_v34  ;;  %v4506_v43 = vadd.f32 %v4339_v3, %v726_v33  ;;  %v764_v53 = vsub.f32 0.0, %v4499_v38 }
  0x37   : > { %v3989_v51 = vpop.eup %3988  ;;  %4008 = vrcp.f32 %v614_v37  ;;  %v612_v52 = vadd.f32 1.0, %v3987_v40  ;;  %v4511_v54 = vmul.f32 1.442695, %v763_v39  ;;  %v765_v60 = vsub.f32 0.0, %v4503_v42 }
  0x38   : > { %v3991_v56 = vpop.eup %3990  ;;  %4010 = vrcp.f32 %v611_v41  ;;  %v821_v59 = vadd.f32 1.0, %v3989_v51  ;;  %v766_v61 = vsub.f32 0.0, %v4506_v43  ;;  %v4532_v13 = vmul.f32 1.442695, %v764_v53 }
  0x39   : > { %v3993_v0 = vpop.eup %3992  ;;  %v647_v6 = vmul.f32 %v3991_v56, %v4359_v18  ;;  %4012 = vrcp.f32 %v612_v52  ;;  %v727_v14 = vmul.f32 %v4326_v1, %v707_v47  ;;  %v4537_v18 = vmul.f32 1.442695, %v765_v60 }
  0x3a   : > { %v3995_v15 = vpop.eup %3994  ;;  %v648_v20 = vmul.f32 %v3993_v0, %v4362_v19  ;;  %4014 = vpow2.f32 %v4453_v28  ;;  %v4539_v44 = vmul.f32 1.442695, %v766_v61  ;;  %v728_v27 = vmul.f32 %v4326_v1, %v708_v48 }
  0x3b   : > { %v3997_v21 = vpop.eup %3996  ;;  %v675_v22 = vsel %vm4517_vm3, %v647_v6, 0.0  ;;  %v643_v26 = vmul.f32 %v3995_v15, %v4369_v23  ;;  %4016 = vrcp.f32 %v821_v59  ;;  %vm4550_vm5 = vcmp.eq.s32.totalorder %v881_v31, 1 }
  0x3c   : > { %v3999_v32 = vpop.eup %3998  ;;  %v676_v33 = vsel %vm4528_vm4, %v648_v20, 0.0  ;;  %v644_v19 = vmul.f32 %v3997_v21, %v4372_v24  ;;  %4018 = vpow2.f32 %v593_v8  ;;  %v4555_v34 = vadd.f32 %v4339_v3, %v727_v14  ;;  %vm4617_vm6 = vmand %vm455_vm0, %vm4550_vm5 }
  0x3d   : > { %v4001_v37 = vpop.eup %4000  ;;  %v4557_v23 = vpack.c.bf16 %v676_v33, %v675_v22  ;;  %v671_v39 = vsel %vm4517_vm3, %v643_v26, 0.0  ;;  %v649_v40 = vmul.f32 %v3999_v32, %v4380_v29  ;;  %4020 = vpow2.f32 %v4485_v9  ;;  %vm4671_vm7 = vmand %vm462_vm2, %vm4550_vm5 }
  0x3e   : > { %v4003_v24 = vpop.eup %4002  ;;  %v672_v31 = vsel %vm4528_vm4, %v644_v19, 0.0  ;;  %v650_v41 = vmul.f32 %v4001_v37, %v4383_v30  ;;  %4022 = vpow2.f32 %v4488_v16  ;;  %v4568_v8 = vadd.f32 %v4339_v3, %v728_v27 }
  0x3f   : > { %v4005_v47 = vpop.eup %4004  ;;  %v1149_v48 = vshrl.u32 %v4557_v23, 16  ;;  %v1151_v51 = vshll.u32 %v4557_v23, 16  ;;  %v4572_v52 = vpack.c.bf16 %v672_v31, %v671_v39  ;;  %v677_v29 = vsel %vm4517_vm3, %v649_v40, 0.0 }
  0x40   : > { %v4007_v9 = vpop.eup %4006  ;;  %v678_v53 = vsel %vm4528_vm4, %v650_v41, 0.0  ;;  %v645_v30 = vmul.f32 %v4003_v24, %v4390_v35  ;;  %v646_v16 = vmul.f32 %v4005_v47, %v4393_v36  ;;  %4024 = vpow2.f32 %v4490_v17 }
  0x41   : > { %v4009_v56 = vpop.eup %4008  ;;  %v1153_v59 = vrot.slane %v1151_v51, 1  ;;  %v1135_v60 = vshrl.u32 %v4572_v52, 16  ;;  %v1137_v61 = vshll.u32 %v4572_v52, 16  ;;  %v4583_v0 = vpack.c.bf16 %v678_v53, %v677_v29 }
  0x42   : > { %v4011_v6 = vpop.eup %4010  ;;  %v673_v14 = vsel %vm4517_vm3, %v645_v30, 0.0  ;;  %v674_v15 = vsel %vm4528_vm4, %v646_v16, 0.0  ;;  %v653_v35 = vmul.f32 %v4007_v9, %v4412_v55  ;;  %v654_v36 = vmul.f32 %v4009_v56, %v4421_v58  ;;  %v3856_v30 = vld [vmem:[%s5877_s3 + $0x40] sm:$0xff]  }
  0x43   : > { %v4013_v17 = vpop.eup %4012  ;;  %v1154_v20 = vor.u32 %v1153_v59, %v1149_v48  ;;  %v1139_v21 = vrot.slane %v1137_v61, 1  ;;  %v1156_v22 = vshrl.u32 %v4583_v0, 16  ;;  %v1158_v26 = vshll.u32 %v4583_v0, 16  ;;  %v711_v61 = vld [vmem:[%s4400_s21 + $0x60] sm:$0xff]  ;;  %3564 = vmatprep.subr.bf16.mxu1 %v3856_v30 }
  0x44   : > { %v4015_v27 = vpop.eup %4014  ;;  %v4593_v32 = vpack.c.bf16 %v674_v15, %v673_v14  ;;  %v681_v33 = vsel %vm4517_vm3, %v653_v35, 0.0  ;;  %v682_v19 = vsel %vm4528_vm4, %v654_v36, 0.0  ;;  %v651_v55 = vmul.f32 %v4011_v6, %v4427_v62  ;;  %v712_v36 = vld [vmem:[%s4400_s21 + $0x68] sm:$0x3] }
  0x45   : > { %v4017_v37 = vpop.eup %4016  ;;  %1203 = vrot.lane.b32.xlu1 %v1154_v20, %s4231_s24  ;;  %v1140_v58 = vor.u32 %v1139_v21, %v1135_v60  ;;  %v1160_v39 = vrot.slane %v1158_v26, 1  ;;  %v4601_v40 = vpack.c.bf16 %v682_v19, %v681_v33  ;;  %v652_v24 = vmul.f32 %v4013_v17, %v4430_v63  ;;  %v709_v26 = vld [vmem:[%s4400_s21 + $0x50] sm:$0xff] }
  0x46   : > { %v4019_v31 = vpop.eup %4018  ;;  %v1142_v41 = vshrl.u32 %v4593_v32, 16  ;;  %v1144_v47 = vshll.u32 %v4593_v32, 16  ;;  %v679_v48 = vsel %vm4517_vm3, %v651_v55, 0.0  ;;  %v822_v62 = vadd.f32 1.0, %v4015_v27  ;;  %v710_v27 = vld [vmem:[%s4400_s21 + $0x58] sm:$0x3] }
  0x47   : > { %v4021_v51 = vpop.eup %4020  ;;  %1199 = vrot.lane.b32.xlu0 %v1140_v58, %s4231_s24  ;;  %v1161_v29 = vor.u32 %v1160_v39, %v1156_v22  ;;  %v1170_v9 = vshrl.u32 %v4601_v40, 16  ;;  %v1172_v53 = vshll.u32 %v4601_v40, 16  ;;  %v680_v63 = vsel %vm4528_vm4, %v652_v24, 0.0  ;;  %v714_v58 = vld [vmem:[%s4400_s21 + $0x78] sm:$0x3] }
  0x48   : > { %v4023_v16 = vpop.eup %4022  ;;  %v1146_v56 = vrot.slane %v1144_v47, 1  ;;  %v4621_v59 = vpack.c.bf16 %v680_v63, %v679_v48  ;;  %4026 = vrcp.f32 %v822_v62  ;;  %v4624_v60 = vmul.f32 %v4017_v37, %v4438_v4  ;;  %v713_v37 = vld [vmem:[%s4400_s21 + $0x70] sm:$0xff] }
  0x49   : > { %1205 = vrot.lane.b32.xlu1 %v1161_v29, %s4231_s24  ;;  %v1174_v6 = vrot.slane %v1172_v53, 1  ;;  %v617_v14 = vadd.f32 1.0, %v4019_v31  ;;  %v618_v15 = vadd.f32 1.0, %v4021_v51  ;;  %v615_v35 = vadd.f32 1.0, %v4023_v16 }
  0x4a   : > { %v4025_v17 = vpop.eup %4024  ;;  %v1147_v20 = vor.u32 %v1146_v56, %v1142_v41  ;;  %v1163_v21 = vshrl.u32 %v4621_v59, 16  ;;  %v1165_v22 = vshll.u32 %v4621_v59, 16  ;;  %v889_v4 = vsel %vm4617_vm6, %v4624_v60, 0.0 }
  0x4b   : > { %v1175_v33 = vor.u32 %v1174_v6, %v1170_v9  ;;  %4028 = vrcp.f32 %v617_v14  ;;  %v616_v19 = vadd.f32 1.0, %v4025_v17  ;;  %v767_v55 = vsub.f32 0.0, %v4555_v34 }
  0x4c   : > { %1201 = vrot.lane.b32.xlu0 %v1147_v20, %s4231_s24  ;;  %v1167_v39 = vrot.slane %v1165_v22, 1  ;;  %4030 = vrcp.f32 %v618_v15  ;;  %v768_v24 = vsub.f32 0.0, %v4568_v8  ;;  %v731_v31 = vmul.f32 %v4326_v1, %v711_v61 }
  0x4d   : > { %1209 = vrot.lane.b32.xlu1 %v1175_v33, %s4231_s24  ;;  %4032 = vrcp.f32 %v615_v35  ;;  %v795_v41 = vmul.f32 1.442695, %v767_v55  ;;  %v732_v47 = vmul.f32 %v4326_v1, %v712_v36  ;;  %v729_v48 = vmul.f32 %v4326_v1, %v709_v26 }
  0x4e   : > { %v1168_v62 = vor.u32 %v1167_v39, %v1163_v21  ;;  %4034 = vrcp.f32 %v616_v19  ;;  %v797_v51 = vmul.f32 1.442695, %v768_v24  ;;  %v4646_v29 = vadd.f32 %v4339_v3, %v731_v31 }
  0x4f   : > { %4036 = vpow2.f32 %v4511_v54  ;;  %v4650_v9 = vadd.f32 %v4339_v3, %v732_v47  ;;  %v730_v53 = vmul.f32 %v4326_v1, %v710_v27  ;;  %v4654_v63 = vadd.f32 %v4339_v3, %v729_v48 }
  0x50   : > { %1207 = vrot.lane.b32.xlu0 %v1168_v62, %s4231_s24  ;;  %4038 = vpow2.f32 %v4532_v13  ;;  %v771_v16 = vsub.f32 0.0, %v4646_v29  ;;  %v733_v56 = vmul.f32 %v4326_v1, %v713_v37  ;;  %v734_v60 = vmul.f32 %v4326_v1, %v714_v58  ;;  %v3858_v13 = vld [vmem:[%s5877_s3 + $0x48] sm:$0xff]  }
  0x51   : > { %4040 = vpow2.f32 %v4537_v18  ;;  %v772_v54 = vsub.f32 0.0, %v4650_v9  ;;  %v4664_v61 = vadd.f32 %v4339_v3, %v730_v53  ;;  %v769_v6 = vsub.f32 0.0, %v4654_v63 }
  0x52   : > { %v4027_v14 = vpop.eup %4026  ;;  %4042 = vpow2.f32 %v4539_v44  ;;  %v803_v15 = vmul.f32 1.442695, %v771_v16  ;;  %v4677_v18 = vadd.f32 %v4339_v3, %v733_v56  ;;  %v4680_v35 = vadd.f32 %v4339_v3, %v734_v60  ;;  %v715_v60 = vld [vmem:[%s4400_s21 + $0x80] sm:$0xff] }
  0x53   : > { %v862_v36 = vmul.f32 %v4027_v14, %v4441_v5  ;;  %4044 = vpow2.f32 %v795_v41  ;;  %v805_v17 = vmul.f32 1.442695, %v772_v54  ;;  %v770_v28 = vsub.f32 0.0, %v4664_v61  ;;  %v716_v54 = vld [vmem:[%s4400_s21 + $0x88] sm:$0x3] }
  0x54   : > { %1358 = vrot.lane.b32.xlu0 %v4348_v11, %s4231_s24  ;;  %4046 = vpow2.f32 %v797_v51  ;;  %v799_v20 = vmul.f32 1.442695, %v769_v6  ;;  %v773_v44 = vsub.f32 0.0, %v4677_v18  ;;  %v774_v21 = vsub.f32 0.0, %v4680_v35 }
  0x55   : > { %v4029_v22 = vpop.eup %4028  ;;  %v890_v26 = vsel %vm4671_vm7, %v862_v36, 0.0  ;;  %4048 = vpow2.f32 %v803_v15  ;;  %v801_v27 = vmul.f32 1.442695, %v770_v28 }
  0x56   : > { %v4031_v5 = vpop.eup %4030  ;;  %v4690_v33 = vpack.c.bf16 %v890_v26, %v889_v4  ;;  %v657_v19 = vmul.f32 %v4029_v22, %v4467_v45  ;;  %4050 = vpow2.f32 %v805_v17  ;;  %v807_v58 = vmul.f32 1.442695, %v773_v44 }
  0x57   : > { %v4033_v55 = vpop.eup %4032  ;;  %v658_v37 = vmul.f32 %v4031_v5, %v4470_v46  ;;  %4052 = vpow2.f32 %v799_v20  ;;  %v4694_v39 = vmul.f32 1.442695, %v774_v21  ;;  %v735_v21 = vmul.f32 %v4326_v1, %v715_v60 }
  0x58   : > { %v4035_v24 = vpop.eup %4034  ;;  %v1296_v31 = vshrl.u32 %v4690_v33, 16  ;;  %v1298_v41 = vshll.u32 %v4690_v33, 16  ;;  %v685_v4 = vsel %vm4517_vm3, %v657_v19, 0.0  ;;  %v655_v45 = vmul.f32 %v4033_v55, %v4474_v49 }
  0x59   : > { %v4037_v47 = vpop.eup %4036  ;;  %v686_v46 = vsel %vm4528_vm4, %v658_v37, 0.0  ;;  %v656_v48 = vmul.f32 %v4035_v24, %v4477_v50  ;;  %4054 = vpow2.f32 %v801_v27  ;;  %v736_v37 = vmul.f32 %v4326_v1, %v716_v54 }
  0x5a   : > { %v4039_v62 = vpop.eup %4038  ;;  %v1300_v51 = vrot.slane %v1298_v41, 1  ;;  %v4704_v53 = vpack.c.bf16 %v686_v46, %v685_v4  ;;  %v683_v16 = vsel %vm4517_vm3, %v655_v45, 0.0  ;;  %v823_v56 = vadd.f32 1.0, %v4037_v47 }
  0x5b   : > { %v4041_v6 = vpop.eup %4040  ;;  %v684_v49 = vsel %vm4528_vm4, %v656_v48, 0.0  ;;  %v824_v14 = vadd.f32 1.0, %v4039_v62  ;;  %4056 = vpow2.f32 %v807_v58  ;;  %v4722_v47 = vadd.f32 %v4339_v3, %v735_v21 }
  0x5c   : > { %v4043_v15 = vpop.eup %4042  ;;  %v1301_v36 = vor.u32 %v1300_v51, %v1296_v31  ;;  %v1184_v50 = vshrl.u32 %v4704_v53, 16  ;;  %v1186_v17 = vshll.u32 %v4704_v53, 16  ;;  %v4714_v28 = vpack.c.bf16 %v684_v49, %v683_v16 }
  0x5d   : > { %v4045_v20 = vpop.eup %4044  ;;  %4058 = vrcp.f32 %v823_v56  ;;  %v825_v57 = vadd.f32 1.0, %v4041_v6  ;;  %v826_v44 = vadd.f32 1.0, %v4043_v15  ;;  %v4725_v46 = vadd.f32 %v4339_v3, %v736_v37 }
  0x5e   : > { %v4047_v22 = vpop.eup %4046  ;;  %1360 = vrot.lane.b32.xlu1 %v1301_v36, %s4231_s24  ;;  %v1188_v7 = vrot.slane %v1186_v17, 1  ;;  %v1177_v26 = vshrl.u32 %v4714_v28, 16  ;;  %v1179_v27 = vshll.u32 %v4714_v28, 16  ;;  %4060 = vrcp.f32 %v824_v14 }
  0x5f   : > { %v4049_v5 = vpop.eup %4048  ;;  %4062 = vrcp.f32 %v825_v57  ;;  %v827_v19 = vadd.f32 1.0, %v4045_v20  ;;  %v828_v55 = vadd.f32 1.0, %v4047_v22  ;;  %v775_v51 = vsub.f32 0.0, %v4722_v47 }
  0x60   : > { %v4051_v58 = vpop.eup %4050  ;;  %v1189_v24 = vor.u32 %v1188_v7, %v1184_v50  ;;  %v1181_v31 = vrot.slane %v1179_v27, 1  ;;  %4064 = vrcp.f32 %v826_v44  ;;  %v831_v41 = vadd.f32 1.0, %v4049_v5 }
  0x61   : > { %v4053_v4 = vpop.eup %4052  ;;  %4066 = vrcp.f32 %v827_v19  ;;  %v832_v45 = vadd.f32 1.0, %v4051_v58  ;;  %v776_v16 = vsub.f32 0.0, %v4725_v46  ;;  %v811_v54 = vmul.f32 1.442695, %v775_v51 }
  0x62   : > { %1213 = vrot.lane.b32.xlu1 %v1189_v24, %s4231_s24  ;;  %v1182_v48 = vor.u32 %v1181_v31, %v1177_v26  ;;  %4068 = vrcp.f32 %v828_v55  ;;  %v829_v62 = vadd.f32 1.0, %v4053_v4 }
  0x63   : > { %v4055_v1 = vpop.eup %4054  ;;  %4070 = vrcp.f32 %v831_v41  ;;  %v813_v3 = vmul.f32 1.442695, %v776_v16 }
  0x64   : > { %1211 = vrot.lane.b32.xlu0 %v1182_v48, %s4231_s24  ;;  %4072 = vrcp.f32 %v832_v45  ;;  %v830_v56 = vadd.f32 1.0, %v4055_v1 }
  0x65   : > { %v4057_v60 = vpop.eup %4056  ;;  %4074 = vrcp.f32 %v829_v62 }
  0x66   : > { %4076 = vrcp.f32 %v830_v56  ;;  %v833_v21 = vadd.f32 1.0, %v4057_v60 }
  0x67   : > { %v4059_v6 = vpop.eup %4058  ;;  %4078 = vpow2.f32 %v4694_v39 }
  0x68   : > { %v4061_v49 = vpop.eup %4060  ;;  %v863_v14 = vmul.f32 %v4059_v6, %v4494_v25  ;;  %4080 = vpow2.f32 %v811_v54 }
  0x69   : > { %v4063_v15 = vpop.eup %4062  ;;  %v864_v36 = vmul.f32 %v4061_v49, %v4499_v38  ;;  %4082 = vpow2.f32 %v813_v3 }
  0x6a   : > { %v4065_v50 = vpop.eup %4064  ;;  %v891_v17 = vsel %vm4617_vm6, %v863_v14, 0.0  ;;  %v865_v20 = vmul.f32 %v4063_v15, %v4503_v42  ;;  %4084 = vrcp.f32 %v833_v21 }
  0x6b   : > { %v4067_v57 = vpop.eup %4066  ;;  %v892_v44 = vsel %vm4671_vm7, %v864_v36, 0.0  ;;  %v866_v39 = vmul.f32 %v4065_v50, %v4506_v43 }
  0x6c   : > { %v4069_v22 = vpop.eup %4068  ;;  %v4740_v25 = vpack.c.bf16 %v892_v44, %v891_v17  ;;  %v893_v38 = vsel %vm4617_vm6, %v865_v20, 0.0  ;;  %v867_v7 = vmul.f32 %v4067_v57, %v4555_v34 }
  0x6d   : > { %v4071_v26 = vpop.eup %4070  ;;  %v894_v42 = vsel %vm4671_vm7, %v866_v39, 0.0  ;;  %v868_v27 = vmul.f32 %v4069_v22, %v4568_v8 }
  0x6e   : > { %v4073_v5 = vpop.eup %4072  ;;  %v1303_v19 = vshrl.u32 %v4740_v25, 16  ;;  %v1305_v43 = vshll.u32 %v4740_v25, 16  ;;  %v4750_v55 = vpack.c.bf16 %v894_v42, %v893_v38  ;;  %v895_v37 = vsel %vm4617_vm6, %v867_v7, 0.0 }
  0x6f   : > { %v4075_v58 = vpop.eup %4074  ;;  %v896_v34 = vsel %vm4671_vm7, %v868_v27, 0.0  ;;  %v871_v24 = vmul.f32 %v4071_v26, %v4646_v29  ;;  %v872_v31 = vmul.f32 %v4073_v5, %v4650_v9 }
  0x70   : > { %v4077_v8 = vpop.eup %4076  ;;  %v1307_v41 = vrot.slane %v1305_v43, 1  ;;  %v1310_v4 = vshrl.u32 %v4750_v55, 16  ;;  %v1312_v45 = vshll.u32 %v4750_v55, 16  ;;  %v4760_v48 = vpack.c.bf16 %v896_v34, %v895_v37 }
  0x71   : > { %v4079_v62 = vpop.eup %4078  ;;  %v899_v1 = vsel %vm4617_vm6, %v871_v24, 0.0  ;;  %v900_v51 = vsel %vm4671_vm7, %v872_v31, 0.0  ;;  %v869_v29 = vmul.f32 %v4075_v58, %v4654_v63  ;;  %v870_v9 = vmul.f32 %v4077_v8, %v4664_v61 }
  0x72   : > { %v1308_v16 = vor.u32 %v1307_v41, %v1303_v19  ;;  %v1314_v56 = vrot.slane %v1312_v45, 1  ;;  %v1317_v60 = vshrl.u32 %v4760_v48, 16  ;;  %v1319_v54 = vshll.u32 %v4760_v48, 16  ;;  %v4081_v3 = vpop.eup %4080 }
  0x73   : > { %v4770_v6 = vpack.c.bf16 %v900_v51, %v899_v1  ;;  %v897_v49 = vsel %vm4617_vm6, %v869_v29, 0.0  ;;  %v898_v14 = vsel %vm4671_vm7, %v870_v9, 0.0  ;;  %v834_v15 = vadd.f32 1.0, %v4079_v62  ;;  %v4083_v36 = vpop.eup %4082  ;;  %v3859_v51 = vld [vmem:[%s5877_s3 + $0x8] sm:$0xff]   ;;  %v3865_v29 = vld [vmem:[%s5877_s3 + $0x140] sm:$0xff]  }
  0x74   : > { %1362 = vrot.lane.b32.xlu0 %v1308_v16, %s4231_s24  ;;  %v1315_v63 = vor.u32 %v1314_v56, %v1310_v4  ;;  %v1321_v61 = vrot.slane %v1319_v54, 1  ;;  %v4777_v50 = vpack.c.bf16 %v898_v14, %v897_v49  ;;  %v835_v57 = vadd.f32 1.0, %v4081_v3  ;;  %v4085_v26 = vpop.eup %4084  ;;  %v3867_v9 = vld [vmem:[%s5877_s3 + $0x100] sm:$0xff]   ;;  %v3860_v16 = vld [vmem:[%s5877_s3 + $0x50] sm:$0xff]   ;;  %v3869_v56 = vld [vmem:[%s5877_s3 + $0x148] sm:$0xff]   ;;  %3644 = vmatprep.subr.bf16.mxu0 %v3865_v29 }
  0x75   : > { %v1331_v17 = vshrl.u32 %v4770_v6, 16  ;;  %v1333_v20 = vshll.u32 %v4770_v6, 16  ;;  %4086 = vrcp.f32 %v834_v15  ;;  %v836_v38 = vadd.f32 1.0, %v4083_v36  ;;  %3645 = vmatpush3.bf16.msra.mxu0 %v3867_v9  ;;  %v3871_v54 = vld [vmem:[%s5877_s3 + $0x108] sm:$0xff]   ;;  %v3861_v3 = vld [vmem:[%s5877_s3 + $0x10] sm:$0xff]   ;;  %v3862_v14 = vld [vmem:[%s5877_s3 + $0x58] sm:$0xff]  }
  0x76   : > { %1364 = vrot.lane.b32.xlu1 %v1315_v63, %s4231_s24  ;;  %v1322_v44 = vor.u32 %v1321_v61, %v1317_v60  ;;  %v1324_v39 = vshrl.u32 %v4777_v50, 16  ;;  %v1326_v21 = vshll.u32 %v4777_v50, 16  ;;  %4088 = vrcp.f32 %v835_v57  ;;  %v919_v60 = vld [vmem:[%s4822_s25 + $0x10] sm:$0xff]  ;;  %3646 = vmatprep.subr.bf16.mxu0 %v3869_v56  ;;  %v4855_v15 = vld [vmem:[%s5879_s5] ss:$0 sm:$0xff]  ;;  %v3863_v63 = vld [vmem:[%s5877_s3 + $0x18] sm:$0xff]  }
  0x77   : > { %v1335_v22 = vrot.slane %v1333_v20, 1  ;;  %4090 = vrcp.f32 %v836_v38  ;;  %v873_v5 = vmul.f32 %v4085_v26, %v4677_v18  ;;  %v3873_v49 = vld [vmem:[%s5877_s3 + $0x150] sm:$0xff]   ;;  %v939_v36 = vmul.f32 %v4855_v15, %v919_v60  ;;  %v3877_v20 = vld [vmem:[%s5877_s3 + $0x158] sm:$0xff]   ;;  %v3864_v57 = vld [vmem:[%s5877_s3 + $0x60] sm:$0xff]  }
  0x78   : > { %1366 = vrot.lane.b32.xlu0 %v1322_v44, %s4231_s24  ;;  %v1328_v7 = vrot.slane %v1326_v21, 1  ;;  %v3875_v61 = vld [vmem:[%s5877_s3 + $0x110] sm:$0xff]   ;;  %v4874_v44 = vld [vmem:[%s5880_s6] ss:$0 sm:$0xff]  ;;  %v3868_v38 = vld [vmem:[%s5877_s3 + $0x68] sm:$0xff]  }
  0x79   : > { %v1336_v42 = vor.u32 %v1335_v22, %v1331_v17  ;;  %v901_v37 = vsel %vm4617_vm6, %v873_v5, 0.0  ;;  %3647 = vmatpush3.bf16.msra.mxu0 %v3871_v54  ;;  %v920_v17 = vld [vmem:[%s4822_s25 + $0x18] sm:$0x3]  ;;  %v3866_v21 = vld [vmem:[%s5877_s3 + $0x20] sm:$0xff]  }
  0x7a   : > { %v1329_v27 = vor.u32 %v1328_v7, %v1324_v39  ;;  %3648 = vmatprep.subr.bf16.mxu0 %v3873_v49  ;;  %v4877_v39 = vadd.f32 %v4874_v44, %v939_v36  ;;  %v3879_v22 = vld [vmem:[%s5877_s3 + $0x118] sm:$0xff]   ;;  %v940_v7 = vmul.f32 %v4855_v15, %v920_v17 }
  0x7c   : > { %1370 = vrot.lane.b32.xlu0 %v1336_v42, %s4231_s24  ;;  %1368 = vrot.lane.b32.xlu1 %v1329_v27, %s4231_s24  ;;  %v979_v26 = vsub.f32 0.0, %v4877_v39  ;;  %v921_v42 = vld [vmem:[%s4822_s25 + $0x20] sm:$0xff]  ;;  %v3870_v27 = vld [vmem:[%s5877_s3 + $0x28] sm:$0xff]   ;;  %v4895_v5 = vadd.f32 %v4874_v44, %v940_v7 }
  0x7d   : > { %3649 = vmatpush3.bf16.msra.mxu0 %v3875_v61  ;;  %v927_v61 = vld [vmem:[%s4822_s25 + $0x50] sm:$0xff]  ;;  %v3882_v7 = vld [vmem:[%s5877_s3 + $0x120] sm:$0xff]  }
  0x7e   : > { %3650 = vmatprep.subr.bf16.mxu0 %v3877_v20 }
  0x7f   : > { %v4087_v19 = vpop.eup %4086 }
  0x80   : > { %1197 = vrot.lane.b32.xlu0 %v4348_v11, %s4231_s24  ;;  %v874_v43 = vmul.f32 %v4087_v19, %v4680_v35  ;;  %v4089_v58 = vpop.eup %4088  ;;  %v3872_v19 = vld [vmem:[%s5877_s3 + $0x70] sm:$0xff]  }
  0x81   : > { %v875_v24 = vmul.f32 %v4089_v58, %v4722_v47  ;;  %v4091_v31 = vpop.eup %4090  ;;  %3651 = vmatpush3.bf16.msra.mxu0 %v3879_v22  ;;  %v923_v58 = vld [vmem:[%s4822_s25 + $0x30] sm:$0xff]  ;;  %v3880_v22 = vld [vmem:[%s5877_s3 + $0xc0] sm:$0xff]  }
  0x82   : > { %v902_v34 = vsel %vm4671_vm7, %v874_v43, 0.0  ;;  %v876_v8 = vmul.f32 %v4091_v31, %v4725_v46  ;;  %v3857_v46 = vld [vmem:[%s5877_s3] sm:$0xff]   ;;  %v922_v43 = vld [vmem:[%s4822_s25 + $0x28] sm:$0x3]  ;;  %v980_v31 = vsub.f32 0.0, %v4895_v5 }
  0x83   : > { %v4797_v18 = vpack.c.bf16 %v902_v34, %v901_v37  ;;  %v903_v41 = vsel %vm4617_vm6, %v875_v24, 0.0  ;;  %3565 = vmatpush3.bf16.msra.mxu1 %v3857_v46  ;;  %v1001_v37 = vmul.f32 1.442695, %v979_v26  ;;  %v924_v34 = vld [vmem:[%s4822_s25 + $0x38] sm:$0x3]  ;;  %v3874_v24 = vld [vmem:[%s5877_s3 + $0x30] sm:$0xff]  }
  0x84   : > { %v904_v45 = vsel %vm4671_vm7, %v876_v8, 0.0  ;;  %3566 = vmatprep.subr.bf16.mxu1 %v3858_v13  ;;  %v941_v8 = vmul.f32 %v4855_v15, %v921_v42  ;;  %v944_v46 = vmul.f32 %v4855_v15, %v924_v34  ;;  %v3885_v34 = vld [vmem:[%s5877_s3 + $0x168] sm:$0xff]  }
  0x85   : > { %v1338_v35 = vshrl.u32 %v4797_v18, 16  ;;  %v1340_v4 = vshll.u32 %v4797_v18, 16  ;;  %v4806_v1 = vpack.c.bf16 %v904_v45, %v903_v41  ;;  %v925_v41 = vld [vmem:[%s4822_s25 + $0x40] sm:$0xff]  ;;  %v3878_v45 = vld [vmem:[%s5877_s3 + $0x38] sm:$0xff]   ;;  %4092 = vpow2.f32 %v1001_v37 }
  0x86   : > { %v4918_v30 = vadd.f32 %v4874_v44, %v941_v8  ;;  %v945_v29 = vmul.f32 %v4855_v15, %v925_v41  ;;  %v4931_v56 = vadd.f32 %v4874_v44, %v944_v46 }
  0x87   : > { %v1342_v62 = vrot.slane %v1340_v4, 1  ;;  %3567 = vmatpush3.bf16.msra.mxu1 %v3859_v51  ;;  %v942_v4 = vmul.f32 %v4855_v15, %v922_v43  ;;  %v926_v51 = vld [vmem:[%s4822_s25 + $0x48] sm:$0x3] }
  0x88   : > { %3568 = vmatprep.subr.bf16.mxu1 %v3860_v16  ;;  %v981_v16 = vsub.f32 0.0, %v4918_v30  ;;  %v946_v60 = vmul.f32 %v4855_v15, %v926_v51  ;;  %v984_v36 = vsub.f32 0.0, %v4931_v56 }
  0x89   : > { %v1343_v47 = vor.u32 %v1342_v62, %v1338_v35  ;;  %v3876_v35 = vld [vmem:[%s5877_s3 + $0x78] sm:$0xff]   ;;  %v943_v62 = vmul.f32 %v4855_v15, %v923_v58  ;;  %v4922_v13 = vadd.f32 %v4874_v44, %v942_v4 }
  0x8a   : > { %v1011_v43 = vmul.f32 1.442695, %v984_v36  ;;  %v932_v36 = vld [vmem:[%s4822_s25 + $0x78] sm:$0x3] }
  0x8b   : > { %1372 = vrot.lane.b32.xlu1 %v1343_v47, %s4231_s24  ;;  %3569 = vmatpush3.bf16.msra.mxu1 %v3861_v3  ;;  %v1003_v47 = vmul.f32 1.442695, %v980_v31  ;;  %v4927_v9 = vadd.f32 %v4874_v44, %v943_v62  ;;  %v982_v54 = vsub.f32 0.0, %v4922_v13  ;;  %v4936_v3 = vadd.f32 %v4874_v44, %v945_v29  ;;  %v3886_v31 = vld [vmem:[%s5877_s3 + $0x128] sm:$0xff]   ;;  %v931_v29 = vld [vmem:[%s4822_s25 + $0x70] sm:$0xff] }
  0x8c   : > { %3570 = vmatprep.subr.bf16.mxu1 %v3862_v14  ;;  %v1005_v14 = vmul.f32 1.442695, %v981_v16 }
  0x8d   : > { %4094 = vpow2.f32 %v1003_v47  ;;  %v983_v49 = vsub.f32 0.0, %v4927_v9  ;;  %v1007_v17 = vmul.f32 1.442695, %v982_v54  ;;  %v985_v20 = vsub.f32 0.0, %v4936_v3 }
  0x8e   : > { %4096 = vpow2.f32 %v1005_v14 }
  0x8f   : > { %3571 = vmatpush3.bf16.msra.mxu1 %v3863_v63  ;;  %v4941_v63 = vadd.f32 %v4874_v44, %v946_v60  ;;  %v4093_v26 = vpop.eup %4092  ;;  %v1009_v42 = vmul.f32 1.442695, %v983_v49  ;;  %4098 = vpow2.f32 %v1007_v17  ;;  %v4232_v60 = vmov 0.0|0.0  }
  0x90   : > { %3572 = vmatprep.subr.bf16.mxu1 %v3864_v57  ;;  %v928_v57 = vld [vmem:[%s4822_s25 + $0x58] sm:$0x3]  ;;  %v4975_v54 = vrot.slane %v4232_v60, 1  ;;  %v5884_v49 = vrot.slane %v4690_v33, 1 }
  0x91   : > { %v986_v37 = vsub.f32 0.0, %v4941_v63  ;;  %v948_v58 = vmul.f32 %v4855_v15, %v928_v57  ;;  %4100 = vpow2.f32 %v1009_v42  ;;  %v3890_v57 = vld [vmem:[%s5877_s3 + $0x130] sm:$0xff]  }
  0x92   : > { %4102 = vpow2.f32 %v1011_v43 }
  0x93   : > { %3573 = vmatpush3.bf16.msra.mxu1 %v3866_v21  ;;  %v1015_v46 = vmul.f32 1.442695, %v986_v37  ;;  %v4972_v51 = vadd.f32 %v4874_v44, %v948_v58  ;;  %v3412_v58 = vcombine.low %v4975_v54, %v5884_v49 }
  0x94   : > { %3574 = vmatprep.subr.bf16.mxu1 %v3868_v38  ;;  %v3881_v38 = vld [vmem:[%s5877_s3 + $0x160] sm:$0xff]  }
  0x95   : > { %3652 = vmatprep.subr.bf16.mxu0 %v3881_v38  ;;  %v988_v42 = vsub.f32 0.0, %v4972_v51 }
  0x96   : > { %3653 = vmatpush3.bf16.msra.mxu0 %v3882_v7  ;;  %v929_v7 = vld [vmem:[%s4822_s25 + $0x60] sm:$0xff] }
  0x97   : > { %3575 = vmatpush3.bf16.msra.mxu1 %v3870_v27  ;;  %v947_v27 = vmul.f32 %v4855_v15, %v927_v61  ;;  %v4095_v8 = vpop.eup %4094  ;;  %3654 = vmatprep.subr.bf16.mxu0 %v3885_v34  ;;  %v1347_v34 = vshll.u32 %v4806_v1, 16 }
  0x98   : > { %3576 = vmatprep.subr.bf16.mxu1 %v3872_v19  ;;  %v1040_v14 = vadd.f32 1.0, %v4095_v8  ;;  %v949_v8 = vmul.f32 %v4855_v15, %v929_v7 }
  0x99   : > { %v4969_v62 = vadd.f32 %v4874_v44, %v947_v27  ;;  %v930_v27 = vld [vmem:[%s4822_s25 + $0x68] sm:$0x3] }
  0x9a   : > { %3655 = vmatpush3.bf16.msra.mxu0 %v3886_v31 }
  0x9b   : > { %3577 = vmatpush3.bf16.msra.mxu1 %v3874_v24  ;;  %v1013_v24 = vmul.f32 1.442695, %v985_v20  ;;  %v3889_v20 = vld [vmem:[%s5877_s3 + $0x170] sm:$0xff]   ;;  %v987_v38 = vsub.f32 0.0, %v4969_v62 }
  0x9c   : > { %3578 = vmatprep.subr.bf16.mxu1 %v3876_v35  ;;  %v1039_v35 = vadd.f32 1.0, %v4093_v26  ;;  %v951_v26 = vmul.f32 %v4855_v15, %v931_v29  ;;  %3656 = vmatprep.subr.bf16.mxu0 %v3889_v20 }
  0x9d   : > { %4104 = vpow2.f32 %v1013_v24  ;;  %v4097_v24 = vpop.eup %4096 }
  0x9e   : > { %4106 = vrcp.f32 %v1039_v35  ;;  %3657 = vmatpush3.bf16.msra.mxu0 %v3890_v57  ;;  %v1041_v20 = vadd.f32 1.0, %v4097_v24  ;;  %v1228_v24 = vrot.slane %v4572_v52, 1 }
  0x9f   : > { %3579 = vmatpush3.bf16.msra.mxu1 %v3878_v45  ;;  %4108 = vpow2.f32 %v1015_v46  ;;  %v5015_v46 = vadd.f32 %v4874_v44, %v951_v26 }
  0xa0   : > { %3604 = vmatprep.subr.bf16.mxu1 %v3880_v22  ;;  %4110 = vrcp.f32 %v1040_v14 }
  0xb7   : > { %v1204_v21 = vpop.permute.xlu1 %1203 }
  0xb8   : > { %v1245_v4 = vsel %vm1237_vm8, %v4557_v23, %v1204_v21 }
  0xb9   : > { %v1200_v19 = vpop.permute.xlu0 %1199 }
  0xba   : > { %v4981_v61 = vsel %vm1237_vm8, %v4572_v52, %v1200_v19  ;;  %v952_v19 = vmul.f32 %v4855_v15, %v932_v36  ;;  %v1349_v36 = vrot.slane %v1347_v34, 1 }
  0xbb   : > { %v1206_v41 = vpop.permute.xlu1 %1205 }
  0xbc   : > { %v1247_v45 = vsel %vm1237_vm8, %v4583_v0, %v1206_v41  ;;  %v4099_v41 = vpop.eup %4098  ;;  %v5022_v60 = vadd.f32 %v4874_v44, %v952_v19 }
  0xbd   : > { %v3403_v47 = vcombine.low %v1245_v4, %v1247_v45  ;;  %v4101_v14 = vpop.eup %4100  ;;  %v1042_v57 = vadd.f32 1.0, %v4099_v41 }
  0xbe   : > { %v1202_v16 = vpop.permute.xlu0 %1201 }
  0xbf   : > { %v1243_v17 = vsel %vm1237_vm8, %v4593_v32, %v1202_v16  ;;  %1632 = vrot.lane.b32.xlu0 %v3403_v47, %s4231_s24  ;;  %v1210_v43 = vpop.permute.xlu1 %1209  ;;  %v950_v47 = vmul.f32 %v4855_v15, %v930_v27  ;;  %v1019_v16 = vmul.f32 1.442695, %v988_v42  ;;  %v991_v42 = vsub.f32 0.0, %v5015_v46  ;;  %v933_v27 = vld [vmem:[%s4822_s25 + $0x80] sm:$0xff] }
  0xc0   : > { %v4992_v21 = vcombine.low %v1243_v17, %v1245_v4  ;;  %v3401_v22 = vcombine.low %v4981_v61, %v1243_v17  ;;  %v1017_v4 = vmul.f32 1.442695, %v987_v38  ;;  %v5019_v29 = vsel %vm1237_vm8, %v4601_v40, %v1210_v43  ;;  %v4103_v17 = vpop.eup %4102 }
  0xc1   : > { %v4105_v38 = vpop.eup %4104  ;;  %v5031_v26 = vadd.f32 %v4874_v44, %v950_v47  ;;  %v1043_v43 = vadd.f32 1.0, %v4101_v14  ;;  %v953_v49 = vmul.f32 %v4855_v15, %v933_v27  ;;  %v1025_v10 = vmul.f32 1.442695, %v991_v42 }
  0xc2   : > { %1628 = vrot.lane.b32.xlu1 %v3401_v22, %s4231_s24  ;;  %v1208_v37 = vpop.permute.xlu0 %1207  ;;  %v5027_v22 = vadd.f32 %v4874_v44, %v949_v8  ;;  %4112 = vpow2.f32 %v1017_v4  ;;  %v4107_v19 = vpop.eup %4106  ;;  %v1044_v8 = vadd.f32 1.0, %v4103_v17  ;;  %v1045_v4 = vadd.f32 1.0, %v4105_v38 }
  0xc3   : > { %v1249_v31 = vsel %vm1237_vm8, %v4621_v59, %v1208_v37  ;;  %1376 = vrot.lane.b32.xlu0 %v4348_v11, %s4231_s24  ;;  %4114 = vpow2.f32 %v1019_v16  ;;  %v992_v37 = vsub.f32 0.0, %v5022_v60  ;;  %v4109_v41 = vpop.eup %4108  ;;  %v990_v16 = vsub.f32 0.0, %v5031_v26 }
  0xc4   : > { %v5011_v35 = vcombine.low %v1247_v45, %v1249_v31  ;;  %v1345_v45 = vshrl.u32 %v4806_v1, 16  ;;  %v3405_v7 = vcombine.low %v1249_v31, %v5019_v29  ;;  %v5887_v31 = vrot.slane %v4593_v32, 1  ;;  %v4111_v14 = vpop.eup %4110 }
  0xc5   : > { %4116 = vrcp.f32 %v1041_v20  ;;  %v989_v47 = vsub.f32 0.0, %v5027_v22  ;;  %v1027_v17 = vmul.f32 1.442695, %v992_v37  ;;  %v1080_v38 = vmul.f32 %v4111_v14, %v4895_v5 }
  0xc6   : > { %1666 = vrot.lane.b32.xlu1 %v3412_v58, %s4231_s24  ;;  %v934_v58 = vld [vmem:[%s4822_s25 + $0x88] sm:$0x3]  ;;  %v1350_v34 = vor.u32 %v1349_v36, %v1345_v45  ;;  %4118 = vrcp.f32 %v1042_v57  ;;  %v3893_v45 = vld [vmem:[%s5877_s3 + $0x178] sm:$0xff]   ;;  %v3402_v20 = vcombine.low %v1228_v24, %v5887_v31  ;;  %v1079_v57 = vmul.f32 %v4107_v19, %v4877_v39  ;;  %v1359_v37 = vpop.permute.xlu0 %1358 }
  0xc7   : > { %v3894_v36 = vld [vmem:[%s5877_s3 + $0x138] sm:$0xff]   ;;  %4120 = vrcp.f32 %v1043_v43  ;;  %3658 = vmatprep.subr.bf16.mxu0 %v3893_v45  ;;  %v1021_v42 = vmul.f32 1.442695, %v989_v47  ;;  %v5058_v27 = vadd.f32 %v4874_v44, %v953_v49  ;;  %v1100_v49 = vsel %vm462_vm2, %v1080_v38, 0.0 }
  0xc8   : > { %4122 = vrcp.f32 %v1044_v8  ;;  %3659 = vmatpush3.bf16.msra.mxu0 %v3894_v36  ;;  %v1099_v5 = vsel %vm455_vm0, %v1079_v57, 0.0 }
  0xc9   : > { %4124 = vrcp.f32 %v1045_v4  ;;  %v993_v8 = vsub.f32 0.0, %v5058_v27 }
  0xca   : > { %1636 = vrot.lane.b32.xlu1 %v3405_v7, %s4231_s24  ;;  %v954_v7 = vmul.f32 %v4855_v15, %v934_v58  ;;  %v1046_v15 = vadd.f32 1.0, %v4109_v41  ;;  %v1023_v58 = vmul.f32 1.442695, %v990_v16  ;;  %4126 = vpow2.f32 %v1025_v10 }
  0xcb   : > { %4128 = vpow2.f32 %v1027_v17 }
  0xcc   : > { %v4113_v39 = vpop.eup %4112  ;;  %4130 = vrcp.f32 %v1046_v15 }
  0xcd   : > { %v4115_v19 = vpop.eup %4114  ;;  %4132 = vpow2.f32 %v1021_v42  ;;  %v1047_v47 = vadd.f32 1.0, %v4113_v39 }
  0xce   : > { %1374 = vrot.lane.b32.xlu1 %v1350_v34, %s4231_s24  ;;  %v5061_v34 = vadd.f32 %v4874_v44, %v954_v7  ;;  %4134 = vpow2.f32 %v1023_v58  ;;  %v5074_v7 = vpack.c.bf16 %v1100_v49, %v1099_v5  ;;  %v1048_v45 = vadd.f32 1.0, %v4115_v19 }
  0xcf   : > { %v4117_v44 = vpop.eup %4116  ;;  %v1399_v19 = vsel %vm1237_vm8, 0.0|0.0, %v1359_v37  ;;  %4136 = vrcp.f32 %v1047_v47 }
  0xd0   : > { %v1361_v43 = vpop.permute.xlu1 %1360  ;;  %v994_v10 = vsub.f32 0.0, %v5061_v34  ;;  %v4119_v14 = vpop.eup %4118  ;;  %v1081_v42 = vmul.f32 %v4117_v44, %v4918_v30  ;;  %v1458_v30 = vshll.u32 %v5074_v7, 16  ;;  %4138 = vrcp.f32 %v1048_v45 }
  0xd1   : > { %v4121_v36 = vpop.eup %4120  ;;  %v5085_v5 = vsel %vm1237_vm8, %v4690_v33, %v1361_v43  ;;  %v1082_v49 = vmul.f32 %v4119_v14, %v4922_v13 }
  0xd2   : > { %1630 = vrot.lane.b32.xlu1 %v3402_v20, %s4231_s24  ;;  %v1029_v20 = vmul.f32 1.442695, %v993_v8  ;;  %v4123_v57 = vpop.eup %4122  ;;  %v1031_v58 = vmul.f32 1.442695, %v994_v10  ;;  %v3411_v43 = vcombine.low %v1399_v19, %v5085_v5  ;;  %v1101_v13 = vsel %vm455_vm0, %v1081_v42, 0.0 }
  0xd3   : > { %v4125_v39 = vpop.eup %4124  ;;  %v1102_v47 = vsel %vm462_vm2, %v1082_v49, 0.0  ;;  %v1084_v31 = vmul.f32 %v4123_v57, %v4931_v56 }
  0xd4   : > { %v1214_v41 = vpop.permute.xlu1 %1213  ;;  %v4127_v8 = vpop.eup %4126  ;;  %4140 = vpow2.f32 %v1029_v20  ;;  %v1460_v20 = vrot.slane %v1458_v30, 1  ;;  %v5106_v19 = vpack.c.bf16 %v1102_v47, %v1101_v13 }
  0xd5   : > { %v5072_v4 = vsel %vm1237_vm8, %v4704_v53, %v1214_v41  ;;  %v5888_v41 = vrot.slane %v4750_v55, 1  ;;  %v4129_v10 = vpop.eup %4128  ;;  %4142 = vpow2.f32 %v1031_v58  ;;  %v1051_v14 = vadd.f32 1.0, %v4127_v8  ;;  %v3899_v8 = vld [vmem:[%s5877_s3 + $0x240] sm:$0xff]  }
  0xd6   : > { %v1212_v16 = vpop.permute.xlu0 %1211  ;;  %v4131_v44 = vpop.eup %4130  ;;  %v1085_v58 = vmul.f32 %v4125_v39, %v4936_v3  ;;  %v1230_v3 = vrot.slane %v4557_v23, 1  ;;  %3724 = vmatprep.subr.bf16.mxu0 %v3899_v8  ;;  %v1465_v56 = vshll.u32 %v5106_v19, 16  ;;  %v3884_v23 = vld [vmem:[%s5877_s3 + $0xc8] sm:$0xff]  }
  0xd7   : > { %v1253_v17 = vsel %vm1237_vm8, %v4714_v28, %v1212_v16  ;;  %v4133_v37 = vpop.eup %4132  ;;  %v1086_v42 = vmul.f32 %v4131_v44, %v4941_v63  ;;  %4144 = vrcp.f32 %v1051_v14  ;;  %v1231_v63 = vrot.slane %v4583_v0, 1 }
  0xd8   : > { %v5079_v15 = vcombine.low %v5019_v29, %v1253_v17  ;;  %v3407_v38 = vcombine.low %v1253_v17, %v5072_v4  ;;  %v5889_v29 = vrot.slane %v4740_v25, 1  ;;  %v4135_v16 = vpop.eup %4134  ;;  %v1456_v17 = vshrl.u32 %v5074_v7, 16 }
  0xd9   : > { %v1049_v49 = vadd.f32 1.0, %v4133_v37  ;;  %v4137_v39 = vpop.eup %4136  ;;  %v1104_v37 = vsel %vm462_vm2, %v1084_v31, 0.0  ;;  %v3404_v14 = vcombine.low %v1230_v3, %v1231_v63 }
  0xda   : > { %1640 = vrot.lane.b32.xlu0 %v3407_v38, %s4231_s24  ;;  %v3414_v45 = vcombine.low %v5889_v29, %v5888_v41  ;;  %v1052_v38 = vadd.f32 1.0, %v4129_v10  ;;  %v1050_v41 = vadd.f32 1.0, %v4135_v16  ;;  %v1461_v30 = vor.u32 %v1460_v20, %v1456_v17 }
  0xdb   : > { %v1105_v10 = vsel %vm455_vm0, %v1085_v58, 0.0  ;;  %v1463_v17 = vshrl.u32 %v5106_v19, 16  ;;  %v1087_v31 = vmul.f32 %v4137_v39, %v4969_v62  ;;  %v1467_v58 = vrot.slane %v1465_v56, 1 }
  0xdc   : > { %4146 = vrcp.f32 %v1052_v38  ;;  %v1392_v62 = vrot.slane %v4760_v48, 1 }
  0xdd   : > { %4148 = vrcp.f32 %v1049_v49  ;;  %v1107_v56 = vsel %vm455_vm0, %v1087_v31, 0.0 }
  0xde   : > { %1664 = vrot.lane.b32.xlu0 %v3411_v43, %s4231_s24  ;;  %v1083_v43 = vmul.f32 %v4121_v36, %v4927_v9  ;;  %v1106_v9 = vsel %vm462_vm2, %v1086_v42, 0.0  ;;  %v4139_v36 = vpop.eup %4138  ;;  %4150 = vrcp.f32 %v1050_v41 }
  0xdf   : > { %v4141_v57 = vpop.eup %4140  ;;  %v5130_v16 = vpack.c.bf16 %v1106_v9, %v1105_v10  ;;  %v1088_v41 = vmul.f32 %v4139_v36, %v4972_v51  ;;  %v1393_v51 = vrot.slane %v4777_v50, 1 }
  0xe0   : > { %v1103_v44 = vsel %vm455_vm0, %v1083_v43, 0.0  ;;  %v4143_v13 = vpop.eup %4142  ;;  %v1053_v49 = vadd.f32 1.0, %v4141_v57 }
  0xe1   : > { %v5141_v42 = vpack.c.bf16 %v1104_v37, %v1103_v44  ;;  %v1054_v43 = vadd.f32 1.0, %v4143_v13  ;;  %v1479_v39 = vshll.u32 %v5130_v16, 16  ;;  %v4145_v9 = vpop.eup %4144  ;;  %v1108_v57 = vsel %vm462_vm2, %v1088_v41, 0.0 }
  0xe2   : > { %1670 = vrot.lane.b32.xlu0 %v3414_v45, %s4231_s24  ;;  %v1468_v13 = vor.u32 %v1467_v58, %v1463_v17  ;;  %4152 = vrcp.f32 %v1053_v49  ;;  %v3416_v31 = vcombine.low %v1392_v62, %v1393_v51  ;;  %v1477_v41 = vshrl.u32 %v5130_v16, 16 }
  0xe3   : > { %4154 = vrcp.f32 %v1054_v43  ;;  %v1481_v20 = vrot.slane %v1479_v39, 1  ;;  %v5170_v29 = vpack.c.bf16 %v1108_v57, %v1107_v56  ;;  %v1091_v49 = vmul.f32 %v4145_v9, %v5015_v46 }
  0xe4   : > { %v1470_v56 = vshrl.u32 %v5141_v42, 16 }
  0xe5   : > { %v1482_v46 = vor.u32 %v1481_v20, %v1477_v41  ;;  %v1484_v41 = vshrl.u32 %v5170_v29, 16 }
  0xe6   : > { %v1363_v47 = vpop.permute.xlu0 %1362  ;;  %1520 = vrot.lane.b32.xlu0 %v1461_v30, %s4231_s24  ;;  %v4147_v44 = vpop.eup %4146 }
  0xe7   : > { %v5134_v45 = vsel %vm1237_vm8, %v4740_v25, %v1363_v47  ;;  %v1472_v47 = vshll.u32 %v5141_v42, 16  ;;  %v1092_v43 = vmul.f32 %v4147_v44, %v5022_v60  ;;  %v1486_v60 = vshll.u32 %v5170_v29, 16 }
  0xe8   : > { %v1365_v38 = vpop.permute.xlu1 %1364 }
  0xe9   : > { %v5145_v8 = vsel %vm1237_vm8, %v4750_v55, %v1365_v38  ;;  %v1474_v57 = vrot.slane %v1472_v47, 1  ;;  %v1112_v39 = vsel %vm462_vm2, %v1092_v43, 0.0 }
  0xea   : > { %v3413_v30 = vcombine.low %v5134_v45, %v5145_v8  ;;  %v1367_v10 = vpop.permute.xlu0 %1366  ;;  %1634 = vrot.lane.b32.xlu0 %v3404_v14, %s4231_s24  ;;  %v4149_v14 = vpop.eup %4148 }
  0xeb   : > { %v5155_v36 = vsel %vm1237_vm8, %v4760_v48, %v1367_v10  ;;  %v4151_v37 = vpop.eup %4150  ;;  %v1089_v9 = vmul.f32 %v4149_v14, %v5027_v22  ;;  %v1475_v47 = vor.u32 %v1474_v57, %v1470_v56  ;;  %v1488_v22 = vrot.slane %v1486_v60, 1 }
  0xec   : > { %1668 = vrot.lane.b32.xlu1 %v3413_v30, %s4231_s24  ;;  %v1090_v44 = vmul.f32 %v4151_v37, %v5031_v26  ;;  %v1232_v60 = vrot.slane %v4621_v59, 1  ;;  %v5910_v48 = vcombine.low %v5085_v5, %v5134_v45  ;;  %v3947_v5 = vld [vmem:[%s5877_s3 + $0x2d0] sm:$0xff]   ;;  %v3940_v45 = vld [vmem:[%s5877_s3 + $0x320] sm:$0xff]  }
  0xed   : > { %v1109_v26 = vsel %vm455_vm0, %v1089_v9, 0.0  ;;  %v1489_v56 = vor.u32 %v1488_v22, %v1484_v41 }
  0xee   : > { %v1371_v38 = vpop.permute.xlu0 %1370  ;;  %v1369_v10 = vpop.permute.xlu1 %1368  ;;  %v1110_v37 = vsel %vm462_vm2, %v1090_v44, 0.0 }
  0xef   : > { %v5174_v17 = vsel %vm1237_vm8, %v4770_v6, %v1371_v38  ;;  %v5178_v58 = vsel %vm1237_vm8, %v4777_v50, %v1369_v10  ;;  %v1394_v38 = vrot.slane %v4770_v6, 1  ;;  %v1395_v10 = vrot.slane %v4797_v18, 1  ;;  %v3942_v6 = vld [vmem:[%s5877_s3 + $0x328] sm:$0xff]  }
  0xf0   : > { %1522 = vrot.lane.b32.xlu1 %v1468_v13, %s4231_s24  ;;  %v3415_v30 = vcombine.low %v5155_v36, %v5178_v58  ;;  %v1111_v13 = vsel %vm455_vm0, %v1091_v49, 0.0  ;;  %v5212_v49 = vpack.c.bf16 %v1110_v37, %v1109_v26  ;;  %v5911_v50 = vcombine.low %v5145_v8, %v5155_v36  ;;  %v3945_v8 = vld [vmem:[%s5877_s3 + $0x330] sm:$0xff]   ;;  %v3955_v36 = vld [vmem:[%s5877_s3 + $0x2a0] sm:$0xff]  }
  0xf1   : > { %v3418_v20 = vcombine.low %v1394_v38, %v1395_v10  ;;  %v5209_v14 = vpack.c.bf16 %v1112_v39, %v1111_v13  ;;  %v1233_v39 = vrot.slane %v4601_v40, 1  ;;  %v3851_v13 = vpack.i.bf16 %v4348_v11, %v4348_v11  ;;  %v3906_v40 = vld [vmem:[%s5877_s3 + $0xf8] sm:$0xff]  }
  0xf2   : > { %1672 = vrot.lane.b32.xlu0 %v3415_v30, %s4231_s24  ;;  %v4153_v30 = vpop.eup %4152  ;;  %v1493_v44 = vshll.u32 %v5212_v49, 16  ;;  %v1491_v22 = vshrl.u32 %v5212_v49, 16 }
  0xf3   : > { %v1093_v43 = vmul.f32 %v4153_v30, %v5058_v27  ;;  %v1500_v57 = vshll.u32 %v5209_v14, 16  ;;  %v3406_v2 = vcombine.low %v1232_v60, %v1233_v39 }
  0xf4   : > { %1674 = vrot.lane.b32.xlu1 %v3416_v31, %s4231_s24  ;;  %v4155_v31 = vpop.eup %4154  ;;  %v1495_v26 = vrot.slane %v1493_v44, 1 }
  0xf5   : > { %v1113_v27 = vsel %vm455_vm0, %v1093_v43, 0.0  ;;  %v1234_v43 = vrot.slane %v4714_v28, 1 }
  0xf6   : > { %1526 = vrot.lane.b32.xlu0 %v1482_v46, %s4231_s24  ;;  %v1094_v46 = vmul.f32 %v4155_v31, %v5061_v34  ;;  %v1498_v34 = vshrl.u32 %v5209_v14, 16  ;;  %v1496_v12 = vor.u32 %v1495_v26, %v1491_v22  ;;  %v1552_v22 = vrot.slane %v5130_v16, 1 }
  0xf8   : > { %1524 = vrot.lane.b32.xlu1 %v1475_v47, %s4231_s24  ;;  %v1114_v41 = vsel %vm462_vm2, %v1094_v46, 0.0 }
  0xf9   : > { %v5241_v37 = vpack.c.bf16 %v1114_v41, %v1113_v27  ;;  %v1396_v27 = vrot.slane %v4806_v1, 1  ;;  %v1550_v41 = vrot.slane %v5106_v19, 1 }
  0xfa   : > { %1678 = vrot.lane.b32.xlu0 %v3418_v20, %s4231_s24  ;;  %v1502_v20 = vrot.slane %v1500_v57, 1 }
  0xfb   : > { %v1507_v57 = vshll.u32 %v5241_v37, 16 }
  0xfc   : > { %v1503_v31 = vor.u32 %v1502_v20, %v1498_v34  ;;  %v3428_v34 = vcombine.low %v1396_v27, %v4975_v54  ;;  %v5890_v20 = vrot.slane %v5074_v7, 1 }
  0xfd   : > { %v1373_v9 = vpop.permute.xlu1 %1372  ;;  %v1509_v44 = vrot.slane %v1507_v57, 1 }
  0xfe   : > { %v5227_v47 = vsel %vm1237_vm8, %v4797_v18, %v1373_v9  ;;  %1528 = vrot.lane.b32.xlu0 %v1489_v56, %s4231_s24  ;;  %v1235_v56 = vrot.slane %v4704_v53, 1  ;;  %v1505_v9 = vshrl.u32 %v5241_v37, 16 }
  0xff   : > { %v3417_v30 = vcombine.low %v5174_v17, %v5227_v47 }
 0x100   : > { %v3408_v46 = vcombine.low %v1234_v43, %v1235_v56 }
 0x101   : > { %1676 = vrot.lane.b32.xlu1 %v3417_v30, %s4231_s24  ;;  %v3438_v30 = vcombine.low %v5890_v20, %v1550_v41 }
 0x102   : > { %3852 = vrot.lane.b32.xlu0 %v3851_v13, %s4231_s24  ;;  %v1510_v13 = vor.u32 %v1509_v44, %v1505_v9  ;;  %v5892_v9 = vrot.slane %v5241_v37, 1 }
 0x105   : > { %1638 = vrot.lane.b32.xlu1 %v3406_v2, %s4231_s24  ;;  %v1551_v2 = vrot.slane %v5141_v42, 1 }
 0x106   : > { %1532 = vrot.lane.b32.xlu0 %v1503_v31, %s4231_s24  ;;  %v1553_v31 = vrot.slane %v5170_v29, 1 }
 0x107   : > { %v3440_v26 = vcombine.low %v1551_v2, %v1552_v22 }
 0x108   : > { %v3434_v18 = vcombine.low %v1552_v22, %v1553_v31 }
 0x109   : > { %1530 = vrot.lane.b32.xlu1 %v1496_v12, %s4231_s24  ;;  %v5891_v12 = vrot.slane %v5212_v49, 1 }
 0x10b   : > { %v3442_v57 = vcombine.low %v1553_v31, %v5891_v12 }
 0x10d   : > { %1642 = vrot.lane.b32.xlu1 %v3408_v46, %s4231_s24  ;;  %v1555_v46 = vrot.slane %v5209_v14, 1 }
 0x10f   : > { %v3444_v44 = vcombine.low %v1555_v46, %v5892_v9 }
 0x111   : > { %1534 = vrot.lane.b32.xlu1 %v1510_v13, %s4231_s24  ;;  %v1198_v13 = vpop.permute.xlu0 %1197 }
 0x115   : > { %1704 = vrot.lane.b32.xlu1 %v3428_v34, %s4231_s24  ;;  %v3394_v34 = vcombine.low %v4975_v54, %v1228_v24 }
 0x119   : > { %1730 = vrot.lane.b32.xlu1 %v3438_v30, %s4231_s24  ;;  %v1239_v30 = vsel %vm1237_vm8, 0.0|0.0, %v1198_v13 }
 0x11a   : > { %v3393_v9 = vcombine.low %v1239_v30, %v4981_v61  ;;  %v3888_v61 = vld [vmem:[%s5877_s3 + $0xd0] sm:$0xff]   ;;  %v3892_v30 = vld [vmem:[%s5877_s3 + $0xd8] sm:$0xff]  }
 0x11d   : > { %1734 = vrot.lane.b32.xlu1 %v3440_v26, %s4231_s24  ;;  %v5905_v26 = vrot.slane %v4593_v32, 1 }
 0x11f   : > { %v3396_v20 = vcombine.low %v5905_v26, %v1230_v3  ;;  %v3887_v3 = vld [vmem:[%s5877_s3 + $0x88] sm:$0xff]  }
 0x121   : > { %1738 = vrot.lane.b32.xlu1 %v3442_v57, %s4231_s24 }
 0x125   : > { %1742 = vrot.lane.b32.xlu1 %v3444_v44, %s4231_s24  ;;  %v3883_v44 = vld [vmem:[%s5877_s3 + $0x80] sm:$0xff]  }
 0x131   : > { %v5300_v12 = vpop.permute.xlu0 %1632 }
 0x132   : > { %v1761_v32 = vsel %vm1237_vm8, %v3396_v20, %v5300_v12 }
 0x134   : > { %v5298_v57 = vpop.permute.xlu1 %1628 }
 0x135   : > { %v1757_v52 = vsel %vm1237_vm8, %v3394_v34, %v5298_v57  ;;  %v3891_v34 = vld [vmem:[%s5877_s3 + $0x90] sm:$0xff]   ;;  %v1377_v26 = vpop.permute.xlu0 %1376 }
 0x136   : > { %2725 = vmatprep.mubr.bf16.mxu1 %v1757_v52  ;;  %v3896_v52 = vld [vmem:[%s5877_s3 + $0xe0] sm:$0xff]  }
 0x137   : > { %2726 = vmatmul.mubr.bf16.vlgmr.msra.gmra.mrb[0].mxu1 %v3393_v9  ;;  %v5323_v9 = vcombine.low %v1231_v63, %v1232_v60  ;;  %v3895_v63 = vld [vmem:[%s5877_s3 + $0x98] sm:$0xff]   ;;  %v1417_v60 = vsel %vm1237_vm8, 0.0|0.0, %v1377_v26 }
 0x138   : > { %v1667_v24 = vpop.permute.xlu1 %1666  ;;  %2733 = vmatprep.mubr.bf16.mxu1 %v1761_v32  ;;  %3605 = vmatpush3.bf16.msra.mxu1 %v3883_v44  ;;  %v3897_v32 = vld [vmem:[%s5877_s3 + $0xa0] sm:$0xff]  }
 0x139   : > { %3606 = vmatprep.subr.bf16.mxu1 %v3884_v23 }
 0x13c   : > { %v5325_v13 = vpop.permute.xlu1 %1636  ;;  %3607 = vmatpush3.bf16.msra.mxu1 %v3887_v3  ;;  %v3898_v3 = vld [vmem:[%s5877_s3 + $0xe8] sm:$0xff]  }
 0x13d   : > { %3608 = vmatprep.subr.bf16.mxu1 %v3888_v61  ;;  %v1765_v0 = vsel %vm1237_vm8, %v5323_v9, %v5325_v13  ;;  %v3900_v61 = vld [vmem:[%s5877_s3 + $0xa8] sm:$0xff]  }
 0x13f   : > { %2734 = vmatmul.mubr.bf16.gmra.mrb[4].mxu1 %v4992_v21 }
 0x140   : > { %v1375_v59 = vpop.permute.xlu1 %1374  ;;  %2741 = vmatprep.mubr.bf16.mxu1 %v1765_v0  ;;  %3609 = vmatpush3.bf16.msra.mxu1 %v3891_v34  ;;  %v5364_v34 = vcombine.low %v1233_v39, %v1234_v43  ;;  %v3904_v0 = vld [vmem:[%s5877_s3 + $0xb0] sm:$0xff]   ;;  %v3901_v43 = vld [vmem:[%s5877_s3 + $0x200] sm:$0xff]  }
 0x141   : > { %v5343_v44 = vsel %vm1237_vm8, %v4806_v1, %v1375_v59  ;;  %3610 = vmatprep.subr.bf16.mxu1 %v3892_v30  ;;  %v3902_v30 = vld [vmem:[%s5877_s3 + $0xf0] sm:$0xff]   ;;  %v3908_v59 = vld [vmem:[%s5877_s3 + $0xb8] sm:$0xff]   ;;  %v5913_v1 = vrot.slane %v5212_v49, 1 }
 0x142   : > { %v3427_v23 = vcombine.low %v5343_v44, %v1417_v60 }
 0x144   : > { %3611 = vmatpush3.bf16.msra.mxu1 %v3895_v63  ;;  %1702 = vrot.lane.b32.xlu0 %v3427_v23, %s4231_s24  ;;  %v3910_v23 = vld [vmem:[%s5877_s3 + $0x1c0] sm:$0xff]  }
 0x145   : > { %3612 = vmatprep.subr.bf16.mxu1 %v3896_v52  ;;  %v3903_v52 = vld [vmem:[%s5877_s3 + $0x248] sm:$0xff]  }
 0x147   : > { %2742 = vmatmul.mubr.bf16.gmra.mrb[8].mxu1 %v5011_v35 }
 0x148   : > { %3613 = vmatpush3.bf16.msra.mxu1 %v3897_v32  ;;  %v1631_v32 = vpop.permute.xlu1 %1630 }
 0x149   : > { %3614 = vmatprep.subr.bf16.mxu1 %v3898_v3  ;;  %v3912_v3 = vld [vmem:[%s5877_s3 + $0x180] sm:$0xff]  }
 0x14c   : > { %v5369_v26 = vpop.permute.xlu0 %1640  ;;  %3615 = vmatpush3.bf16.msra.mxu1 %v3900_v61  ;;  %v1645_v61 = vsel %vm1237_vm8, %v5298_v57, %v1631_v32  ;;  %v3916_v57 = vld [vmem:[%s5877_s3 + $0x188] sm:$0xff]   ;;  %v3922_v32 = vld [vmem:[%s5877_s3 + $0x1d8] sm:$0xff]  }
 0x14d   : > { %v1769_v28 = vsel %vm1237_vm8, %v5364_v34, %v5369_v26  ;;  %3616 = vmatprep.subr.bf16.mxu1 %v3902_v30  ;;  %v3914_v30 = vld [vmem:[%s5877_s3 + $0x1c8] sm:$0xff]  }
 0x14e   : > { %2749 = vmatprep.mubr.bf16.mxu1 %v1769_v28  ;;  %v3909_v28 = vld [vmem:[%s5877_s3 + $0x210] sm:$0xff]  }
 0x14f   : > { %2750 = vmatmul.mubr.bf16.gmra.mrb[12].mxu1 %v5079_v15 }
 0x150   : > { %v1665_v39 = vpop.permute.xlu0 %1664  ;;  %3617 = vmatpush3.bf16.msra.mxu1 %v3904_v0  ;;  %2790 = vmatprep.mubr.bf16.mxu1 %v4992_v21 }
 0x151   : > { %v1680_v63 = vsel %vm1237_vm8, %v1665_v39, %v1667_v24  ;;  %v1772_v60 = vsel %vm1237_vm8, %v3396_v20, %v1665_v39  ;;  %3618 = vmatprep.subr.bf16.mxu1 %v3906_v40  ;;  %v3905_v24 = vld [vmem:[%s5877_s3 + $0x208] sm:$0xff]   ;;  %v3907_v20 = vld [vmem:[%s5877_s3 + $0x250] sm:$0xff]   ;;  %v3911_v40 = vld [vmem:[%s5877_s3 + $0x258] sm:$0xff]  }
 0x152   : > { %2855 = vmatprep.mubr.bf16.mxu0 %v1680_v63  ;;  %v3918_v39 = vld [vmem:[%s5877_s3 + $0x1d0] sm:$0xff]  }
 0x153   : > { %2856 = vmatmul.mubr.bf16.vlgmr.msra.gmra.mrb[0].mxu0 %v1772_v60 }
 0x154   : > { %v1671_v21 = vpop.permute.xlu0 %1670  ;;  %3725 = vmatpush3.bf16.msra.mxu0 %v3901_v43  ;;  %3619 = vmatpush3.bf16.msra.mxu1 %v3908_v59  ;;  %v3915_v59 = vld [vmem:[%s5877_s3 + $0x260] sm:$0xff]  }
 0x155   : > { %3726 = vmatprep.subr.bf16.mxu0 %v3903_v52  ;;  %3684 = vmatprep.subr.bf16.mxu1 %v3910_v23  ;;  %v3920_v52 = vld [vmem:[%s5877_s3 + $0x190] sm:$0xff]  }
 0x157   : > { %2791 = vmatmul.mubr.bf16.vlgmr.msra.gmra.mrb[16].mxu1 %v1645_v61 }
 0x158   : > { %v1521_v0 = vpop.permute.xlu0 %1520  ;;  %3727 = vmatpush3.bf16.msra.mxu0 %v3905_v24  ;;  %2798 = vmatprep.mubr.bf16.mxu1 %v5011_v35  ;;  %v3913_v35 = vld [vmem:[%s5877_s3 + $0x218] sm:$0xff]   ;;  %v3917_v24 = vld [vmem:[%s5877_s3 + $0x220] sm:$0xff]  }
 0x159   : > { %3728 = vmatprep.subr.bf16.mxu0 %v3907_v20  ;;  %3685 = vmatpush3.bf16.msra.mxu1 %v3912_v3  ;;  %v3919_v20 = vld [vmem:[%s5877_s3 + $0x268] sm:$0xff]  }
 0x15a   : > { %3686 = vmatprep.subr.bf16.mxu1 %v3914_v30  ;;  %v3926_v30 = vld [vmem:[%s5877_s3 + $0x1e0] sm:$0xff]  }
 0x15c   : > { %v1635_v43 = vpop.permute.xlu0 %1634  ;;  %3729 = vmatpush3.bf16.msra.mxu0 %v3909_v28 }
 0x15d   : > { %3730 = vmatprep.subr.bf16.mxu0 %v3911_v40  ;;  %3687 = vmatpush3.bf16.msra.mxu1 %v3916_v57  ;;  %v1646_v60 = vsel %vm1237_vm8, %v5300_v12, %v1635_v43  ;;  %v3923_v40 = vld [vmem:[%s5877_s3 + $0x270] sm:$0xff]   ;;  %v3928_v43 = vld [vmem:[%s5877_s3 + $0x1a0] sm:$0xff]  }
 0x15e   : > { %v5429_v63 = vpop.permute.xlu1 %1668  ;;  %3688 = vmatprep.subr.bf16.mxu1 %v3918_v39 }
 0x15f   : > { %v5438_v23 = vsel %vm1237_vm8, %v5429_v63, %v1671_v21  ;;  %2799 = vmatmul.mubr.bf16.gmra.mrb[20].mxu1 %v1646_v60  ;;  %v1775_v12 = vsel %vm1237_vm8, %v5323_v9, %v5429_v63  ;;  %v5452_v21 = vsel %vm1237_vm8, %v5074_v7, %v1521_v0  ;;  %v3924_v9 = vld [vmem:[%s5877_s3 + $0x198] sm:$0xff]  }
 0x160   : > { %2863 = vmatprep.mubr.bf16.mxu0 %v5438_v23  ;;  %3731 = vmatpush3.bf16.msra.mxu0 %v3913_v35 }
 0x161   : > { %2864 = vmatmul.mubr.bf16.gmra.mrb[4].mxu0 %v1775_v12  ;;  %3732 = vmatprep.subr.bf16.mxu0 %v3915_v59  ;;  %v3930_v59 = vld [vmem:[%s5877_s3 + $0x1e8] sm:$0xff]  }
 0x162   : > { %v1523_v3 = vpop.permute.xlu1 %1522  ;;  %2806 = vmatprep.mubr.bf16.mxu1 %v5079_v15  ;;  %3689 = vmatpush3.bf16.msra.mxu1 %v3920_v52  ;;  %v3921_v15 = vld [vmem:[%s5877_s3 + $0x228] sm:$0xff]  }
 0x163   : > { %v5463_v61 = vsel %vm1237_vm8, %v5106_v19, %v1523_v3  ;;  %3690 = vmatprep.subr.bf16.mxu1 %v3922_v32  ;;  %v3927_v32 = vld [vmem:[%s5877_s3 + $0x278] sm:$0xff]   ;;  %v3932_v3 = vld [vmem:[%s5877_s3 + $0x1f0] sm:$0xff]   ;;  %v3436_v19 = vcombine.low %v5913_v1, %v1555_v46 }
 0x164   : > { %v3437_v0 = vcombine.low %v5452_v21, %v5463_v61  ;;  %v5470_v28 = vpop.permute.xlu0 %1672  ;;  %3733 = vmatpush3.bf16.msra.mxu0 %v3917_v24  ;;  %v3931_v24 = vld [vmem:[%s5877_s3 + $0x1a8] sm:$0xff]  }
 0x165   : > { %3734 = vmatprep.subr.bf16.mxu0 %v3919_v20  ;;  %v1778_v39 = vsel %vm1237_vm8, %v5364_v34, %v5470_v28  ;;  %v3925_v34 = vld [vmem:[%s5877_s3 + $0x230] sm:$0xff]  }
 0x166   : > { %v1675_v57 = vpop.permute.xlu1 %1674  ;;  %1728 = vrot.lane.b32.xlu0 %v3437_v0, %s4231_s24  ;;  %3691 = vmatpush3.bf16.msra.mxu1 %v3924_v9  ;;  %v3929_v0 = vld [vmem:[%s5877_s3 + $0x238] sm:$0xff]  }
 0x167   : > { %v5487_v35 = vsel %vm1237_vm8, %v5470_v28, %v1675_v57  ;;  %3692 = vmatprep.subr.bf16.mxu1 %v3926_v30 }
 0x168   : > { %2871 = vmatprep.mubr.bf16.mxu0 %v5487_v35  ;;  %v1527_v60 = vpop.permute.xlu0 %1526  ;;  %3735 = vmatpush3.bf16.msra.mxu0 %v3921_v15  ;;  %v3933_v15 = vld [vmem:[%s5877_s3 + $0x1b0] sm:$0xff]  }
 0x169   : > { %2872 = vmatmul.mubr.bf16.gmra.mrb[8].mxu0 %v1778_v39  ;;  %v5498_v52 = vsel %vm1237_vm8, %v5130_v16, %v1527_v60  ;;  %3736 = vmatprep.subr.bf16.mxu0 %v3923_v40  ;;  %v3934_v40 = vld [vmem:[%s5877_s3 + $0x1f8] sm:$0xff]   ;;  %v3410_v39 = vcombine.low %v1235_v56, %v4975_v54  ;;  %v5915_v16 = vrot.slane %v5074_v7, 1 }
 0x16a   : > { %v1525_v12 = vpop.permute.xlu1 %1524  ;;  %3693 = vmatpush3.bf16.msra.mxu1 %v3928_v43  ;;  %v5906_v43 = vmov 0  }
 0x16b   : > { %v1565_v20 = vsel %vm1237_vm8, %v5141_v42, %v1525_v12  ;;  %3694 = vmatprep.subr.bf16.mxu1 %v3930_v59  ;;  %v3935_v59 = vld [vmem:[%s5877_s3 + $0x1b8] sm:$0xff]   ;;  %v5914_v42 = vrot.slane %v5241_v37, 1 }
 0x16c   : > { %v3439_v9 = vcombine.low %v1565_v20, %v5498_v52  ;;  %v1679_v30 = vpop.permute.xlu0 %1678  ;;  %3737 = vmatpush3.bf16.msra.mxu0 %v3925_v34  ;;  %v3941_v34 = vld [vmem:[%s5877_s3 + $0x2c0] sm:$0xff]  }
 0x16d   : > { %3738 = vmatprep.subr.bf16.mxu0 %v3927_v32 }
 0x16e   : > { %1732 = vrot.lane.b32.xlu0 %v3439_v9, %s4231_s24  ;;  %3695 = vmatpush3.bf16.msra.mxu1 %v3931_v24 }
 0x16f   : > { %3696 = vmatprep.subr.bf16.mxu1 %v3932_v3 }
 0x170   : > { %v1529_v57 = vpop.permute.xlu0 %1528  ;;  %3739 = vmatpush3.bf16.msra.mxu0 %v3929_v0 }
 0x171   : > { %3083 = vmatprep.subr.bf16.mxu0 %v5906_v43 }
 0x172   : > { %3697 = vmatpush3.bf16.msra.mxu1 %v3933_v15 }
 0x173   : > { %v5529_v60 = vpop.permute.xlu1 %1676  ;;  %3698 = vmatprep.subr.bf16.mxu1 %v3934_v40 }
 0x174   : > { %v5536_v32 = vsel %vm1237_vm8, %v5529_v60, %v1679_v30  ;;  %v3853_v53 = vpop.permute.xlu0 %3852  ;;  %v1782_v56 = vsel %vm1237_vm8, %v3410_v39, %v5529_v60  ;;  %v1569_v39 = vsel %vm1237_vm8, %v5170_v29, %v1529_v57  ;;  %v3446_v29 = vcombine.low %v5914_v42, %v4975_v54 }
 0x175   : > { %2879 = vmatprep.mubr.bf16.mxu0 %v5536_v32  ;;  %v3855_v12 = vunpack.i.h.bf16 %v3853_v53  ;;  %v3854_v24 = vunpack.i.l.bf16 %v3853_v53 }
 0x176   : > { %2880 = vmatmul.mubr.bf16.gmra.mrb[12].mxu0 %v1782_v56  ;;  %3699 = vmatpush3.bf16.msra.mxu1 %v3935_v59  ;;  %v5908_v56 = vrot.slane %v4690_v33, 1 }
 0x177   : > { %v1639_v3 = vpop.permute.xlu1 %1638  ;;  %v1257_v9 = vsel %vm1237_vm8, 0.0|0.0, %v3855_v12  ;;  %v1559_v0 = vsel %vm1237_vm8, 0.0|0.0, %v3854_v24  ;;  %3764 = vmatprep.subr.bf16.mxu1 %v3941_v34  ;;  %v3936_v34 = vld [vmem:[%s5877_s3 + $0x300] sm:$0xff]  }
 0x178   : > { %v1647_v30 = vsel %vm1237_vm8, %v5325_v13, %v1639_v3  ;;  %v3409_v15 = vcombine.low %v5072_v4, %v1257_v9  ;;  %v3429_v40 = vcombine.low %v1559_v0, %v5452_v21  ;;  %v5555_v13 = vcombine.low %v5463_v61, %v1565_v20  ;;  %v1533_v24 = vpop.permute.xlu0 %1532  ;;  %v3937_v61 = vld [vmem:[%s5877_s3 + $0x308] sm:$0xff]  }
 0x179   : > { %2807 = vmatmul.mubr.bf16.gmra.mrb[24].mxu1 %v1647_v30  ;;  %v5907_v21 = vrot.slane %v4740_v25, 1  ;;  %v1573_v25 = vsel %vm1237_vm8, %v5209_v14, %v1533_v24  ;;  %v5582_v9 = vcombine.low %v5498_v52, %v1569_v39  ;;  %v5909_v0 = vrot.slane %v4750_v55, 1  ;;  %v3944_v52 = vld [vmem:[%s5877_s3 + $0x2c8] sm:$0xff]   ;;  %v3939_v55 = vld [vmem:[%s5877_s3 + $0x318] sm:$0xff]  }
 0x17a   : > { %2814 = vmatprep.mubr.bf16.mxu1 %v3409_v15  ;;  %2985 = vmatprep.mubr.bf16.mxu0 %v3429_v40  ;;  %v3943_v15 = vld [vmem:[%s5877_s3 + $0x280] sm:$0xff]   ;;  %v3424_v40 = vcombine.low %v1393_v51, %v1394_v38  ;;  %v3952_v38 = vld [vmem:[%s5877_s3 + $0x298] sm:$0xff]  }
 0x17b   : > { %v1531_v59 = vpop.permute.xlu1 %1530  ;;  %v3420_v12 = vcombine.low %v5908_v56, %v5907_v21  ;;  %v3422_v30 = vcombine.low %v5909_v0, %v1392_v62  ;;  %v3951_v21 = vld [vmem:[%s5877_s3 + $0x340] sm:$0xff]   ;;  %v3954_v56 = vld [vmem:[%s5877_s3 + $0x348] sm:$0xff]   ;;  %v3960_v24 = vld [vmem:[%s5877_s3 + $0x358] sm:$0xff]  }
 0x17c   : > { %v1571_v53 = vsel %vm1237_vm8, %v5212_v49, %v1531_v59  ;;  %v1791_v51 = vsel %vm1237_vm8, %v3424_v40, %v5529_v60  ;;  %v3956_v60 = vld [vmem:[%s5877_s3 + $0x2e8] sm:$0xff]   ;;  %v3948_v59 = vld [vmem:[%s5877_s3 + $0x338] sm:$0xff]  }
 0x17d   : > { %v3441_v4 = vcombine.low %v1569_v39, %v1571_v53  ;;  %v1785_v33 = vsel %vm1237_vm8, %v3420_v12, %v5429_v63  ;;  %v1788_v62 = vsel %vm1237_vm8, %v3422_v30, %v5470_v28  ;;  %v5619_v28 = vcombine.low %v1571_v53, %v1573_v25  ;;  %v3950_v39 = vld [vmem:[%s5877_s3 + $0x2d8] sm:$0xff]  }
 0x17e   : > { %2986 = vmatmul.mubr.bf16.vlgmr.msra.gmra.mrb[16].mxu0 %v5438_v23  ;;  %v5912_v53 = vcombine.low %v5178_v58, %v5174_v17  ;;  %v3961_v17 = vld [vmem:[%s5877_s3 + $0x2b0] sm:$0xff]   ;;  %v3962_v58 = vld [vmem:[%s5877_s3 + $0x2f8] sm:$0xff]  }
 0x17f   : > { %v1643_v57 = vpop.permute.xlu1 %1642  ;;  %1736 = vrot.lane.b32.xlu0 %v3441_v4, %s4231_s24  ;;  %2993 = vmatprep.mubr.bf16.mxu0 %v5555_v13  ;;  %v3959_v4 = vld [vmem:[%s5877_s3 + $0x2f0] sm:$0xff]   ;;  %v3963_v12 = vld [vmem:[%s5877_s3 + $0x2b8] sm:$0xff]  }
 0x180   : > { %v1648_v3 = vsel %vm1237_vm8, %v5369_v26, %v1643_v57  ;;  %3084 = vmatpush1.bf16.msra.mxu0 %v3936_v34  ;;  %v3938_v26 = vld [vmem:[%s5877_s3 + $0x310] sm:$0xff]   ;;  %v3958_v34 = vld [vmem:[%s5877_s3 + $0x2a8] sm:$0xff]  }
 0x181   : > { %2815 = vmatmul.mubr.bf16.gmra.mrb[28].mxu1 %v1648_v3  ;;  %3085 = vmatprep.subr.bf16.mxu0 %v5906_v43  ;;  %v3957_v57 = vld [vmem:[%s5877_s3 + $0x350] sm:$0xff]   ;;  %v3426_v3 = vcombine.low %v1395_v10, %v1396_v27  ;;  %v3430_v10 = vcombine.low %v4975_v54, %v5915_v16 }
 0x182   : > { %2920 = vmatprep.mubr.bf16.mxu1 %v1785_v33  ;;  %v3432_v33 = vcombine.low %v1550_v41, %v1551_v2 }
 0x183   : > { %v1535_v23 = vpop.permute.xlu1 %1534 }
 0x184   : > { %v5576_v20 = vsel %vm1237_vm8, %v5241_v37, %v1535_v23  ;;  %3086 = vmatpush1.bf16.msra.mxu0 %v3937_v61  ;;  %v3425_v23 = vcombine.low %v5227_v47, %v5343_v44 }
 0x185   : > { %v3443_v63 = vcombine.low %v1573_v25, %v5576_v20  ;;  %3087 = vmatprep.subr.bf16.mxu0 %v5906_v43 }
 0x186   : > { %2994 = vmatmul.mubr.bf16.gmra.mrb[20].mxu0 %v5487_v35  ;;  %v3946_v35 = vld [vmem:[%s5877_s3 + $0x288] sm:$0xff]  }
 0x187   : > { %1740 = vrot.lane.b32.xlu0 %v3443_v63, %s4231_s24  ;;  %3001 = vmatprep.mubr.bf16.mxu0 %v5582_v9  ;;  %v1705_v61 = vpop.permute.xlu1 %1704 }
 0x188   : > { %3088 = vmatpush1.bf16.msra.mxu0 %v3938_v26 }
 0x189   : > { %2921 = vmatmul.mubr.bf16.vlgmr.msra.gmra.mrb[32].mxu1 %v5910_v48  ;;  %3089 = vmatprep.subr.bf16.mxu0 %v5906_v43 }
 0x18a   : > { %2928 = vmatprep.mubr.bf16.mxu1 %v1788_v62  ;;  %3765 = vmatpush3.bf16.msra.mxu1 %v3943_v15 }
 0x18b   : > { %1536 = vrot.lane.b32.xlu0 %v4348_v11, %s4231_s24  ;;  %3766 = vmatprep.subr.bf16.mxu1 %v3944_v52  ;;  %v3949_v11 = vld [vmem:[%s5877_s3 + $0x290] sm:$0xff]   ;;  %v1731_v14 = vpop.permute.xlu1 %1730  ;;  %s3388_s24 = sshll.u32 %s5933_s30, 3 }
 0x18c   : > { %3090 = vmatpush1.bf16.msra.mxu0 %v3939_v55  ;;  %s448_s26 = sadd.s32 %s3389_s17, %s3388_s24 }
 0x18d   : > { %3091 = vmatprep.subr.bf16.mxu0 %v5906_v43  ;;  %s3390_s30 = sshll.u32 %s448_s26, 2 }
 0x18e   : > { %3002 = vmatmul.mubr.bf16.gmra.mrb[24].mxu0 %v5536_v32  ;;  %3767 = vmatpush3.bf16.msra.mxu1 %v3946_v35  ;;  %v3953_v32 = vld [vmem:[%s5877_s3 + $0x2e0] sm:$0xff]   ;;  %s5833_s29 = scalar_lea.vmem %s5883_s9, %s3390_s30 }
 0x18f   : > { %3009 = vmatprep.mubr.bf16.mxu0 %v5619_v28  ;;  %3768 = vmatprep.subr.bf16.mxu1 %v3947_v5  ;;  %v1735_v41 = vpop.permute.xlu1 %1734 }
 0x190   : > { %3092 = vmatpush1.bf16.msra.mxu0 %v3940_v45 }
 0x191   : > { %2929 = vmatmul.mubr.bf16.gmra.mrb[36].mxu1 %v5911_v50  ;;  %3093 = vmatprep.subr.bf16.mxu0 %v5906_v43 }
 0x192   : > { %2936 = vmatprep.mubr.bf16.mxu1 %v1791_v51  ;;  %3769 = vmatpush3.bf16.msra.mxu1 %v3949_v11 }
 0x193   : > { %3770 = vmatprep.subr.bf16.mxu1 %v3950_v39  ;;  %v1739_v31 = vpop.permute.xlu1 %1738 }
 0x194   : > { %3094 = vmatpush1.bf16.msra.mxu0 %v3942_v6 }
 0x195   : > { %3095 = vmatprep.subr.bf16.mxu0 %v5906_v43 }
 0x196   : > { %3771 = vmatpush3.bf16.msra.mxu1 %v3952_v38 }
 0x197   : > { %3772 = vmatprep.subr.bf16.mxu1 %v3953_v32  ;;  %v1743_v44 = vpop.permute.xlu1 %1742 }
 0x198   : > { %3096 = vmatpush1.bf16.msra.mxu0 %v3945_v8 }
 0x199   : > { %2937 = vmatmul.mubr.bf16.gmra.mrb[40].mxu1 %v5912_v53  ;;  %3097 = vmatprep.subr.bf16.mxu0 %v5906_v43 }
 0x19a   : > { %3773 = vmatpush3.bf16.msra.mxu1 %v3955_v36 }
 0x19b   : > { %3774 = vmatprep.subr.bf16.mxu1 %v3956_v60 }
 0x19c   : > { %3098 = vmatpush1.bf16.msra.mxu0 %v3948_v59 }
 0x19d   : > { %3099 = vmatprep.subr.bf16.mxu0 %v5906_v43 }
 0x19e   : > { %3775 = vmatpush3.bf16.msra.mxu1 %v3958_v34 }
 0x19f   : > { %3776 = vmatprep.subr.bf16.mxu1 %v3959_v4 }
 0x1a0   : > { %3100 = vmatpush1.bf16.msra.mxu0 %v3951_v21 }
 0x1a1   : > { %3101 = vmatprep.subr.bf16.mxu0 %v5906_v43 }
 0x1a2   : > { %3777 = vmatpush3.bf16.msra.mxu1 %v3961_v17 }
 0x1a3   : > { %3778 = vmatprep.subr.bf16.mxu1 %v3962_v58 }
 0x1a4   : > { %3102 = vmatpush1.bf16.msra.mxu0 %v3954_v56 }
 0x1a5   : > { %3103 = vmatprep.subr.bf16.mxu0 %v5906_v43 }
 0x1a6   : > { %3779 = vmatpush3.bf16.msra.mxu1 %v3963_v12  ;;  %v5747_v12 = vld [vmem:[%s5878_s4] ss:$0 sm:$0xff] }
 0x1a8   : > { %3104 = vmatpush1.bf16.msra.mxu0 %v3957_v57 }
 0x1a9   : > { %3105 = vmatprep.subr.bf16.mxu0 %v5906_v43 }
 0x1ac   : > { %3106 = vmatpush1.bf16.msra.mxu0 %v3960_v24 }
 0x1b6   : > { %v1703_v25 = vpop.permute.xlu0 %1702 }
 0x1b7   : > { %v1795_v26 = vsel %vm1237_vm8, %v3426_v3, %v1703_v25  ;;  %v1706_v43 = vsel %vm1237_vm8, %v1703_v25, %v1705_v61 }
 0x1b8   : > { %2944 = vmatprep.mubr.bf16.mxu1 %v1795_v26  ;;  %3010 = vmatmul.mubr.bf16.gmra.mrb[28].mxu0 %v1706_v43 }
 0x1b9   : > { %2945 = vmatmul.mubr.bf16.gmra.mrb[44].mxu1 %v3425_v23  ;;  %3556 = vmatprep.mubr.msk.bf16.mxu0 %vm1237_vm8, %v3432_v33 }
 0x1c0   : > { %3116 = vmatmul.mubr.bf16.vlgmr.msra.gmra.mrb[32].mxu0 %v5555_v13 }
 0x1c1   : > { %3557 = vmatprep.mubr.msk.bf16.mxu0 %vm1237_vm8, %v3434_v18 }
 0x1c8   : > { %3124 = vmatmul.mubr.bf16.gmra.mrb[36].mxu0 %v5582_v9 }
 0x1c9   : > { %3558 = vmatprep.mubr.msk.bf16.mxu0 %vm1237_vm8, %v3436_v19 }
 0x1d0   : > { %3132 = vmatmul.mubr.bf16.gmra.mrb[40].mxu0 %v5619_v28 }
 0x1d1   : > { %3559 = vmatprep.mubr.msk.bf16.mxu0 %vm1237_vm8, %v3446_v29 }
 0x1d8   : > { %v1729_v47 = vpop.permute.xlu0 %1728 }
 0x1d9   : > { %v1799_v49 = vsel %vm1237_vm8, %v3430_v10, %v1729_v47  ;;  %v1744_v27 = vsel %vm1237_vm8, %v1729_v47, %v1731_v14 }
 0x1da   : > { %3050 = vmatprep.mubr.bf16.mxu1 %v1744_v27 }
 0x1db   : > { %3051 = vmatmul.mubr.bf16.vlgmr.msra.gmra.mrb[48].mxu1 %v1799_v49 }
 0x1e0   : > { %v1733_v2 = vpop.permute.xlu0 %1732 }
 0x1e1   : > { %v1745_v37 = vsel %vm1237_vm8, %v1733_v2, %v1735_v41  ;;  %v1803_v22 = vsel %vm1237_vm8, %v3432_v33, %v1733_v2 }
 0x1e2   : > { %3058 = vmatprep.mubr.bf16.mxu1 %v1745_v37 }
 0x1e3   : > { %3059 = vmatmul.mubr.bf16.gmra.mrb[52].mxu1 %v1803_v22 }
 0x1f1   : > { %v1737_v7 = vpop.permute.xlu0 %1736 }
 0x1f2   : > { %v1746_v54 = vsel %vm1237_vm8, %v1737_v7, %v1739_v31  ;;  %v1807_v46 = vsel %vm1237_vm8, %v3434_v18, %v1737_v7 }
 0x1f3   : > { %3066 = vmatprep.mubr.bf16.mxu1 %v1746_v54 }
 0x1f4   : > { %3067 = vmatmul.mubr.bf16.gmra.mrb[56].mxu1 %v1807_v46 }
 0x1f9   : > { %v1741_v13 = vpop.permute.xlu0 %1740 }
 0x1fa   : > { %v1747_v9 = vsel %vm1237_vm8, %v1741_v13, %v1743_v44  ;;  %v1811_v63 = vsel %vm1237_vm8, %v3436_v19, %v1741_v13 }
 0x1fb   : > { %3074 = vmatprep.mubr.bf16.mxu1 %v1747_v9 }
 0x1fc   : > { %3075 = vmatmul.mubr.bf16.gmra.mrb[60].mxu1 %v1811_v63 }
 0x1fd   : > { %v1537_v0 = vpop.permute.xlu0 %1536 }
 0x1fe   : > { %v1577_v30 = vsel %vm1237_vm8, 0.0|0.0, %v1537_v0 }
 0x1ff   : > { %v3445_v15 = vcombine.low %v5576_v20, %v1577_v30 }
 0x201   : > { %3140 = vmatmul.mubr.bf16.gmra.mrb[44].mxu0 %v3445_v15 }
 0x20a   : > { %v3580_v52 = vpop.f32.mrb[0].mxu1 }
 0x20b   : > { %v3581_v55 = vpop.f32.mrb[1].mxu1 }
 0x20c   : > { %v3582_v48 = vadd.f32 %v3581_v55, %v3580_v52  ;;  %v3583_v62 = vpop.f32.mrb[2].mxu1 }
 0x20d   : > { %v3584_v35 = vpop.f32.mrb[3].mxu1 }
 0x20e   : > { %v3585_v5 = vadd.f32 %v3584_v35, %v3583_v62  ;;  %v2728_v33 = vadd.f32 %v3582_v48, %v5747_v12 }
 0x210   : > { %v2731_v43 = vadd.f32 %v3585_v5, %v5747_v12 }
 0x212   : > { %v3586_v45 = vpop.f32.mrb[4].mxu1 }
 0x213   : > { %v3587_v28 = vpop.f32.mrb[5].mxu1 }
 0x214   : > { %v3588_v40 = vadd.f32 %v3587_v28, %v3586_v45  ;;  %v3589_v11 = vpop.f32.mrb[6].mxu1 }
 0x215   : > { %v3590_v39 = vpop.f32.mrb[7].mxu1 }
 0x216   : > { %v3591_v6 = vadd.f32 %v3590_v39, %v3589_v11  ;;  %v2736_v14 = vadd.f32 %v3588_v40, %v5747_v12 }
 0x218   : > { %v2739_v37 = vadd.f32 %v3591_v6, %v5747_v12 }
 0x21a   : > { %v3592_v50 = vpop.f32.mrb[8].mxu1 }
 0x21b   : > { %v3593_v51 = vpop.f32.mrb[9].mxu1 }
 0x21c   : > { %v3594_v38 = vadd.f32 %v3593_v51, %v3592_v50  ;;  %v3595_v32 = vpop.f32.mrb[10].mxu1 }
 0x21d   : > { %v3596_v8 = vpop.f32.mrb[11].mxu1 }
 0x21e   : > { %v3597_v36 = vadd.f32 %v3596_v8, %v3595_v32  ;;  %v2744_v6 = vadd.f32 %v3594_v38, %v5747_v12 }
 0x220   : > { %v2747_v8 = vadd.f32 %v3597_v36, %v5747_v12 }
 0x222   : > { %v3598_v20 = vpop.f32.mrb[12].mxu1 }
 0x223   : > { %v3599_v60 = vpop.f32.mrb[13].mxu1 }
 0x224   : > { %v5740_v59 = vadd.f32 %v3599_v60, %v3598_v20  ;;  %v3601_v53 = vpop.f32.mrb[14].mxu1 }
 0x225   : > { %v3602_v34 = vpop.f32.mrb[15].mxu1 }
 0x226   : > { %v3660_v4 = vpop.f32.mrb[0].mxu0  ;;  %v5742_v21 = vadd.f32 %v3602_v34, %v3601_v53  ;;  %v2752_v38 = vadd.f32 %v5740_v59, %v5747_v12 }
 0x227   : > { %v3661_v17 = vpop.f32.mrb[1].mxu0 }
 0x228   : > { %v3662_v58 = vadd.f32 %v3661_v17, %v3660_v4  ;;  %v3663_v56 = vpop.f32.mrb[2].mxu0  ;;  %v2755_v36 = vadd.f32 %v5742_v21, %v5747_v12 }
 0x229   : > { %v3664_v57 = vpop.f32.mrb[3].mxu0 }
 0x22a   : > { %v3665_v24 = vadd.f32 %v3664_v57, %v3663_v56  ;;  %v3620_v3 = vpop.f32.mrb[16].mxu1 }
 0x22b   : > { %v3621_v61 = vpop.f32.mrb[17].mxu1 }
 0x22c   : > { %v3622_v25 = vadd.f32 %v3621_v61, %v3620_v3  ;;  %v3623_v23 = vpop.f32.mrb[18].mxu1 }
 0x22d   : > { %v3624_v26 = vpop.f32.mrb[19].mxu1 }
 0x22e   : > { %v2793_v18 = vadd.f32 %v3622_v25, %v2728_v33  ;;  %v3625_v1 = vadd.f32 %v3624_v26, %v3623_v23 }
 0x230   : > { %v2796_v19 = vadd.f32 %v3625_v1, %v2731_v43  ;;  %v5751_v42 = vadd.f32 %v3662_v58, %v2793_v18 }
 0x232   : > { %v3626_v29 = vpop.f32.mrb[20].mxu1  ;;  %v5753_v16 = vadd.f32 %v3665_v24, %v2796_v19 }
 0x233   : > { %v3627_v10 = vpop.f32.mrb[21].mxu1 }
 0x234   : > { %v3666_v47 = vpop.f32.mrb[4].mxu0  ;;  %v3628_v49 = vadd.f32 %v3627_v10, %v3626_v29  ;;  %v3629_v27 = vpop.f32.mrb[22].mxu1 }
 0x235   : > { %v3667_v41 = vpop.f32.mrb[5].mxu0  ;;  %v3630_v2 = vpop.f32.mrb[23].mxu1 }
 0x236   : > { %v3668_v22 = vadd.f32 %v3667_v41, %v3666_v47  ;;  %v3669_v31 = vpop.f32.mrb[6].mxu0  ;;  %v2801_v7 = vadd.f32 %v3628_v49, %v2736_v14  ;;  %v3631_v54 = vadd.f32 %v3630_v2, %v3629_v27 }
 0x237   : > { %v3670_v46 = vpop.f32.mrb[7].mxu0 }
 0x238   : > { %v3671_v44 = vadd.f32 %v3670_v46, %v3669_v31  ;;  %v2804_v13 = vadd.f32 %v3631_v54, %v2739_v37  ;;  %v5757_v9 = vadd.f32 %v3668_v22, %v2801_v7 }
 0x23a   : > { %v5759_v63 = vadd.f32 %v3671_v44, %v2804_v13 }
 0x23c   : > { %v3672_v0 = vpop.f32.mrb[8].mxu0 }
 0x23d   : > { %v3673_v30 = vpop.f32.mrb[9].mxu0 }
 0x23e   : > { %v3674_v15 = vadd.f32 %v3673_v30, %v3672_v0  ;;  %v3675_v52 = vpop.f32.mrb[10].mxu0 }
 0x23f   : > { %v3676_v55 = vpop.f32.mrb[11].mxu0 }
 0x240   : > { %v3677_v48 = vadd.f32 %v3676_v55, %v3675_v52 }
 0x249   : > { %v3678_v62 = vpop.f32.mrb[12].mxu0 }
 0x24a   : > { %v3679_v35 = vpop.f32.mrb[13].mxu0 }
 0x24b   : > { %v3680_v5 = vadd.f32 %v3679_v35, %v3678_v62  ;;  %v3681_v45 = vpop.f32.mrb[14].mxu0 }
 0x24c   : > { %v3682_v28 = vpop.f32.mrb[15].mxu0  ;;  %v3632_v40 = vpop.f32.mrb[24].mxu1 }
 0x24d   : > { %v3683_v11 = vadd.f32 %v3682_v28, %v3681_v45  ;;  %v3633_v39 = vpop.f32.mrb[25].mxu1 }
 0x24e   : > { %v3634_v50 = vadd.f32 %v3633_v39, %v3632_v40  ;;  %v3635_v51 = vpop.f32.mrb[26].mxu1 }
 0x24f   : > { %v3636_v32 = vpop.f32.mrb[27].mxu1 }
 0x250   : > { %v2809_v20 = vadd.f32 %v3634_v50, %v2744_v6  ;;  %v3637_v60 = vadd.f32 %v3636_v32, %v3635_v51 }
 0x251   : > { %v3740_v53 = vpop.f32.mrb[16].mxu0 }
 0x252   : > { %v2812_v34 = vadd.f32 %v3637_v60, %v2747_v8  ;;  %v3741_v4 = vpop.f32.mrb[17].mxu0  ;;  %v2874_v17 = vadd.f32 %v3674_v15, %v2809_v20 }
 0x253   : > { %v3742_v58 = vadd.f32 %v3741_v4, %v3740_v53  ;;  %v3743_v56 = vpop.f32.mrb[18].mxu0 }
 0x254   : > { %v3744_v57 = vpop.f32.mrb[19].mxu0  ;;  %v3638_v24 = vpop.f32.mrb[28].mxu1  ;;  %v2877_v3 = vadd.f32 %v3677_v48, %v2812_v34 }
 0x255   : > { %v3745_v61 = vadd.f32 %v3744_v57, %v3743_v56  ;;  %v3639_v33 = vpop.f32.mrb[29].mxu1 }
 0x256   : > { %v3640_v25 = vadd.f32 %v3639_v33, %v3638_v24  ;;  %v3641_v23 = vpop.f32.mrb[30].mxu1 }
 0x257   : > { %v3642_v26 = vpop.f32.mrb[31].mxu1 }
 0x258   : > { %v2817_v43 = vadd.f32 %v3640_v25, %v2752_v38  ;;  %v3643_v18 = vadd.f32 %v3642_v26, %v3641_v23 }
 0x259   : > { %v3746_v1 = vpop.f32.mrb[20].mxu0 }
 0x25a   : > { %v2820_v19 = vadd.f32 %v3643_v18, %v2755_v36  ;;  %v3747_v29 = vpop.f32.mrb[21].mxu0  ;;  %v2882_v10 = vadd.f32 %v3680_v5, %v2817_v43 }
 0x25b   : > { %v3748_v14 = vadd.f32 %v3747_v29, %v3746_v1  ;;  %v3749_v47 = vpop.f32.mrb[22].mxu0 }
 0x25c   : > { %v3750_v49 = vpop.f32.mrb[23].mxu0  ;;  %v3700_v27 = vpop.f32.mrb[32].mxu1  ;;  %v2885_v41 = vadd.f32 %v3683_v11, %v2820_v19 }
 0x25d   : > { %v3751_v2 = vadd.f32 %v3750_v49, %v3749_v47  ;;  %v3701_v37 = vpop.f32.mrb[33].mxu1 }
 0x25e   : > { %v3702_v59 = vadd.f32 %v3701_v37, %v3700_v27  ;;  %v3703_v22 = vpop.f32.mrb[34].mxu1 }
 0x25f   : > { %v3704_v31 = vpop.f32.mrb[35].mxu1 }
 0x260   : > { %v2923_v7 = vadd.f32 %v3702_v59, %v5751_v42  ;;  %v3705_v54 = vadd.f32 %v3704_v31, %v3703_v22 }
 0x261   : > { %v3752_v21 = vpop.f32.mrb[24].mxu0 }
 0x262   : > { %v2926_v12 = vadd.f32 %v3705_v54, %v5753_v16  ;;  %v3753_v46 = vpop.f32.mrb[25].mxu0  ;;  %v2988_v44 = vadd.f32 %v3742_v58, %v2923_v7 }
 0x263   : > { %v3754_v13 = vadd.f32 %v3753_v46, %v3752_v21  ;;  %v3755_v0 = vpop.f32.mrb[26].mxu0  ;;  %v5786_v21 = vld [vmem:[%s5881_s7] ss:$0 sm:$0xff] }
 0x264   : > { %v3756_v30 = vpop.f32.mrb[27].mxu0  ;;  %v3706_v15 = vpop.f32.mrb[36].mxu1  ;;  %v2991_v52 = vadd.f32 %v3745_v61, %v2926_v12 }
 0x265   : > { %v3757_v55 = vadd.f32 %v3756_v30, %v3755_v0  ;;  %v3707_v48 = vpop.f32.mrb[37].mxu1 }
 0x266   : > { %v3708_v62 = vadd.f32 %v3707_v48, %v3706_v15  ;;  %v3709_v35 = vpop.f32.mrb[38].mxu1 }
 0x267   : > { %v3710_v5 = vpop.f32.mrb[39].mxu1 }
 0x268   : > { %v2931_v45 = vadd.f32 %v3708_v62, %v5757_v9  ;;  %v3711_v28 = vadd.f32 %v3710_v5, %v3709_v35 }
 0x26a   : > { %v2934_v42 = vadd.f32 %v3711_v28, %v5759_v63  ;;  %v2996_v40 = vadd.f32 %v3748_v14, %v2931_v45 }
 0x26c   : > { %v3712_v11 = vpop.f32.mrb[40].mxu1  ;;  %v5771_v16 = vadd.f32 %v3751_v2, %v2934_v42 }
 0x26d   : > { %v3713_v39 = vpop.f32.mrb[41].mxu1 }
 0x26e   : > { %v3714_v6 = vadd.f32 %v3713_v39, %v3712_v11  ;;  %v3715_v50 = vpop.f32.mrb[42].mxu1 }
 0x26f   : > { %v3716_v51 = vpop.f32.mrb[43].mxu1 }
 0x270   : > { %v2939_v32 = vadd.f32 %v3714_v6, %v2874_v17  ;;  %v3717_v8 = vadd.f32 %v3716_v51, %v3715_v50 }
 0x272   : > { %v2942_v20 = vadd.f32 %v3717_v8, %v2877_v3  ;;  %v5773_v60 = vadd.f32 %v3754_v13, %v2939_v32  ;;  %v5791_v13 = vld [vmem:[%s5882_s8] ss:$0 sm:$0xff] }
 0x274   : > { %v5775_v53 = vadd.f32 %v3757_v55, %v2942_v20 }
 0x28b   : > { %v3758_v34 = vpop.f32.mrb[28].mxu0 }
 0x28c   : > { %v3718_v9 = vpop.f32.mrb[44].mxu1  ;;  %v3759_v4 = vpop.f32.mrb[29].mxu0 }
 0x28d   : > { %v3760_v58 = vadd.f32 %v3759_v4, %v3758_v34  ;;  %v3719_v63 = vpop.f32.mrb[45].mxu1  ;;  %v3761_v56 = vpop.f32.mrb[30].mxu0 }
 0x28e   : > { %v3720_v57 = vadd.f32 %v3719_v63, %v3718_v9  ;;  %v3721_v24 = vpop.f32.mrb[46].mxu1  ;;  %v3762_v61 = vpop.f32.mrb[31].mxu0 }
 0x28f   : > { %v3763_v33 = vadd.f32 %v3762_v61, %v3761_v56  ;;  %v3722_v38 = vpop.f32.mrb[47].mxu1 }
 0x290   : > { %v2947_v25 = vadd.f32 %v3720_v57, %v2882_v10  ;;  %v3723_v23 = vadd.f32 %v3722_v38, %v3721_v24 }
 0x292   : > { %v2950_v17 = vadd.f32 %v3723_v23, %v2885_v41  ;;  %v5777_v26 = vadd.f32 %v3760_v58, %v2947_v25 }
 0x293   : > { %v3117_v3 = vpop.f32.mrb[32].mxu0 }
 0x294   : > { %v3119_v36 = vpop.f32.mrb[33].mxu0  ;;  %v5779_v43 = vadd.f32 %v3763_v33, %v2950_v17 }
 0x295   : > { %v3120_v18 = vpop.f32.mrb[34].mxu0 }
 0x296   : > { %v3122_v1 = vpop.f32.mrb[35].mxu0 }
 0x29b   : > { %v3125_v19 = vpop.f32.mrb[36].mxu0 }
 0x29c   : > { %v3127_v29 = vpop.f32.mrb[37].mxu0 }
 0x29d   : > { %v3128_v14 = vpop.f32.mrb[38].mxu0 }
 0x29e   : > { %v3130_v47 = vpop.f32.mrb[39].mxu0 }
 0x2a3   : > { %v3133_v49 = vpop.f32.mrb[40].mxu0 }
 0x2a4   : > { %v3135_v27 = vpop.f32.mrb[41].mxu0 }
 0x2a5   : > { %v5781_v2 = vpop.f32.mrb[42].mxu0 }
 0x2a6   : > { %v3138_v37 = vpop.f32.mrb[43].mxu0 }
 0x2ae   : > { %v3780_v10 = vpop.f32.mrb[48].mxu1 }
 0x2af   : > { %v3781_v59 = vpop.f32.mrb[49].mxu1 }
 0x2b0   : > { %v3782_v41 = vadd.f32 %v3781_v59, %v3780_v10  ;;  %v3783_v22 = vpop.f32.mrb[50].mxu1 }
 0x2b1   : > { %v3784_v31 = vpop.f32.mrb[51].mxu1 }
 0x2b2   : > { %v3053_v7 = vadd.f32 %v3782_v41, %v2988_v44  ;;  %v3785_v54 = vadd.f32 %v3784_v31, %v3783_v22 }
 0x2b4   : > { %v3118_v12 = vadd.f32 %v3117_v3, %v3053_v7  ;;  %v3056_v46 = vadd.f32 %v3785_v54, %v2991_v52 }
 0x2b6   : > { %v3155_v0 = vmul.f32 %v5786_v21, %v3118_v12  ;;  %v3121_v30 = vadd.f32 %v3120_v18, %v3056_v46  ;;  %v3786_v15 = vpop.f32.mrb[52].mxu1 }
 0x2b7   : > { %v3787_v55 = vpop.f32.mrb[53].mxu1 }
 0x2b8   : > { %v5795_v44 = vadd.f32 %v5791_v13, %v3155_v0  ;;  %v3156_v48 = vmul.f32 %v5786_v21, %v3121_v30  ;;  %v3788_v62 = vadd.f32 %v3787_v55, %v3786_v15  ;;  %v3789_v35 = vpop.f32.mrb[54].mxu1 }
 0x2b9   : > { %v3790_v5 = vpop.f32.mrb[55].mxu1 }
 0x2ba   : > { %v3178_v52 = vsub.f32 0.0, %v5795_v44  ;;  %v5800_v45 = vadd.f32 %v5791_v13, %v3156_v48  ;;  %v3061_v28 = vadd.f32 %v3788_v62, %v2996_v40  ;;  %v3791_v42 = vadd.f32 %v3790_v5, %v3789_v35 }
 0x2bc   : > { %v3186_v11 = vmul.f32 1.442695, %v3178_v52  ;;  %v3179_v39 = vsub.f32 0.0, %v5800_v45  ;;  %v3126_v6 = vadd.f32 %v3125_v19, %v3061_v28  ;;  %v3064_v50 = vadd.f32 %v3791_v42, %v5771_v16 }
 0x2be   : > { %4156 = vpow2.f32 %v3186_v11  ;;  %v3188_v51 = vmul.f32 1.442695, %v3179_v39  ;;  %v3157_v32 = vmul.f32 %v5786_v21, %v3126_v6  ;;  %v3129_v8 = vadd.f32 %v3128_v14, %v3064_v50 }
 0x2c0   : > { %4158 = vpow2.f32 %v3188_v51  ;;  %v5806_v20 = vadd.f32 %v5791_v13, %v3157_v32  ;;  %v3158_v34 = vmul.f32 %v5786_v21, %v3129_v8 }
 0x2c2   : > { %v3180_v40 = vsub.f32 0.0, %v5806_v20  ;;  %v5811_v9 = vadd.f32 %v5791_v13, %v3158_v34 }
 0x2c4   : > { %v3190_v4 = vmul.f32 1.442695, %v3180_v40  ;;  %v3181_v16 = vsub.f32 0.0, %v5811_v9 }
 0x2c6   : > { %4160 = vpow2.f32 %v3190_v4  ;;  %v3192_v58 = vmul.f32 1.442695, %v3181_v16 }
 0x2c7   : > { %v3792_v63 = vpop.f32.mrb[56].mxu1 }
 0x2c8   : > { %v4157_v56 = vpop.eup %4156  ;;  %4162 = vpow2.f32 %v3192_v58  ;;  %v3793_v57 = vpop.f32.mrb[57].mxu1 }
 0x2c9   : > { %v3202_v24 = vadd.f32 1.0, %v4157_v56  ;;  %v3794_v61 = vadd.f32 %v3793_v57, %v3792_v63  ;;  %v3795_v33 = vpop.f32.mrb[58].mxu1 }
 0x2ca   : > { %v4159_v38 = vpop.eup %4158  ;;  %v3796_v25 = vpop.f32.mrb[59].mxu1 }
 0x2cb   : > { %4164 = vrcp.f32 %v3202_v24  ;;  %v3203_v23 = vadd.f32 1.0, %v4159_v38  ;;  %v3069_v17 = vadd.f32 %v3794_v61, %v5773_v60  ;;  %v3797_v3 = vadd.f32 %v3796_v25, %v3795_v33 }
 0x2cd   : > { %4166 = vrcp.f32 %v3203_v23  ;;  %v3134_v36 = vadd.f32 %v3133_v49, %v3069_v17  ;;  %v3072_v18 = vadd.f32 %v3797_v3, %v5775_v53 }
 0x2cf   : > { %v3159_v1 = vmul.f32 %v5786_v21, %v3134_v36  ;;  %v3137_v19 = vadd.f32 %v5781_v2, %v3072_v18  ;;  %v3798_v29 = vpop.f32.mrb[60].mxu1 }
 0x2d0   : > { %v4161_v14 = vpop.eup %4160  ;;  %v3799_v47 = vpop.f32.mrb[61].mxu1 }
 0x2d1   : > { %v3204_v27 = vadd.f32 1.0, %v4161_v14  ;;  %v5822_v37 = vadd.f32 %v5791_v13, %v3159_v1  ;;  %v3160_v60 = vmul.f32 %v5786_v21, %v3137_v19  ;;  %v3800_v10 = vadd.f32 %v3799_v47, %v3798_v29  ;;  %v3801_v49 = vpop.f32.mrb[62].mxu1 }
 0x2d2   : > { %v4163_v59 = vpop.eup %4162  ;;  %v3802_v53 = vpop.f32.mrb[63].mxu1 }
 0x2d3   : > { %4168 = vrcp.f32 %v3204_v27  ;;  %v3205_v41 = vadd.f32 1.0, %v4163_v59  ;;  %v3182_v22 = vsub.f32 0.0, %v5822_v37  ;;  %v3175_v2 = vadd.f32 %v5791_v13, %v3160_v60 }
 0x2d4   : > { %v3803_v31 = vadd.f32 %v3802_v53, %v3801_v49  ;;  %v3077_v7 = vadd.f32 %v3800_v10, %v5777_v26  ;;  %v3141_v54 = vpop.f32.mrb[44].mxu0 }
 0x2d5   : > { %v4165_v12 = vpop.eup %4164  ;;  %4170 = vrcp.f32 %v3205_v41  ;;  %v3194_v46 = vmul.f32 1.442695, %v3182_v22  ;;  %v3183_v0 = vsub.f32 0.0, %v3175_v2  ;;  %v3143_v30 = vpop.f32.mrb[45].mxu0 }
 0x2d6   : > { %v3218_v15 = vmul.f32 %v4165_v12, %v5795_v44  ;;  %v3142_v55 = vadd.f32 %v3141_v54, %v3077_v7  ;;  %v3080_v48 = vadd.f32 %v3803_v31, %v5779_v43  ;;  %v3144_v62 = vpop.f32.mrb[46].mxu0 }
 0x2d7   : > { %v4167_v35 = vpop.eup %4166  ;;  %4172 = vpow2.f32 %v3194_v46  ;;  %v3196_v26 = vmul.f32 1.442695, %v3183_v0  ;;  %v3146_v5 = vpop.f32.mrb[47].mxu0 }
 0x2d8   : > { %v3226_v52 = vpack.c.bf16 %v3218_v15, %v3218_v15  ;;  %v3219_v28 = vmul.f32 %v4167_v35, %v5800_v45  ;;  %v3161_v44 = vmul.f32 %v5786_v21, %v3142_v55  ;;  %v3145_v42 = vadd.f32 %v3144_v62, %v3080_v48 }
 0x2d9   : > { %4174 = vpow2.f32 %v3196_v26 }
 0x2da   : > { %3235 = vst.msk [vmem:[%s5833_s29] sm:$0xf] %vm3234_vm9, %v3226_v52  ;;  %v3227_v43 = vpack.c.bf16 %v3219_v28, %v3219_v28  ;;  %v3176_v11 = vadd.f32 %v5791_v13, %v3161_v44  ;;  %v3162_v39 = vmul.f32 %v5786_v21, %v3145_v42 }
 0x2dc   : > { %3236 = vst.msk [vmem:[%s5833_s29 + $0x4] sm:$0xf] %vm3234_vm9, %v3227_v43  ;;  %v3184_v6 = vsub.f32 0.0, %v3176_v11  ;;  %v3177_v50 = vadd.f32 %v5791_v13, %v3162_v39 }
 0x2dd   : > { %v4169_v51 = vpop.eup %4168 }
 0x2de   : > { %v3220_v45 = vmul.f32 %v4169_v51, %v5806_v20  ;;  %v3198_v32 = vmul.f32 1.442695, %v3184_v6  ;;  %v3185_v8 = vsub.f32 0.0, %v3177_v50 }
 0x2df   : > { %v4171_v34 = vpop.eup %4170 }
 0x2e0   : > { %v3228_v40 = vpack.c.bf16 %v3220_v45, %v3220_v45  ;;  %v3221_v4 = vmul.f32 %v4171_v34, %v5811_v9  ;;  %4176 = vpow2.f32 %v3198_v32  ;;  %v3200_v16 = vmul.f32 1.442695, %v3185_v8 }
 0x2e1   : > { %v4173_v58 = vpop.eup %4172 }
 0x2e2   : > { %3237 = vst.msk [vmem:[%s5833_s29 + $0x8] sm:$0xf] %vm3234_vm9, %v3228_v40  ;;  %v3229_v21 = vpack.c.bf16 %v3221_v4, %v3221_v4  ;;  %v3206_v63 = vadd.f32 1.0, %v4173_v58  ;;  %4178 = vpow2.f32 %v3200_v16 }
 0x2e3   : > { %v4175_v56 = vpop.eup %4174 }
 0x2e4   : > { %3238 = vst.msk [vmem:[%s5833_s29 + $0xc] sm:$0xf] %vm3234_vm9, %v3229_v21  ;;  %4180 = vrcp.f32 %v3206_v63  ;;  %v3207_v13 = vadd.f32 1.0, %v4175_v56 }
 0x2e6   : > { %4182 = vrcp.f32 %v3207_v13 }
 0x2ea   : > { %v4177_v20 = vpop.eup %4176 }
 0x2eb   : > { %v3208_v57 = vadd.f32 1.0, %v4177_v20 }
 0x2ec   : > { %v4179_v24 = vpop.eup %4178 }
 0x2ed   : > { %4184 = vrcp.f32 %v3208_v57  ;;  %v3209_v9 = vadd.f32 1.0, %v4179_v24 }
 0x2ee   : > { %v4181_v61 = vpop.eup %4180 }
 0x2ef   : > { %v3222_v33 = vmul.f32 %v4181_v61, %v5822_v37  ;;  %4186 = vrcp.f32 %v3209_v9 }
 0x2f0   : > { %v4183_v38 = vpop.eup %4182 }
 0x2f1   : > { %v3230_v25 = vpack.c.bf16 %v3222_v33, %v3222_v33  ;;  %v3223_v23 = vmul.f32 %v4183_v38, %v3175_v2 }
 0x2f3   : > { %3239 = vst.msk [vmem:[%s5833_s29 + $0x10] sm:$0xf] %vm3234_vm9, %v3230_v25  ;;  %v3231_v17 = vpack.c.bf16 %v3223_v23, %v3223_v23 }
 0x2f5   : > { %3240 = vst.msk [vmem:[%s5833_s29 + $0x14] sm:$0xf] %vm3234_vm9, %v3231_v17 }
 0x2f7   : > { %v4185_v3 = vpop.eup %4184 }
 0x2f8   : > { %v3224_v36 = vmul.f32 %v4185_v3, %v3176_v11 }
 0x2f9   : > { %v4187_v18 = vpop.eup %4186 }
 0x2fa   : > { %v3232_v1 = vpack.c.bf16 %v3224_v36, %v3224_v36  ;;  %v3225_v19 = vmul.f32 %v4187_v18, %v3177_v50 }
 0x2fc   : > { %3241 = vst.msk [vmem:[%s5833_s29 + $0x18] sm:$0xf] %vm3234_vm9, %v3232_v1  ;;  %v3233_v29 = vpack.c.bf16 %v3225_v19, %v3225_v19 }
 0x2fe   : > { %3242 = vst.msk [vmem:[%s5833_s29 + $0x1c] sm:$0xf] %vm3234_vm9, %v3233_v29 }
 0x2ff PF: > { %s19_s13 = sadd.s32 1, %s4228_s13   ;;  %s5916_s30 = smov %s4220_s11 }
 0x300   : > { %p16_p12 = scmp.ge.s32.totalorder %s19_s13, 10   ;;  %s5917_s10 = smov %s4224_s12 }
 0x301   : > { %s5918_s11 = smov %s5921_s14  ;;  %s5919_s12 = smov %s5925_s15 }
 0x302   :  { %18 = sbr.rel (!%p16_p12) target bundleno = 3 (0x3), region = 92 }

// kernel: emu3_resnet_temporal_block.3
= control target key start
LH: loop header
LB: loop body
LE: loop exit
PB: predicated region body
PF: predicated region fallthrough
CT: control target
= control target key end

     0   :  { %s4891_s0 = inlined_call_operand.vmem [shape: bf16[2,6,10,10,64], index: 0, kind: input, shape index: {}, may-alias: {0,1,2}]   ;;  %s4892_s1 = inlined_call_operand.vmem [shape: bf16[2,6,10,10,64], index: 1, kind: input, shape index: {}, may-alias: {0,1,2}]   ;;  %s4893_s2 = inlined_call_operand.vmem [shape: bf16[2,6,10,10,64], index: 2, kind: input, shape index: {}, may-alias: {0,1,2}]   ;;  %s4894_s3 = inlined_call_operand.vmem [shape: bf16[1728,64], index: 3, kind: input, shape index: {}]   ;;  %s4895_s4 = inlined_call_operand.vmem [shape: f32[1,64], index: 4, kind: input, shape index: {}]   ;;  %s4896_s5 = inlined_call_operand.vmem [shape: f32[2,4,8,8,64], index: 5, kind: input, shape index: {}]   ;;  %s4897_s6 = inlined_call_operand.hbm [shape: f32[2,4,8,8,64], index: 6, kind: output, shape index: {}]  }
   0x1   :  { %4924 = sst [smem:[#allocation15_spill]] %s4891_s0 }
   0x2   :  { %4925 = sst [smem:[#allocation16_spill]] %s4892_s1 }
   0x3   :  { %11 = vsyncpa [#allocation3], 0 }
   0x4   :  { %13 = vsyncpa [#allocation3 + $0x1], 0  ;;  %s3622_s21 = smov 0   ;;  %s3624_s22 = smov 0  }
   0x5   :  { %s3626_s23 = smov 0   ;;  %s3628_s24 = smov 0  }
   0x6   :  { %s3630_s25 = smov 0   ;;  %s3632_s26 = smov 0  }
   0x7   :  { %s3634_s27 = smov 0   ;;  %s3636_s28 = smov 0  }
   0x8 LB: > { %s2814_s29 = sadd.s32 4294967295, %s3580_s28   ;;  %s2815_s30 = sadd.s32 4294967294, %s3580_s28   ;;  %s3580_s28 = sphi %s3636_s28, %s19_s28   ;;  %s3576_s27 = sphi %s3634_s27, %s4979_s27   ;;  %s3572_s26 = sphi %s3632_s26, %s4978_s26   ;;  %s3568_s25 = sphi %s3630_s25, %s4977_s25   ;;  %s3564_s24 = sphi %s3628_s24, %s4976_s24   ;;  %s3560_s23 = sphi %s3626_s23, %s4975_s23   ;;  %s3556_s22 = sphi %s3624_s22, %s4974_s22   ;;  %s3552_s21 = sphi %s3622_s21, %s4973_s21  }
   0x9   : > { %s28_s7 = sadd.s32 1, %s3572_s26  ;;  %s31_s8 = sadd.s32 1, %s3576_s27 }
   0xa   : > { %p29_p0 = scmp.ge.s32.totalorder %s28_s7, 4  ;;  %p208_p1 = scmp.ne.s32.totalorder %s3560_s23, %s3556_s22 }
   0xb   : > { %p209_p2 = scmp.eq.s32.totalorder %s2814_s29, 7  ;;  %p214_p5 = scmp.ne.s32.totalorder %s3556_s22, %s3552_s21 }
   0xc   : > { %s4981_s7 = smov (%p29_p0, %s28_s7), 0  ;;  %s4983_s8 = smov (!%p29_p0, %s31_s8), %s3576_s27 }
   0xd   : > { %4926 = sst [smem:[#allocation5_spill]] %s4981_s7  ;;  %s194_s9 = ssub.s32 %s3572_s26, %s4981_s7 }
   0xe   : > { %p3673_p3 = por %p209_p2, %p208_p1  ;;  %p33_p4 = scmp.ge.s32.totalorder %s4983_s8, 2 }
   0xf   : > { %p215_p6 = scmp.eq.s32.totalorder %s2815_s30, 7  ;;  %p2818_p7 = scmp.ge.s32.totalorder %s3580_s28, 1 }
  0x10   : > { %s4985_s8 = smov (%p33_p4, %s4983_s8), 0  ;;  %p291_p9 = scmp.lt.s32.totalorder %s3580_s28, 9 }
  0x11   : > { %4928 = sst [smem:[#allocation6_spill]] %s4985_s8  ;;  %p3682_p8 = por %p215_p6, %p214_p5 }
  0x12   : > { %s193_s12 = ssub.s32 %s3576_s27, %s4985_s8  ;;  %s198_s13 = sadd.s32 1, %s3560_s23 }
  0x13   : > { %s195_s14 = sor.u32 %s194_s9, %s193_s12  ;;  %p292_p10 = pnand %p2818_p7, %p291_p9 }
  0x14   : > { %p196_p11 = scmp.eq.s32.totalorder %s195_s14, 0 }
  0x15   : > { %295 = sbr.rel (%p292_p10) target bundleno = 700 (0x2bc), region = 44 }
  0x16   : > { %s3691_s15 = scalar_select %p196_p11, %s3560_s23, %s198_s13  }
  0x1c   : > { %p354_p12 = scmp.lt.s32.totalorder %s3568_s25, 1  ;;  %p356_p13 = scmp.lt.s32.totalorder %s3564_s24, 5  ;;  %vm605_vm0 = vcmask 523264  }
  0x1d   : > { %s363_s16 = sadd.s32 1, %s3564_s24  ;;  %s4930_s0 = sld [smem:[#allocation15_spill]] }
  0x1e   : > { %s3697_s17 = scalar_select %p354_p12, %s3568_s25, 1 }
  0x1f   : > { %s357_s18 = scalar_select %p356_p13, %s3564_s24, 5 }
  0x20   : > { %s3701_s19 = smul.u32 120, %s3697_s17  ;;  %p366_p0 = scmp.lt.s32.totalorder %s363_s16, 5 }
  0x21   : > { %s3269_s20 = smul.u32 20, %s357_s18  ;;  %s4931_s1 = sld [smem:[#allocation16_spill]] }
  0x22   : > { %s4987_s16 = smov (!%p366_p0, %s363_s16), 5  ;;  %s4937_s8 = smov 64  }
  0x23   : > { %s360_s29 = sadd.s32 %s3701_s19, %s3269_s20  ;;  %s3271_s9 = smul.u32 20, %s4987_s16 }
  0x24   : > { %s2820_s30 = sshll.u32 %s360_s29, 2  ;;  %p387_p2 = scmp.lt.s32.totalorder %s3564_s24, 3 }
  0x25   : > { %s3707_s14 = scalar_lea.vmem %s4930_s0, %s2820_s30  ;;  %s370_s16 = sadd.s32 %s3271_s9, %s3701_s19 }
  0x26   : > { %v3710_v0 = vld [vmem:[%s3707_s14 + $0x18] sm:$0xf]  ;;  %v402_v1 = vld [vmem:[%s3707_s14 + $0x1c] sm:$0x1]  ;;  %v3714_v2 = vld [vmem:[%s3707_s14 + $0x8] sm:$0xf] }
  0x27   : > { %v3717_v3 = vcombine.low %v3710_v0, %v402_v1  ;;  %v398_v4 = vld [vmem:[%s3707_s14 + $0xc] sm:$0x1]  ;;  %v3721_v5 = vld [vmem:[%s3707_s14 + $0x20] sm:$0xf]  ;;  %v404_v6 = vld [vmem:[%s3707_s14 + $0x24] sm:$0x1] }
  0x28   : > { %v3725_v7 = vcombine.low %v3714_v2, %v398_v4  ;;  %v3728_v8 = vcombine.low %v3721_v5, %v404_v6  ;;  %v3731_v9 = vld [vmem:[%s3707_s14 + $0x10] sm:$0xf]  ;;  %v400_v10 = vld [vmem:[%s3707_s14 + $0x14] sm:$0x1]  ;;  %v3745_v16 = vld [vmem:[%s3707_s14 + $0x28] sm:$0xf] }
  0x29   : > { %v3735_v11 = vld [vmem:[%s3707_s14 + $0x30] sm:$0xf]  ;;  %v527_v12 = vshrl.u32 %v3717_v3, 16  ;;  %v529_v13 = vshll.u32 %v3717_v3, 16  ;;  %v3741_v14 = vcombine.low %v3731_v9, %v400_v10  ;;  %v408_v15 = vld [vmem:[%s3707_s14 + $0x34] sm:$0x1] }
  0x2a   : > { %v513_v17 = vshrl.u32 %v3725_v7, 16  ;;  %v515_v18 = vshll.u32 %v3725_v7, 16  ;;  %v534_v19 = vshrl.u32 %v3728_v8, 16  ;;  %v536_v20 = vshll.u32 %v3728_v8, 16  ;;  %v406_v21 = vld [vmem:[%s3707_s14 + $0x2c] sm:$0x1] }
  0x2b   : > { %v531_v22 = vrot.slane %v529_v13, 1  ;;  %v520_v23 = vshrl.u32 %v3741_v14, 16  ;;  %v522_v24 = vshll.u32 %v3741_v14, 16  ;;  %v3755_v25 = vcombine.low %v3735_v11, %v408_v15  ;;  %s2821_s18 = sshll.u32 %s370_s16, 2  ;;  %v3766_v29 = vld [vmem:[%s3707_s14 + $0x40] sm:$0xf] }
  0x2c   : > { %v517_v26 = vrot.slane %v515_v18, 1  ;;  %v538_v27 = vrot.slane %v536_v20, 1  ;;  %v3758_v28 = vcombine.low %v3745_v16, %v406_v21  ;;  %s3763_s30 = scalar_lea.vmem %s4931_s1, %s2821_s18  ;;  %v412_v30 = vld [vmem:[%s3707_s14 + $0x44] sm:$0x1]  ;;  %v3774_v35 = vld [vmem:[%s3707_s14 + $0x38] sm:$0xf] }
  0x2d   : > { %v532_v31 = vor.u32 %v531_v22, %v527_v12  ;;  %v524_v32 = vrot.slane %v522_v24, 1  ;;  %v550_v33 = vshll.u32 %v3755_v25, 16  ;;  %v3771_v34 = vld [vmem:[%s3763_s30 + $0x8] sm:$0xf]  ;;  %v548_v38 = vshrl.u32 %v3755_v25, 16  ;;  %s4898_s9 = smov 64  }
  0x2e   : > { %v518_v36 = vor.u32 %v517_v26, %v513_v17  ;;  %v539_v37 = vor.u32 %v538_v27, %v534_v19  ;;  %v543_v39 = vshll.u32 %v3758_v28, 16  ;;  %v418_v40 = vld [vmem:[%s3763_s30 + $0xc] sm:$0x1]  ;;  %v3780_v41 = vld [vmem:[%s3763_s30] sm:$0xf]  ;;  %v541_v43 = vshrl.u32 %v3758_v28, 16 }
  0x2f   : > { %581 = vrot.lane.b32.xlu1 %v532_v31, %s4898_s9  ;;  %v552_v42 = vrot.slane %v550_v33, 1  ;;  %v3785_v44 = vcombine.low %v3771_v34, %v418_v40  ;;  %v416_v45 = vld [vmem:[%s3763_s30 + $0x4] sm:$0x1]  ;;  %v3789_v46 = vcombine.low %v3766_v29, %v412_v30  ;;  %v410_v47 = vld [vmem:[%s3707_s14 + $0x3c] sm:$0x1]  ;;  %v525_v48 = vor.u32 %v524_v32, %v520_v23  ;;  %s4902_s16 = sadd.s32 2, %s3564_s24 }
  0x30   : > { %577 = vrot.lane.b32.xlu0 %v518_v36, %s4898_s9  ;;  %v545_v49 = vrot.slane %v543_v39, 1  ;;  %v3794_v50 = vcombine.low %v3780_v41, %v416_v45  ;;  %v3797_v51 = vcombine.low %v3774_v35, %v410_v47  ;;  %v3801_v53 = vld [vmem:[%s3763_s30 + $0x10] sm:$0xf]  ;;  %v420_v54 = vld [vmem:[%s3763_s30 + $0x14] sm:$0x1]  ;;  %p3915_p1 = scmp.lt.s32.totalorder %s4902_s16, 5 }
  0x31   : > { %v726_v52 = vshll.u32 %v3785_v44, 16  ;;  %v724_v55 = vshrl.u32 %v3785_v44, 16  ;;  %v564_v57 = vshll.u32 %v3789_v46, 16  ;;  %v553_v58 = vor.u32 %v552_v42, %v548_v38  ;;  %v3810_v61 = vld [vmem:[%s3763_s30 + $0x20] sm:$0xf]  ;;  %s351_s18 = sand.u32 1, %s3556_s22  }
  0x32   : > { %v719_v56 = vshll.u32 %v3794_v50, 16  ;;  %v717_v60 = vshrl.u32 %v3794_v50, 16  ;;  %v424_v62 = vld [vmem:[%s3763_s30 + $0x24] sm:$0x1]  ;;  %v546_v63 = vor.u32 %v545_v49, %v541_v43  ;;  %v557_v4 = vshll.u32 %v3797_v51, 16  ;;  %s3024_s16 = sshll.u32 %s3564_s24, 3 }
  0x33   : > { %583 = vrot.lane.b32.xlu1 %v539_v37, %s4898_s9  ;;  %v728_v59 = vrot.slane %v726_v52, 1  ;;  %v3816_v6 = vcombine.low %v3801_v53, %v420_v54  ;;  %v3819_v10 = vld [vmem:[%s3763_s30 + $0x18] sm:$0xf]  ;;  %v422_v12 = vld [vmem:[%s3763_s30 + $0x1c] sm:$0x1]  ;;  %v562_v13 = vshrl.u32 %v3789_v46, 16  ;;  %v3826_v19 = vcombine.low %v3810_v61, %v424_v62 }
  0x34   : > { %579 = vrot.lane.b32.xlu0 %v525_v48, %s4898_s9  ;;  %v721_v1 = vrot.slane %v719_v56, 1  ;;  %v566_v15 = vrot.slane %v564_v57, 1  ;;  %v555_v18 = vshrl.u32 %v3797_v51, 16  ;;  %v3829_v20 = vcombine.low %v3819_v10, %v422_v12  ;;  %v3832_v21 = vld [vmem:[%s3763_s30 + $0x28] sm:$0xf]  ;;  %s3025_s1 = sshll.u32 %s3568_s25, 5 }
  0x35   : > { %v729_v17 = vor.u32 %v728_v59, %v724_v55  ;;  %v426_v22 = vld [vmem:[%s3763_s30 + $0x2c] sm:$0x1]  ;;  %v559_v24 = vrot.slane %v557_v4, 1  ;;  %v733_v26 = vshll.u32 %v3816_v6, 16  ;;  %v3841_v30 = vld [vmem:[%s3763_s30 + $0x38] sm:$0xf]  ;;  %s2663_s12 = sadd.s32 %s3025_s1, %s3024_s16 }
  0x36   : > { %v722_v23 = vor.u32 %v721_v1, %v717_v60  ;;  %v3838_v27 = vcombine.low %v3832_v21, %v426_v22  ;;  %v430_v31 = vld [vmem:[%s3763_s30 + $0x3c] sm:$0x1]  ;;  %v740_v32 = vshll.u32 %v3829_v20, 16  ;;  %v3846_v33 = vld [vmem:[%s3763_s30 + $0x30] sm:$0xf]  ;;  %v567_v37 = vor.u32 %v566_v15, %v562_v13 }
  0x37   : > { %587 = vrot.lane.b32.xlu1 %v553_v58, %s4898_s9  ;;  %v428_v36 = vld [vmem:[%s3763_s30 + $0x34] sm:$0x1]  ;;  %v731_v38 = vshrl.u32 %v3816_v6, 16  ;;  %v738_v39 = vshrl.u32 %v3829_v20, 16  ;;  %v3854_v43 = vcombine.low %v3841_v30, %v430_v31  ;;  %v560_v45 = vor.u32 %v559_v24, %v555_v18  ;;  %v3862_v52 = vld [vmem:[%s3707_s14] sm:$0xf] }
  0x38   : > { %585 = vrot.lane.b32.xlu0 %v546_v63, %s4898_s9  ;;  %4932 = vst [vmem:[#allocation7_spill] sm:$0xff] %v3838_v27  ;;  %v742_v40 = vrot.slane %v740_v32, 1  ;;  %v754_v42 = vshll.u32 %v3838_v27, 16  ;;  %v735_v47 = vrot.slane %v733_v26, 1  ;;  %v747_v48 = vshll.u32 %v3826_v19, 16 }
  0x39   : > { %4933 = vst [vmem:[#allocation8_spill] sm:$0xff] %v3854_v43  ;;  %v3859_v49 = vcombine.low %v3846_v33, %v428_v36  ;;  %v396_v54 = vld [vmem:[%s3707_s14 + $0x4] sm:$0x1]  ;;  %v745_v55 = vshrl.u32 %v3826_v19, 16  ;;  %v752_v57 = vshrl.u32 %v3838_v27, 16  ;;  %v768_v59 = vshll.u32 %v3854_v43, 16 }
  0x3a   : > { %v743_v56 = vor.u32 %v742_v40, %v738_v39  ;;  %v756_v58 = vrot.slane %v754_v42, 1  ;;  %v736_v60 = vor.u32 %v735_v47, %v731_v38  ;;  %v749_v62 = vrot.slane %v747_v48, 1  ;;  %v3377_v36 = vld [vmem:[%s4894_s3 + $0x40] sm:$0xff]   ;;  %v3379_v38 = vld [vmem:[%s4894_s3 + $0x48] sm:$0xff]  }
  0x3b   : > { %788 = vrot.lane.b32.xlu1 %v729_v17, %s4898_s9  ;;  %4934 = vst [vmem:[#allocation9_spill] sm:$0xff] %v3859_v49  ;;  %v761_v63 = vshll.u32 %v3859_v49, 16  ;;  %v3872_v1 = vcombine.low %v3862_v52, %v396_v54  ;;  %v766_v12 = vshrl.u32 %v3854_v43, 16  ;;  %v770_v13 = vrot.slane %v768_v59, 1  ;;  %3029 = vmatprep.subr.bf16.mxu1 %v3377_v36  ;;  %v3380_v39 = vld [vmem:[%s4894_s3 + $0x8] sm:$0xff]   ;;  %v3386_v40 = vld [vmem:[%s4894_s3 + $0x140] sm:$0xff]  }
  0x3c   : > { %786 = vrot.lane.b32.xlu0 %v722_v23, %s4898_s9  ;;  %v757_v4 = vor.u32 %v756_v58, %v752_v57  ;;  %v750_v15 = vor.u32 %v749_v62, %v745_v55  ;;  %v759_v17 = vshrl.u32 %v3859_v49, 16  ;;  %v3388_v42 = vld [vmem:[%s4894_s3 + $0x100] sm:$0xff]   ;;  %v3390_v47 = vld [vmem:[%s4894_s3 + $0x148] sm:$0xff]   ;;  %3109 = vmatprep.subr.bf16.mxu0 %v3386_v40  ;;  %v3382_v54 = vld [vmem:[%s4894_s3 + $0x10] sm:$0xff]  }
  0x3d   : > { %v763_v18 = vrot.slane %v761_v63, 1  ;;  %v508_v22 = vshll.u32 %v3872_v1, 16  ;;  %v771_v23 = vor.u32 %v770_v13, %v766_v12  ;;  %v506_v26 = vshrl.u32 %v3872_v1, 16  ;;  %3110 = vmatpush3.bf16.msra.mxu0 %v3388_v42  ;;  %v3392_v48 = vld [vmem:[%s4894_s3 + $0x108] sm:$0xff]   ;;  %v3383_v55 = vld [vmem:[%s4894_s3 + $0x58] sm:$0xff]   ;;  %v3396_v57 = vld [vmem:[%s4894_s3 + $0x110] sm:$0xff]  }
  0x3e   : > { %3111 = vmatprep.subr.bf16.mxu0 %v3390_v47  ;;  %v3384_v58 = vld [vmem:[%s4894_s3 + $0x18] sm:$0xff]   ;;  %v3387_v63 = vld [vmem:[%s4894_s3 + $0x20] sm:$0xff]   ;;  %v3391_v12 = vld [vmem:[%s4894_s3 + $0x28] sm:$0xff]  }
  0x3f   : > { %591 = vrot.lane.b32.xlu1 %v567_v37, %s4898_s9  ;;  %v764_v24 = vor.u32 %v763_v18, %v759_v17  ;;  %v510_v31 = vrot.slane %v508_v22, 1  ;;  %v3378_v37 = vld [vmem:[%s4894_s3] sm:$0xff]   ;;  %v3398_v59 = vld [vmem:[%s4894_s3 + $0x158] sm:$0xff]   ;;  %v3393_v13 = vld [vmem:[%s4894_s3 + $0x70] sm:$0xff]  }
  0x40   : > { %589 = vrot.lane.b32.xlu0 %v560_v45, %s4898_s9  ;;  %3030 = vmatpush3.bf16.msra.mxu1 %v3378_v37  ;;  %v3381_v45 = vld [vmem:[%s4894_s3 + $0x50] sm:$0xff]   ;;  %v3400_v62 = vld [vmem:[%s4894_s3 + $0x118] sm:$0xff]   ;;  %v3965_v22 = vld [vmem:[%s3763_s30 + $0x48] sm:$0xf] }
  0x41   : > { %v511_v32 = vor.u32 %v510_v31, %v506_v26  ;;  %3031 = vmatprep.subr.bf16.mxu1 %v3379_v38  ;;  %3112 = vmatpush3.bf16.msra.mxu0 %v3392_v48  ;;  %v3397_v17 = vld [vmem:[%s4894_s3 + $0x78] sm:$0xff]   ;;  %v3401_v26 = vld [vmem:[%s4894_s3 + $0xc0] sm:$0xff]   ;;  %v3406_v38 = vld [vmem:[%s4894_s3 + $0x168] sm:$0xff]   ;;  %v806_v48 = vrot.slane %v3794_v50, 1 }
  0x42   : > { %v3399_v18 = vld [vmem:[%s4894_s3 + $0x38] sm:$0xff]   ;;  %v3402_v31 = vld [vmem:[%s4894_s3 + $0x160] sm:$0xff]   ;;  %v3411_v50 = vld [vmem:[%s4894_s3 + $0x130] sm:$0xff]  }
  0x43   : > { %792 = vrot.lane.b32.xlu1 %v743_v56, %s4898_s9  ;;  %v3394_v56 = vld [vmem:[%s4894_s3 + $0x150] sm:$0xff]   ;;  %v3993_v42 = vld [vmem:[%s3763_s30 + $0x40] sm:$0xf] }
  0x44   : > { %790 = vrot.lane.b32.xlu0 %v736_v60, %s4898_s9  ;;  %3032 = vmatpush3.bf16.msra.mxu1 %v3380_v39  ;;  %v3385_v60 = vld [vmem:[%s4894_s3 + $0x60] sm:$0xff]   ;;  %v3407_v39 = vld [vmem:[%s4894_s3 + $0x128] sm:$0xff]  }
  0x45   : > { %3033 = vmatprep.subr.bf16.mxu1 %v3381_v45  ;;  %3113 = vmatprep.subr.bf16.mxu0 %v3394_v56  ;;  %v432_v45 = vld [vmem:[%s3763_s30 + $0x44] sm:$0x1]  ;;  %v3410_v56 = vld [vmem:[%s4894_s3 + $0x170] sm:$0xff]  }
  0x46   : > { %3114 = vmatpush3.bf16.msra.mxu0 %v3396_v57 }
  0x47   : > { %796 = vrot.lane.b32.xlu1 %v757_v4, %s4898_s9  ;;  %v3389_v4 = vld [vmem:[%s4894_s3 + $0x68] sm:$0xff]   ;;  %3115 = vmatprep.subr.bf16.mxu0 %v3398_v59 }
  0x48   : > { %794 = vrot.lane.b32.xlu0 %v750_v15, %s4898_s9  ;;  %3034 = vmatpush3.bf16.msra.mxu1 %v3382_v54  ;;  %v3395_v15 = vld [vmem:[%s4894_s3 + $0x30] sm:$0xff]  }
  0x49   : > { %3035 = vmatprep.subr.bf16.mxu1 %v3383_v55 }
  0x4a   : > { %3116 = vmatpush3.bf16.msra.mxu0 %v3400_v62  ;;  %v4007_v62 = vcombine.low %v3993_v42, %v432_v45 }
  0x4b   : > { %800 = vrot.lane.b32.xlu1 %v771_v23, %s4898_s9  ;;  %v434_v23 = vld [vmem:[%s3763_s30 + $0x4c] sm:$0x1]  ;;  %3117 = vmatprep.subr.bf16.mxu0 %v3402_v31 }
  0x4c   : > { %798 = vrot.lane.b32.xlu0 %v764_v24, %s4898_s9  ;;  %3036 = vmatpush3.bf16.msra.mxu1 %v3384_v58  ;;  %v3973_v24 = vcombine.low %v3965_v22, %v434_v23  ;;  %v3415_v23 = vld [vmem:[%s4894_s3 + $0x138] sm:$0xff]  }
  0x4d   : > { %3037 = vmatprep.subr.bf16.mxu1 %v3385_v60  ;;  %v4906_v60 = vrot.slane %v3785_v44, 1 }
  0x4e   : > { %v782_v37 = vshll.u32 %v3973_v24, 16  ;;  %v780_v54 = vshrl.u32 %v3973_v24, 16 }
  0x50   : > { %575 = vrot.lane.b32.xlu0 %v511_v32, %s4898_s9  ;;  %3038 = vmatpush3.bf16.msra.mxu1 %v3387_v63  ;;  %s4936_s9 = sadd.s32 2, %s3564_s24  ;;  %v3403_v32 = vld [vmem:[%s4894_s3 + $0x120] sm:$0xff]   ;;  %v784_v55 = vrot.slane %v782_v37, 1 }
  0x51   : > { %3039 = vmatprep.subr.bf16.mxu1 %v3389_v4  ;;  %s4989_s9 = smov (!%p3915_p1, %s4936_s9), 5  ;;  %3118 = vmatpush3.bf16.msra.mxu0 %v3403_v32 }
  0x52   : > { %s3272_s20 = smul.u32 20, %s4989_s9  ;;  %3119 = vmatprep.subr.bf16.mxu0 %v3406_v38 }
  0x54   : > { %3040 = vmatpush3.bf16.msra.mxu1 %v3391_v12  ;;  %s381_s9 = sadd.s32 %s3272_s20, %s3701_s19 }
  0x55   : > { %3041 = vmatprep.subr.bf16.mxu1 %v3393_v13  ;;  %3120 = vmatpush3.bf16.msra.mxu0 %v3407_v39  ;;  %s2822_s7 = sshll.u32 %s381_s9, 2 }
  0x56   : > { %3121 = vmatprep.subr.bf16.mxu0 %v3410_v56  ;;  %s4024_s0 = scalar_lea.vmem %s4893_s2, %s2822_s7  ;;  %v4911_v56 = vrot.slane %v3725_v7, 1  ;;  %s2824_s7 = sshll.u32 %s3697_s17, 5 }
  0x57   : > { %v4040_v31 = vld [vmem:[%s4024_s0 + $0x10] sm:$0xf]  ;;  %v440_v32 = vld [vmem:[%s4024_s0 + $0x14] sm:$0x1]  ;;  %s2819_s17 = sshll.u32 %s351_s18, 6 }
  0x58   : > { %3042 = vmatpush3.bf16.msra.mxu1 %v3395_v15  ;;  %s4797_s29 = scalar_lea.vmem [#allocation2], %s2819_s17 }
  0x59   : > { %3043 = vmatprep.subr.bf16.mxu1 %v3397_v17  ;;  %3122 = vmatpush3.bf16.msra.mxu0 %v3411_v50  ;;  %v2875_v17 = vcombine.low %v806_v48, %v4906_v60  ;;  %v438_v48 = vld [vmem:[%s4024_s0 + $0xc] sm:$0x1]  ;;  %s2666_s25 = sshll.u32 %s4797_s29, 4  ;;  %s4831_s25 = int_to_ptr.vmem [resolvable:$true] %s2666_s25 }
  0x5c   : > { %3044 = vmatpush3.bf16.msra.mxu1 %v3399_v18  ;;  %v775_v18 = vshll.u32 %v4007_v62, 16 }
  0x5d   : > { %3069 = vmatprep.subr.bf16.mxu1 %v3401_v26 }
  0x5e   : > { %v777_v45 = vrot.slane %v775_v18, 1 }
  0xa1   : > { %v582_v36 = vpop.permute.xlu1 %581 }
  0xa2   : > { %v578_v40 = vpop.permute.xlu0 %577  ;;  %v617_v57 = vsel %vm605_vm0, %v3710_v0, %v582_v36 }
  0xa3   : > { %v4014_v63 = vsel %vm605_vm0, %v3714_v2, %v578_v40  ;;  %v785_v2 = vor.u32 %v784_v55, %v780_v54  ;;  %v773_v40 = vshrl.u32 %v4007_v62, 16  ;;  %v3419_v54 = vld [vmem:[%s4894_s3 + $0x240] sm:$0xff]  }
  0xa5   : > { %v584_v47 = vpop.permute.xlu1 %583  ;;  %v778_v50 = vor.u32 %v777_v45, %v773_v40  ;;  %v414_v40 = vld [vmem:[%s3707_s14 + $0x4c] sm:$0x1] }
  0xa6   : > { %v620_v58 = vsel %vm605_vm0, %v3721_v5, %v584_v47  ;;  %v580_v59 = vpop.permute.xlu0 %579  ;;  %v4054_v47 = vld [vmem:[%s4024_s0 + $0x8] sm:$0xf] }
  0xa7   : > { %v2866_v4 = vcombine.low %v617_v57, %v620_v58  ;;  %v614_v0 = vsel %vm605_vm0, %v3731_v9, %v580_v59  ;;  %v3414_v9 = vld [vmem:[%s4894_s3 + $0x178] sm:$0xff]  }
  0xa8   : > { %v4018_v5 = vcombine.low %v614_v0, %v617_v57  ;;  %v2864_v12 = vcombine.low %v4014_v63, %v614_v0  ;;  %3123 = vmatprep.subr.bf16.mxu0 %v3414_v9  ;;  %v4909_v57 = vrot.slane %v3741_v14, 1  ;;  %v4069_v0 = vcombine.low %v4054_v47, %v438_v48 }
  0xa9   : > { %v588_v13 = vpop.permute.xlu1 %587  ;;  %1110 = vrot.lane.b32.xlu0 %v2866_v4, %s4937_s8  ;;  %3124 = vmatpush3.bf16.msra.mxu0 %v3415_v23 }
  0xaa   : > { %1106 = vrot.lane.b32.xlu1 %v2864_v12, %s4937_s8  ;;  %v586_v15 = vpop.permute.xlu0 %585  ;;  %v626_v37 = vsel %vm605_vm0, %v3735_v11, %v588_v13  ;;  %3189 = vmatprep.subr.bf16.mxu0 %v3419_v54  ;;  %v2865_v18 = vcombine.low %v4911_v56, %v4909_v57  ;;  %v934_v54 = vshrl.u32 %v4069_v0, 16  ;;  %v4915_v56 = vrot.slane %v3854_v43, 1 }
  0xab   : > { %v623_v26 = vsel %vm605_vm0, %v3745_v16, %v586_v15  ;;  %v4051_v16 = vcombine.low %v4040_v31, %v440_v32  ;;  %v4907_v15 = vrot.slane %v3816_v6, 1 }
  0xac   : > { %v4043_v36 = vcombine.low %v620_v58, %v623_v26  ;;  %v2868_v11 = vcombine.low %v623_v26, %v626_v37 }
  0xad   : > { %v789_v38 = vpop.permute.xlu1 %788  ;;  %804 = vrot.lane.b32.xlu0 %v785_v2, %s4937_s8  ;;  %v943_v4 = vshll.u32 %v4051_v16, 16 }
  0xae   : > { %1144 = vrot.lane.b32.xlu1 %v2875_v17, %s4937_s8  ;;  %v787_v39 = vpop.permute.xlu0 %786  ;;  %v4904_v17 = vrot.slane %v3829_v20, 1 }
  0xaf   : > { %v818_v9 = vsel %vm605_vm0, %v3780_v41, %v787_v39  ;;  %v945_v26 = vrot.slane %v943_v4, 1  ;;  %v936_v41 = vshll.u32 %v4069_v0, 16 }
  0xb0   : > { %v2877_v45 = vcombine.low %v4907_v15, %v4904_v17 }
  0xb1   : > { %v592_v55 = vpop.permute.xlu1 %591 }
  0xb2   : > { %v4064_v58 = vsel %vm605_vm0, %v3766_v29, %v592_v55  ;;  %1114 = vrot.lane.b32.xlu1 %v2868_v11, %s4937_s8  ;;  %v590_v59 = vpop.permute.xlu0 %589  ;;  %v4078_v29 = vsel %vm605_vm0, %v3771_v34, %v789_v38  ;;  %v941_v34 = vshrl.u32 %v4051_v16, 16  ;;  %v442_v38 = vld [vmem:[%s4024_s0 + $0x1c] sm:$0x1]  ;;  %v938_v11 = vrot.slane %v936_v41, 1 }
  0xb3   : > { %v629_v12 = vsel %vm605_vm0, %v3774_v35, %v590_v59  ;;  %v2874_v39 = vcombine.low %v818_v9, %v4078_v29 }
  0xb4   : > { %v4073_v13 = vcombine.low %v626_v37, %v629_v12  ;;  %v2870_v2 = vcombine.low %v629_v12, %v4064_v58  ;;  %v4097_v37 = vld [vmem:[%s4024_s0 + $0x18] sm:$0xf]  ;;  %v4122_v12 = vld [vmem:[%s4024_s0 + $0x20] sm:$0xf] }
  0xb5   : > { %v793_v23 = vpop.permute.xlu1 %792  ;;  %v4111_v59 = vcombine.low %v4097_v37, %v442_v38 }
  0xb6   : > { %802 = vrot.lane.b32.xlu1 %v778_v50, %s4937_s8  ;;  %v791_v35 = vpop.permute.xlu0 %790  ;;  %1118 = vrot.lane.b32.xlu0 %v2870_v2, %s4937_s8  ;;  %v4119_v4 = vsel %vm605_vm0, %v3819_v10, %v793_v23  ;;  %v444_v2 = vld [vmem:[%s4024_s0 + $0x24] sm:$0x1] }
  0xb7   : > { %v4094_v32 = vsel %vm605_vm0, %v3801_v53, %v791_v35  ;;  %v946_v53 = vor.u32 %v945_v26, %v941_v34  ;;  %4939 = vst [vmem:[#allocation11_spill] sm:$0xff] %v4119_v4  ;;  %v4905_v35 = vrot.slane %v3826_v19, 1  ;;  %v4903_v34 = vrot.slane %v3838_v27, 1 }
  0xb8   : > { %v4908_v26 = vrot.slane %v3728_v8, 1  ;;  %v2876_v10 = vcombine.low %v4094_v32, %v4119_v4  ;;  %v950_v41 = vshll.u32 %v4111_v59, 16  ;;  %v4141_v38 = vcombine.low %v4122_v12, %v444_v2  ;;  %v448_v2 = vld [vmem:[%s4024_s0 + $0x34] sm:$0x1] }
  0xb9   : > { %v797_v55 = vpop.permute.xlu1 %796 }
  0xba   : > { %1108 = vrot.lane.b32.xlu1 %v2865_v18, %s4937_s8  ;;  %v795_v48 = vpop.permute.xlu0 %794  ;;  %1142 = vrot.lane.b32.xlu0 %v2874_v39, %s4937_s8  ;;  %v4130_v18 = vsel %vm605_vm0, %v3832_v21, %v797_v55  ;;  %v939_v21 = vor.u32 %v938_v11, %v934_v54  ;;  %v952_v54 = vrot.slane %v950_v41, 1  ;;  %v957_v11 = vshll.u32 %v4141_v38, 16  ;;  %v4162_v55 = vld [vmem:[%s4024_s0 + $0x30] sm:$0xf]  ;;  %v4176_v41 = vld [vmem:[%s3707_s14 + $0x48] sm:$0xf] }
  0xbb   : > { %v4115_v50 = vsel %vm605_vm0, %v3810_v61, %v795_v48  ;;  %4940 = vst [vmem:[#allocation12_spill] sm:$0xff] %v4130_v18  ;;  %v4910_v61 = vrot.slane %v3717_v3, 1  ;;  %v4913_v48 = vrot.slane %v3755_v25, 1  ;;  %v955_v9 = vshrl.u32 %v4141_v38, 16 }
  0xbc   : > { %4938 = vst [vmem:[#allocation10_spill] sm:$0xff] %v4115_v50  ;;  %v2878_v17 = vcombine.low %v4115_v50, %v4130_v18  ;;  %v959_v60 = vrot.slane %v957_v11, 1 }
  0xbd   : > { %v801_v57 = vpop.permute.xlu1 %800 }
  0xbe   : > { %1000 = vrot.lane.b32.xlu1 %v946_v53, %s4937_s8  ;;  %v799_v23 = vpop.permute.xlu0 %798  ;;  %1148 = vrot.lane.b32.xlu0 %v2877_v45, %s4937_s8  ;;  %v948_v53 = vshrl.u32 %v4111_v59, 16  ;;  %v2879_v45 = vcombine.low %v4905_v35, %v4903_v34  ;;  %v4173_v34 = vcombine.low %v4162_v55, %v448_v2  ;;  %v436_v2 = vld [vmem:[%s4024_s0 + $0x4] sm:$0x1]  ;;  %v960_v11 = vor.u32 %v959_v60, %v955_v9 }
  0xbf   : > { %v4145_v39 = vsel %vm605_vm0, %v3846_v33, %v799_v23  ;;  %v2867_v33 = vcombine.low %v4910_v61, %v4908_v26  ;;  %v446_v23 = vld [vmem:[%s4024_s0 + $0x2c] sm:$0x1]  ;;  %v4187_v26 = vld [vmem:[%s4024_s0] sm:$0xf]  ;;  %v450_v61 = vld [vmem:[%s4024_s0 + $0x3c] sm:$0x1] }
  0xc0   : > { %4941 = vst [vmem:[#allocation13_spill] sm:$0xff] %v4145_v39  ;;  %v953_v35 = vor.u32 %v952_v54, %v948_v53  ;;  %v4197_v53 = vcombine.low %v4187_v26, %v436_v2  ;;  %v4211_v2 = vld [vmem:[%s4024_s0 + $0x38] sm:$0xf]  ;;  %v969_v18 = vshrl.u32 %v4173_v34, 16 }
  0xc1   : > { %v4227_v43 = vcombine.low %v4211_v2, %v450_v61 }
  0xc2   : > { %1146 = vrot.lane.b32.xlu1 %v2876_v10, %s4937_s8  ;;  %998 = vrot.lane.b32.xlu0 %v939_v21, %s4937_s8  ;;  %v4166_v10 = vld [vmem:[%s4024_s0 + $0x28] sm:$0xf]  ;;  %v971_v21 = vshll.u32 %v4173_v34, 16  ;;  %v929_v9 = vshll.u32 %v4197_v53, 16  ;;  %v927_v4 = vshrl.u32 %v4197_v53, 16 }
  0xc3   : > { %v4184_v15 = vcombine.low %v4166_v10, %v446_v23 }
  0xc4   : > { %v931_v27 = vrot.slane %v929_v9, 1  ;;  %v814_v9 = vrot.slane %v4007_v62, 1  ;;  %v1016_v62 = vrot.slane %v4197_v53, 1 }
  0xc5   : > { %v964_v23 = vshll.u32 %v4184_v15, 16 }
  0xc6   : > { %1152 = vrot.lane.b32.xlu1 %v2879_v45, %s4937_s8  ;;  %1112 = vrot.lane.b32.xlu0 %v2867_v33, %s4937_s8  ;;  %v4194_v45 = vcombine.low %v4176_v41, %v414_v40  ;;  %v4942_v33 = vrot.slane %v3758_v28, 1  ;;  %v4208_v40 = vsel %vm605_vm0, %v3841_v30, %v801_v57  ;;  %v962_v30 = vshrl.u32 %v4184_v15, 16 }
  0xc7   : > { %4943 = vst [vmem:[#allocation14_spill] sm:$0xff] %v4208_v40  ;;  %v966_v57 = vrot.slane %v964_v23, 1  ;;  %v978_v23 = vshll.u32 %v4227_v43, 16 }
  0xc8   : > { %v2869_v54 = vcombine.low %v4942_v33, %v4913_v48  ;;  %v973_v33 = vrot.slane %v971_v21, 1  ;;  %v571_v60 = vshll.u32 %v4194_v45, 16  ;;  %v2880_v48 = vcombine.low %v4145_v39, %v4208_v40  ;;  %v452_v21 = vld [vmem:[%s4024_s0 + $0x44] sm:$0x1] }
  0xc9   : > { %v932_v39 = vor.u32 %v931_v27, %v927_v4 }
  0xca   : > { %1002 = vrot.lane.b32.xlu1 %v953_v35, %s4937_s8  ;;  %1150 = vrot.lane.b32.xlu0 %v2878_v17, %s4937_s8  ;;  %v4944_v17 = vrot.slane %v3859_v49, 1  ;;  %v573_v50 = vrot.slane %v571_v60, 1  ;;  %v976_v49 = vshrl.u32 %v4227_v43, 16  ;;  %v980_v60 = vrot.slane %v978_v23, 1 }
  0xcb   : > { %v4922_v23 = vrot.slane %v4173_v34, 1 }
  0xcc   : > { %v2881_v35 = vcombine.low %v4944_v17, %v4915_v56  ;;  %v4230_v17 = vld [vmem:[%s4024_s0 + $0x40] sm:$0xf]  ;;  %v569_v56 = vshrl.u32 %v4194_v45, 16 }
  0xcd   : > { %v4239_v61 = vcombine.low %v4230_v17, %v452_v21  ;;  %v1019_v21 = vrot.slane %v4111_v59, 1  ;;  %v4969_v59 = vrot.slane %v4069_v0, 1 }
  0xce   : > { %1116 = vrot.lane.b32.xlu1 %v2869_v54, %s4937_s8  ;;  %1004 = vrot.lane.b32.xlu0 %v960_v11, %s4937_s8  ;;  %v974_v54 = vor.u32 %v973_v33, %v969_v18  ;;  %v967_v11 = vor.u32 %v966_v57, %v962_v30  ;;  %v574_v40 = vor.u32 %v573_v50, %v569_v56  ;;  %v1018_v30 = vrot.slane %v4051_v16, 1 }
  0xcf   : > { %v985_v18 = vshll.u32 %v4239_v61, 16  ;;  %v981_v33 = vor.u32 %v980_v60, %v976_v49  ;;  %v983_v56 = vshrl.u32 %v4239_v61, 16 }
  0xd1   : > { %v987_v50 = vrot.slane %v985_v18, 1  ;;  %v1023_v18 = vrot.slane %v4227_v43, 1 }
  0xd2   : > { %1154 = vrot.lane.b32.xlu1 %v2880_v48, %s4937_s8  ;;  %1156 = vrot.lane.b32.xlu0 %v2881_v35, %s4937_s8  ;;  %v602_v48 = vrot.slane %v3797_v51, 1  ;;  %v603_v35 = vrot.slane %v3789_v46, 1  ;;  %v3421_v51 = vld [vmem:[%s4894_s3 + $0xe8] sm:$0xff]   ;;  %v3442_v46 = vld [vmem:[%s4894_s3 + $0x190] sm:$0xff]  }
  0xd3   : > { %v988_v4 = vor.u32 %v987_v50, %v983_v56  ;;  %v595_v56 = vrot.slane %v3872_v1, 1  ;;  %v576_v50 = vpop.permute.xlu0 %575  ;;  %v3404_v1 = vld [vmem:[%s4894_s3 + $0x80] sm:$0xff]  }
  0xd4   : > { %v2871_v27 = vcombine.low %v602_v48, %v603_v35 }
  0xd6   : > { %1008 = vrot.lane.b32.xlu1 %v974_v54, %s4937_s8  ;;  %1006 = vrot.lane.b32.xlu0 %v967_v11, %s4937_s8  ;;  %v1021_v11 = vrot.slane %v4184_v15, 1  ;;  %v4970_v15 = vrot.slane %v4173_v34, 1 }
  0xd8   : > { %v2905_v60 = vcombine.low %v1021_v11, %v4922_v23 }
  0xda   : > { %593 = vrot.lane.b32.xlu1 %v574_v40, %s4937_s8  ;;  %996 = vrot.lane.b32.xlu0 %v932_v39, %s4937_s8  ;;  %v815_v40 = vrot.slane %v3973_v24, 1  ;;  %v4923_v39 = vrot.slane %v4069_v0, 1  ;;  %v1020_v24 = vrot.slane %v4141_v38, 1  ;;  %v2899_v38 = vcombine.low %v4970_v15, %v1023_v18 }
  0xdc   : > { %v2891_v49 = vcombine.low %v814_v9, %v815_v40  ;;  %v2901_v57 = vcombine.low %v4923_v39, %v1018_v30  ;;  %v2903_v54 = vcombine.low %v1019_v21, %v1020_v24  ;;  %v2897_v16 = vcombine.low %v1020_v24, %v1021_v11 }
  0xde   : > { %1010 = vrot.lane.b32.xlu1 %v981_v33, %s4937_s8  ;;  %1120 = vrot.lane.b32.xlu0 %v2871_v27, %s4937_s8  ;;  %v1024_v33 = vrot.slane %v4239_v61, 1 }
  0xe0   : > { %v2907_v27 = vcombine.low %v1023_v18, %v1024_v33 }
  0xe2   : > { %1012 = vrot.lane.b32.xlu0 %v988_v4, %s4937_s8  ;;  %v4945_v4 = vrot.slane %v3725_v7, 1 }
  0xe4   : > { %v2857_v40 = vcombine.low %v595_v56, %v4945_v4  ;;  %v3408_v56 = vld [vmem:[%s4894_s3 + $0x88] sm:$0xff]   ;;  %v4948_v4 = vrot.slane %v3758_v28, 1 }
  0xe6   : > { %1182 = vrot.lane.b32.xlu0 %v2891_v49, %s4937_s8  ;;  %v608_v49 = vsel %vm605_vm0, %v3862_v52, %v576_v50 }
  0xea   : > { %1208 = vrot.lane.b32.xlu0 %v2901_v57, %s4937_s8  ;;  %v4946_v57 = vrot.slane %v3717_v3, 1  ;;  %v3405_v3 = vld [vmem:[%s4894_s3 + $0xc8] sm:$0xff]  }
  0xee   : > { %1212 = vrot.lane.b32.xlu0 %v2903_v54, %s4937_s8  ;;  %v4947_v54 = vrot.slane %v3741_v14, 1 }
  0xf2   : > { %1216 = vrot.lane.b32.xlu0 %v2905_v60, %s4937_s8  ;;  %v2859_v60 = vcombine.low %v4947_v54, %v4946_v57  ;;  %v3412_v54 = vld [vmem:[%s4894_s3 + $0x90] sm:$0xff]  }
  0xf6   : > { %1220 = vrot.lane.b32.xlu0 %v2907_v27, %s4937_s8  ;;  %v2856_v27 = vcombine.low %v608_v49, %v4014_v63  ;;  %v3409_v63 = vld [vmem:[%s4894_s3 + $0xd0] sm:$0xff]  }
 0x11b   : > { %v4301_v39 = vpop.permute.xlu0 %1110 }
 0x11c   : > { %v4299_v23 = vpop.permute.xlu1 %1106  ;;  %v1239_v14 = vsel %vm605_vm0, %v2859_v60, %v4301_v39 }
 0x11d   : > { %v1235_v7 = vsel %vm605_vm0, %v2857_v40, %v4299_v23  ;;  %v4949_v40 = vrot.slane %v3728_v8, 1 }
 0x11e   : > { %2203 = vmatprep.mubr.bf16.mxu1 %v1235_v7  ;;  %v3416_v7 = vld [vmem:[%s4894_s3 + $0x98] sm:$0xff]  }
 0x11f   : > { %2204 = vmatmul.mubr.bf16.vlgmr.msra.gmra.mrb[0].mxu1 %v2856_v27  ;;  %v805_v50 = vpop.permute.xlu0 %804  ;;  %v2861_v49 = vcombine.low %v4949_v40, %v4948_v4  ;;  %v4950_v4 = vrot.slane %v3755_v25, 1  ;;  %v3420_v25 = vld [vmem:[%s4894_s3 + $0x200] sm:$0xff]  }
 0x120   : > { %v1145_v52 = vpop.permute.xlu1 %1144  ;;  %2211 = vmatprep.mubr.bf16.mxu1 %v1239_v14  ;;  %3070 = vmatpush3.bf16.msra.mxu1 %v3404_v1  ;;  %v3413_v1 = vld [vmem:[%s4894_s3 + $0xd8] sm:$0xff]  }
 0x121   : > { %3071 = vmatprep.subr.bf16.mxu1 %v3405_v3  ;;  %v845_v3 = vsel %vm605_vm0, %v3965_v22, %v805_v50  ;;  %v4354_v40 = vcombine.low %v4950_v4, %v602_v48  ;;  %v3423_v48 = vld [vmem:[%s4894_s3 + $0x248] sm:$0xff]  }
 0x124   : > { %v4324_v57 = vpop.permute.xlu1 %1114  ;;  %3072 = vmatpush3.bf16.msra.mxu1 %v3408_v56  ;;  %v3417_v56 = vld [vmem:[%s4894_s3 + $0xe0] sm:$0xff]  }
 0x125   : > { %3073 = vmatprep.subr.bf16.mxu1 %v3409_v63  ;;  %v1243_v28 = vsel %vm605_vm0, %v2861_v49, %v4324_v57 }
 0x127   : > { %2212 = vmatmul.mubr.bf16.gmra.mrb[4].mxu1 %v4018_v5 }
 0x128   : > { %v803_v27 = vpop.permute.xlu1 %802  ;;  %2219 = vmatprep.mubr.bf16.mxu1 %v1243_v28  ;;  %3074 = vmatpush3.bf16.msra.mxu1 %v3412_v54  ;;  %v4335_v8 = vpop.permute.xlu0 %1118 }
 0x129   : > { %v4344_v14 = vsel %vm605_vm0, %v3993_v42, %v803_v27  ;;  %3075 = vmatprep.subr.bf16.mxu1 %v3413_v1  ;;  %v3418_v42 = vld [vmem:[%s4894_s3 + $0xa0] sm:$0xff]   ;;  %v3422_v27 = vld [vmem:[%s4894_s3 + $0xa8] sm:$0xff]  }
 0x12a   : > { %v2890_v63 = vcombine.low %v4344_v14, %v845_v3  ;;  %v3425_v3 = vld [vmem:[%s4894_s3 + $0xf0] sm:$0xff]  }
 0x12c   : > { %v4356_v54 = vpop.permute.xlu1 %1108  ;;  %3076 = vmatpush3.bf16.msra.mxu1 %v3416_v7  ;;  %1180 = vrot.lane.b32.xlu1 %v2890_v63, %s4937_s8  ;;  %v1143_v22 = vpop.permute.xlu0 %1142  ;;  %v3424_v7 = vld [vmem:[%s4894_s3 + $0x208] sm:$0xff]  }
 0x12d   : > { %v1158_v50 = vsel %vm605_vm0, %v1143_v22, %v1145_v52  ;;  %3077 = vmatprep.subr.bf16.mxu1 %v3417_v56  ;;  %v1250_v1 = vsel %vm605_vm0, %v2859_v60, %v1143_v22  ;;  %v1247_v60 = vsel %vm605_vm0, %v4354_v40, %v4335_v8  ;;  %v3427_v56 = vld [vmem:[%s4894_s3 + $0x250] sm:$0xff]  }
 0x12e   : > { %2333 = vmatprep.mubr.bf16.mxu0 %v1158_v50 }
 0x12f   : > { %2220 = vmatmul.mubr.bf16.gmra.mrb[8].mxu1 %v4043_v36  ;;  %2334 = vmatmul.mubr.bf16.vlgmr.msra.gmra.mrb[0].mxu0 %v1250_v1 }
 0x130   : > { %v1001_v52 = vpop.permute.xlu1 %1000  ;;  %2227 = vmatprep.mubr.bf16.mxu1 %v1247_v60  ;;  %3078 = vmatpush3.bf16.msra.mxu1 %v3418_v42  ;;  %v1149_v28 = vpop.permute.xlu0 %1148  ;;  %v3426_v42 = vld [vmem:[%s4894_s3 + $0xb0] sm:$0xff]  }
 0x131   : > { %3190 = vmatpush3.bf16.msra.mxu0 %v3420_v25  ;;  %3079 = vmatprep.subr.bf16.mxu1 %v3421_v51  ;;  %v4391_v63 = vsel %vm605_vm0, %v4040_v31, %v1001_v52  ;;  %v3428_v25 = vld [vmem:[%s4894_s3 + $0x210] sm:$0xff]   ;;  %v3430_v52 = vld [vmem:[%s4894_s3 + $0xb8] sm:$0xff]  }
 0x132   : > { %3191 = vmatprep.subr.bf16.mxu0 %v3423_v48  ;;  %v3431_v48 = vld [vmem:[%s4894_s3 + $0x258] sm:$0xff]  }
 0x134   : > { %v4393_v4 = vpop.permute.xlu1 %1146  ;;  %3080 = vmatpush3.bf16.msra.mxu1 %v3422_v27  ;;  %v999_v22 = vpop.permute.xlu0 %998  ;;  %v3433_v27 = vld [vmem:[%s4894_s3 + $0x1c0] sm:$0xff]  }
 0x135   : > { %v4400_v50 = vsel %vm605_vm0, %v4054_v47, %v999_v22  ;;  %v4404_v1 = vsel %vm605_vm0, %v4393_v4, %v1149_v28  ;;  %3192 = vmatpush3.bf16.msra.mxu0 %v3424_v7  ;;  %3081 = vmatprep.subr.bf16.mxu1 %v3425_v3  ;;  %v1253_v31 = vsel %vm605_vm0, %v2861_v49, %v4393_v4  ;;  %v3429_v47 = vld [vmem:[%s4894_s3 + $0xf8] sm:$0xff]  }
 0x136   : > { %v2900_v51 = vcombine.low %v4400_v50, %v4391_v63  ;;  %2341 = vmatprep.mubr.bf16.mxu0 %v4404_v1  ;;  %3193 = vmatprep.subr.bf16.mxu0 %v3427_v56  ;;  %v3432_v28 = vld [vmem:[%s4894_s3 + $0x218] sm:$0xff]   ;;  %v3434_v56 = vld [vmem:[%s4894_s3 + $0x180] sm:$0xff]  }
 0x137   : > { %2228 = vmatmul.mubr.bf16.gmra.mrb[12].mxu1 %v4073_v13  ;;  %2342 = vmatmul.mubr.bf16.gmra.mrb[4].mxu0 %v1253_v31  ;;  %v3436_v31 = vld [vmem:[%s4894_s3 + $0x220] sm:$0xff]  }
 0x138   : > { %v1153_v49 = vpop.permute.xlu1 %1152  ;;  %3082 = vmatpush3.bf16.msra.mxu1 %v3426_v42  ;;  %2268 = vmatprep.mubr.bf16.mxu1 %v4018_v5  ;;  %v1113_v60 = vpop.permute.xlu0 %1112  ;;  %v3435_v5 = vld [vmem:[%s4894_s3 + $0x260] sm:$0xff]  }
 0x139   : > { %1206 = vrot.lane.b32.xlu1 %v2900_v51, %s4937_s8  ;;  %3194 = vmatpush3.bf16.msra.mxu0 %v3428_v25  ;;  %v3437_v25 = vld [vmem:[%s4894_s3 + $0x1c8] sm:$0xff]   ;;  %v604_v51 = vrot.slane %v4194_v45, 1 }
 0x13a   : > { %3083 = vmatprep.subr.bf16.mxu1 %v3429_v47  ;;  %3195 = vmatprep.subr.bf16.mxu0 %v3431_v48  ;;  %v1123_v47 = vsel %vm605_vm0, %v4299_v23, %v4356_v54  ;;  %v3438_v45 = vld [vmem:[%s4894_s3 + $0x188] sm:$0xff]  }
 0x13c   : > { %v1003_v7 = vpop.permute.xlu1 %1002  ;;  %3084 = vmatpush3.bf16.msra.mxu1 %v3430_v52  ;;  %v4435_v3 = vpop.permute.xlu0 %1150  ;;  %v2873_v52 = vcombine.low %v603_v35, %v604_v51 }
 0x13d   : > { %v4442_v22 = vsel %vm605_vm0, %v4435_v3, %v1153_v49  ;;  %3196 = vmatpush3.bf16.msra.mxu0 %v3432_v28  ;;  %v1256_v42 = vsel %vm605_vm0, %v4354_v40, %v4435_v3  ;;  %3149 = vmatprep.subr.bf16.mxu1 %v3433_v27  ;;  %v3439_v40 = vld [vmem:[%s4894_s3 + $0x268] sm:$0xff]   ;;  %v4467_v23 = vsel %vm605_vm0, %v4097_v37, %v1003_v7  ;;  %v3441_v28 = vld [vmem:[%s4894_s3 + $0x1d0] sm:$0xff]  }
 0x13e   : > { %2349 = vmatprep.mubr.bf16.mxu0 %v4442_v22  ;;  %3197 = vmatprep.subr.bf16.mxu0 %v3435_v5 }
 0x13f   : > { %2269 = vmatmul.mubr.bf16.vlgmr.msra.gmra.mrb[16].mxu1 %v1123_v47  ;;  %2350 = vmatmul.mubr.bf16.gmra.mrb[8].mxu0 %v1256_v42  ;;  %v3445_v42 = vld [vmem:[%s4894_s3 + $0x1d8] sm:$0xff]  }
 0x140   : > { %v1117_v48 = vpop.permute.xlu1 %1116  ;;  %2276 = vmatprep.mubr.bf16.mxu1 %v4043_v36  ;;  %3150 = vmatpush3.bf16.msra.mxu1 %v3434_v56  ;;  %v1005_v49 = vpop.permute.xlu0 %1004  ;;  %v3440_v36 = vld [vmem:[%s4894_s3 + $0x228] sm:$0xff]   ;;  %v3444_v56 = vld [vmem:[%s4894_s3 + $0x230] sm:$0xff]  }
 0x141   : > { %v4471_v54 = vsel %vm605_vm0, %v4122_v12, %v1005_v49  ;;  %3198 = vmatpush3.bf16.msra.mxu0 %v3436_v31  ;;  %3151 = vmatprep.subr.bf16.mxu1 %v3437_v25  ;;  %v3443_v12 = vld [vmem:[%s4894_s3 + $0x270] sm:$0xff]   ;;  %v1124_v31 = vsel %vm605_vm0, %v4301_v39, %v1113_v60  ;;  %v3447_v25 = vld [vmem:[%s4894_s3 + $0x278] sm:$0xff]  }
 0x142   : > { %v2902_v37 = vcombine.low %v4467_v23, %v4471_v54  ;;  %3199 = vmatprep.subr.bf16.mxu0 %v3439_v40  ;;  %v3446_v40 = vld [vmem:[%s4894_s3 + $0x198] sm:$0xff]  }
 0x143   : > { %v3448_v49 = vld [vmem:[%s4894_s3 + $0x238] sm:$0xff]  }
 0x144   : > { %v4486_v27 = vpop.permute.xlu1 %1154  ;;  %3152 = vmatpush3.bf16.msra.mxu1 %v3438_v45  ;;  %1210 = vrot.lane.b32.xlu1 %v2902_v37, %s4937_s8  ;;  %v1157_v5 = vpop.permute.xlu0 %1156 }
 0x145   : > { %v4494_v35 = vsel %vm605_vm0, %v4486_v27, %v1157_v5  ;;  %3200 = vmatpush3.bf16.msra.mxu0 %v3440_v36  ;;  %v1260_v7 = vsel %vm605_vm0, %v2873_v52, %v4486_v27  ;;  %3153 = vmatprep.subr.bf16.mxu1 %v3441_v28  ;;  %v4528_v36 = vld [vmem:[%s4024_s0 + $0x48] sm:$0xf]  ;;  %v3450_v28 = vld [vmem:[%s4894_s3 + $0x1a0] sm:$0xff]  }
 0x146   : > { %2357 = vmatprep.mubr.bf16.mxu0 %v4494_v35  ;;  %3201 = vmatprep.subr.bf16.mxu0 %v3443_v12  ;;  %v3451_v5 = vld [vmem:[%s4894_s3 + $0x1e8] sm:$0xff]  }
 0x147   : > { %2277 = vmatmul.mubr.bf16.gmra.mrb[20].mxu1 %v1124_v31  ;;  %2358 = vmatmul.mubr.bf16.gmra.mrb[12].mxu0 %v1260_v7 }
 0x148   : > { %v1009_v51 = vpop.permute.xlu1 %1008  ;;  %2284 = vmatprep.mubr.bf16.mxu1 %v4073_v13  ;;  %3154 = vmatpush3.bf16.msra.mxu1 %v3442_v46  ;;  %v1007_v47 = vpop.permute.xlu0 %1006  ;;  %v3449_v13 = vld [vmem:[%s4894_s3 + $0x1e0] sm:$0xff]  }
 0x149   : > { %v4516_v39 = vsel %vm605_vm0, %v4162_v55, %v1009_v51  ;;  %v1043_v60 = vsel %vm605_vm0, %v4166_v10, %v1007_v47  ;;  %3202 = vmatpush3.bf16.msra.mxu0 %v3444_v56  ;;  %3155 = vmatprep.subr.bf16.mxu1 %v3445_v42  ;;  %v454_v55 = vld [vmem:[%s4024_s0 + $0x4c] sm:$0x1]  ;;  %v1125_v42 = vsel %vm605_vm0, %v4324_v57, %v1117_v48  ;;  %v3453_v57 = vld [vmem:[%s4894_s3 + $0x1f0] sm:$0xff]   ;;  %v4951_v51 = vrot.slane %v3816_v6, 1  ;;  %v3455_v6 = vld [vmem:[%s4894_s3 + $0x1f8] sm:$0xff]  }
 0x14a   : > { %v2904_v45 = vcombine.low %v1043_v60, %v4516_v39  ;;  %3203 = vmatprep.subr.bf16.mxu0 %v3447_v25  ;;  %v4543_v46 = vcombine.low %v4528_v36, %v454_v55  ;;  %v4952_v47 = vrot.slane %v3785_v44, 1 }
 0x14c   : > { %v594_v52 = vpop.permute.xlu1 %593  ;;  %3156 = vmatpush3.bf16.msra.mxu1 %v3446_v40  ;;  %1214 = vrot.lane.b32.xlu1 %v2904_v45, %s4937_s8  ;;  %v997_v10 = vpop.permute.xlu0 %996  ;;  %v992_v48 = vshll.u32 %v4543_v46, 16  ;;  %v2883_v40 = vcombine.low %v4952_v47, %v4951_v51  ;;  %v1025_v0 = vrot.slane %v4543_v46, 1 }
 0x14d   : > { %v635_v37 = vsel %vm605_vm0, %v4176_v41, %v594_v52  ;;  %v1028_v12 = vsel %vm605_vm0, %v4187_v26, %v997_v10  ;;  %3204 = vmatpush3.bf16.msra.mxu0 %v3448_v49  ;;  %3157 = vmatprep.subr.bf16.mxu1 %v3449_v13  ;;  %v3583_v41 = vmov 0   ;;  %v3458_v26 = vld [vmem:[%s4894_s3 + $0x300] sm:$0xff]   ;;  %v3454_v49 = vld [vmem:[%s4894_s3 + $0x1b0] sm:$0xff]   ;;  %v990_v13 = vshrl.u32 %v4543_v46, 16  ;;  %v3456_v10 = vld [vmem:[%s4894_s3 + $0x1b8] sm:$0xff]  }
 0x14e   : > { %v2872_v7 = vcombine.low %v4064_v58, %v635_v37  ;;  %v2892_v56 = vcombine.low %v1028_v12, %v4400_v50  ;;  %2561 = vmatprep.subr.bf16.mxu0 %v3583_v41  ;;  %v3452_v58 = vld [vmem:[%s4894_s3 + $0x1a8] sm:$0xff]   ;;  %v4558_v50 = vcombine.low %v4391_v63, %v4467_v23  ;;  %v994_v45 = vrot.slane %v992_v48, 1  ;;  %v4960_v48 = vld [vmem:[#allocation11_spill] sm:$0xff] }
 0x14f   : > { %2285 = vmatmul.mubr.bf16.gmra.mrb[24].mxu1 %v1125_v42  ;;  %v3459_v63 = vld [vmem:[%s4894_s3 + $0x308] sm:$0xff]   ;;  %v4953_v37 = vrot.slane %v3826_v19, 1  ;;  %v4954_v12 = vrot.slane %v3829_v20, 1  ;;  %v4955_v20 = vcombine.low %v4078_v29, %v4094_v32  ;;  %v3469_v32 = vld [vmem:[%s4894_s3 + $0x2d0] sm:$0xff]   ;;  %v2909_v24 = vcombine.low %v1024_v33, %v1025_v0 }
 0x150   : > { %2292 = vmatprep.mubr.bf16.mxu1 %v2872_v7  ;;  %3158 = vmatpush3.bf16.msra.mxu1 %v3450_v28  ;;  %v1121_v31 = vpop.permute.xlu0 %1120  ;;  %v1011_v25 = vpop.permute.xlu1 %1010  ;;  %v4599_v28 = vcombine.low %v4471_v54, %v1043_v60  ;;  %v3461_v60 = vld [vmem:[%s4894_s3 + $0x318] sm:$0xff]   ;;  %v3466_v19 = vld [vmem:[%s4894_s3 + $0x2c8] sm:$0xff]   ;;  %v3462_v7 = vld [vmem:[%s4894_s3 + $0x320] sm:$0xff]  }
 0x151   : > { %2463 = vmatprep.mubr.bf16.mxu0 %v2892_v56  ;;  %3159 = vmatprep.subr.bf16.mxu1 %v3451_v5  ;;  %v1126_v52 = vsel %vm605_vm0, %v4335_v8, %v1121_v31  ;;  %v995_v8 = vor.u32 %v994_v45, %v990_v13  ;;  %v2885_v54 = vcombine.low %v4954_v12, %v4953_v37  ;;  %v3468_v29 = vld [vmem:[%s4894_s3 + $0x288] sm:$0xff]   ;;  %v4964_v13 = vld [vmem:[#allocation13_spill] sm:$0xff]  ;;  %v3485_v37 = vld [vmem:[%s4894_s3 + $0x2b8] sm:$0xff]  }
 0x152   : > { %2464 = vmatmul.mubr.bf16.vlgmr.msra.gmra.mrb[16].mxu0 %v4404_v1  ;;  %v1049_v1 = vsel %vm605_vm0, %v4211_v2, %v1011_v25  ;;  %v1263_v2 = vsel %vm605_vm0, %v2883_v40, %v4393_v4  ;;  %v3463_v4 = vld [vmem:[%s4894_s3 + $0x2c0] sm:$0xff]   ;;  %v4961_v25 = vld [vmem:[#allocation10_spill] sm:$0xff]  ;;  %v3467_v40 = vld [vmem:[%s4894_s3 + $0x330] sm:$0xff]  }
 0x153   : > { %2471 = vmatprep.mubr.bf16.mxu0 %v4558_v50  ;;  %2562 = vmatpush1.bf16.msra.mxu0 %v3458_v26  ;;  %v1266_v5 = vsel %vm605_vm0, %v2885_v54, %v4435_v3  ;;  %v4633_v56 = vcombine.low %v4516_v39, %v1049_v1  ;;  %v4956_v3 = vld [vmem:[#allocation9_spill] sm:$0xff]  ;;  %v4958_v26 = vld [vmem:[#allocation7_spill] sm:$0xff]  ;;  %v4962_v51 = vcombine.low %v4960_v48, %v4961_v25  ;;  %v3482_v12 = vld [vmem:[%s4894_s3 + $0x358] sm:$0xff]  }
 0x154   : > { %3160 = vmatpush3.bf16.msra.mxu1 %v3452_v58  ;;  %v1013_v23 = vpop.permute.xlu0 %1012  ;;  %2563 = vmatprep.subr.bf16.mxu0 %v3583_v41  ;;  %v4957_v42 = vrot.slane %v4956_v3, 1  ;;  %v4959_v31 = vrot.slane %v4958_v26, 1  ;;  %v3464_v58 = vld [vmem:[%s4894_s3 + $0x328] sm:$0xff]  }
 0x155   : > { %v4581_v44 = vsel %vm605_vm0, %v4230_v17, %v1013_v23  ;;  %3161 = vmatprep.subr.bf16.mxu1 %v3453_v57  ;;  %v3460_v17 = vld [vmem:[%s4894_s3 + $0x310] sm:$0xff]   ;;  %v3472_v57 = vld [vmem:[%s4894_s3 + $0x2d8] sm:$0xff]   ;;  %v3475_v23 = vld [vmem:[%s4894_s3 + $0x2e0] sm:$0xff]  }
 0x156   : > { %v2906_v55 = vcombine.low %v1049_v1, %v4581_v44  ;;  %v2887_v39 = vcombine.low %v4959_v31, %v4957_v42  ;;  %v3478_v1 = vld [vmem:[%s4894_s3 + $0x2e8] sm:$0xff]  }
 0x157   : > { %2293 = vmatmul.mubr.bf16.gmra.mrb[28].mxu1 %v1126_v52  ;;  %2564 = vmatpush1.bf16.msra.mxu0 %v3459_v63  ;;  %v3474_v63 = vld [vmem:[%s4894_s3 + $0x298] sm:$0xff]   ;;  %v3480_v52 = vld [vmem:[%s4894_s3 + $0x2a8] sm:$0xff]  }
 0x158   : > { %3162 = vmatpush3.bf16.msra.mxu1 %v3454_v49  ;;  %2398 = vmatprep.mubr.bf16.mxu1 %v1263_v2  ;;  %v1269_v47 = vsel %vm605_vm0, %v2887_v39, %v4486_v27  ;;  %v3470_v27 = vld [vmem:[%s4894_s3 + $0x338] sm:$0xff]   ;;  %v3477_v49 = vld [vmem:[%s4894_s3 + $0x2a0] sm:$0xff]   ;;  %v3481_v2 = vld [vmem:[%s4894_s3 + $0x2f0] sm:$0xff]  }
 0x159   : > { %1218 = vrot.lane.b32.xlu1 %v2906_v55, %s4937_s8  ;;  %3163 = vmatprep.subr.bf16.mxu1 %v3455_v6  ;;  %v4963_v6 = vld [vmem:[#allocation12_spill] sm:$0xff]  ;;  %v3473_v55 = vld [vmem:[%s4894_s3 + $0x340] sm:$0xff]  }
 0x15a   : > { %2472 = vmatmul.mubr.bf16.gmra.mrb[20].mxu0 %v4442_v22  ;;  %2565 = vmatprep.subr.bf16.mxu0 %v3583_v41  ;;  %v3465_v22 = vld [vmem:[%s4894_s3 + $0x280] sm:$0xff]   ;;  %v4965_v45 = vcombine.low %v4963_v6, %v4964_v13  ;;  %v4966_v54 = vld [vmem:[#allocation8_spill] sm:$0xff] }
 0x15b   : > { %2479 = vmatprep.mubr.bf16.mxu0 %v4599_v28  ;;  %2566 = vmatpush1.bf16.msra.mxu0 %v3460_v17  ;;  %v3476_v17 = vld [vmem:[%s4894_s3 + $0x348] sm:$0xff]  }
 0x15c   : > { %3164 = vmatpush3.bf16.msra.mxu1 %v3456_v10  ;;  %2567 = vmatprep.subr.bf16.mxu0 %v3583_v41  ;;  %v3483_v10 = vld [vmem:[%s4894_s3 + $0x2b0] sm:$0xff]  }
 0x15d   : > { %1014 = vrot.lane.b32.xlu1 %v995_v8, %s4937_s8  ;;  %3229 = vmatprep.subr.bf16.mxu1 %v3463_v4  ;;  %v3484_v8 = vld [vmem:[%s4894_s3 + $0x2f8] sm:$0xff]   ;;  %v3479_v4 = vld [vmem:[%s4894_s3 + $0x350] sm:$0xff]   ;;  %s388_s8 = scalar_select %p387_p2, %s3564_s24, 3 }
 0x15e   : > { %s3026_s24 = sshll.u32 %s2663_s12, 7 }
 0x15f   : > { %2399 = vmatmul.mubr.bf16.vlgmr.msra.gmra.mrb[32].mxu1 %v4955_v20  ;;  %2568 = vmatpush1.bf16.msra.mxu0 %v3461_v60  ;;  %v4967_v60 = vrot.slane %v4966_v54, 1  ;;  %v2895_v20 = vcombine.low %v1018_v30, %v1019_v21  ;;  %s2823_s0 = sshll.u32 %s388_s8, 3 }
 0x160   : > { %2406 = vmatprep.mubr.bf16.mxu1 %v1266_v5  ;;  %2569 = vmatprep.subr.bf16.mxu0 %v3583_v41  ;;  %s391_s13 = sadd.s32 %s2824_s7, %s2823_s0  ;;  %s4829_s0 = scalar_lea.hbm %s4897_s6, %s3026_s24 }
 0x161   : > { %3230 = vmatpush3.bf16.msra.mxu1 %v3465_v22  ;;  %v2889_v22 = vcombine.low %v4967_v60, %v814_v9  ;;  %v2893_v9 = vcombine.low %v1016_v62, %v4969_v59  ;;  %s2825_s14 = sshll.u32 %s391_s13, 3  ;;  %s4839_s7 = scalar_lea.sflag [#allocation3], %s351_s18 }
 0x162   : > { %2480 = vmatmul.mubr.bf16.gmra.mrb[24].mxu0 %v4494_v35  ;;  %3231 = vmatprep.subr.bf16.mxu1 %v3466_v19  ;;  %v3471_v35 = vld [vmem:[%s4894_s3 + $0x290] sm:$0xff]   ;;  %v1183_v19 = vpop.permute.xlu0 %1182  ;;  %s4791_s20 = scalar_lea.vmem %s4896_s5, %s2825_s14  ;;  %s3486_s13 = scalar_lea.vmem %s4831_s25, 1024 }
 0x163   : > { %2487 = vmatprep.mubr.bf16.mxu0 %v4633_v56  ;;  %2570 = vmatpush1.bf16.msra.mxu0 %v3462_v7  ;;  %v4968_v7 = vld [vmem:[#allocation14_spill] sm:$0xff]  ;;  %p3487_p4 = scmp.ne.s32.totalorder %s4831_s25, %s3486_s13  ;;  %s3584_s14 = smov [#allocation2]  }
 0x164   : > { %2571 = vmatprep.subr.bf16.mxu0 %v3583_v41  ;;  %s3490_s19 = sshll.u32 %s3584_s14, 4  ;;  %s3491_s19 = int_to_ptr.vmem [resolvable:$false] %s3490_s19 }
 0x165   : > { %3232 = vmatpush3.bf16.msra.mxu1 %v3468_v29  ;;  %v2888_v29 = vcombine.low %v4968_v7, %v4344_v14  ;;  %p3488_p5 = pnand %p3487_p4, %p3673_p3  ;;  %s3492_s30 = scalar_lea.vmem %s3491_s19, 2048 }
 0x166   : > { %3233 = vmatprep.subr.bf16.mxu1 %v3469_v32  ;;  %v1209_v30 = vpop.permute.xlu0 %1208  ;;  %p3493_p7 = scmp.lt.s32.totalorder %s4831_s25, %s3491_s19  ;;  %p3494_p9 = scmp.lt.s32.totalorder %s3492_s30, %s3486_s13 }
 0x167   : > { %2407 = vmatmul.mubr.bf16.gmra.mrb[36].mxu1 %v4962_v51  ;;  %2572 = vmatpush1.bf16.msra.mxu0 %v3464_v58  ;;  %p3489_p6 = pneg %p3488_p5 }
 0x168   : > { %2414 = vmatprep.mubr.bf16.mxu1 %v1269_v47  ;;  %2573 = vmatprep.subr.bf16.mxu0 %v3583_v41  ;;  %p3495_p10 = por %p3494_p9, %p3493_p7 }
 0x169   : > { %3234 = vmatpush3.bf16.msra.mxu1 %v3471_v35 }
 0x16a   : > { %3235 = vmatprep.subr.bf16.mxu1 %v3472_v57  ;;  %v1213_v53 = vpop.permute.xlu0 %1212  ;;  %p3496_p11 = pnand %p3495_p10, %p3489_p6 }
 0x16b   : > { %2574 = vmatpush1.bf16.msra.mxu0 %v3467_v40 }
 0x16c   : > { %2575 = vmatprep.subr.bf16.mxu0 %v3583_v41 }
 0x16d   : > { %3236 = vmatpush3.bf16.msra.mxu1 %v3474_v63 }
 0x16e   : > { %3237 = vmatprep.subr.bf16.mxu1 %v3475_v23  ;;  %v1217_v43 = vpop.permute.xlu0 %1216 }
 0x16f   : > { %2415 = vmatmul.mubr.bf16.gmra.mrb[40].mxu1 %v4965_v45  ;;  %2576 = vmatpush1.bf16.msra.mxu0 %v3470_v27 }
 0x170   : > { %2577 = vmatprep.subr.bf16.mxu0 %v3583_v41 }
 0x171   : > { %3238 = vmatpush3.bf16.msra.mxu1 %v3477_v49 }
 0x172   : > { %3239 = vmatprep.subr.bf16.mxu1 %v3478_v1  ;;  %v1221_v61 = vpop.permute.xlu0 %1220 }
 0x173   : > { %2578 = vmatpush1.bf16.msra.mxu0 %v3473_v55 }
 0x174   : > { %2579 = vmatprep.subr.bf16.mxu0 %v3583_v41 }
 0x175   : > { %3240 = vmatpush3.bf16.msra.mxu1 %v3480_v52 }
 0x176   : > { %3241 = vmatprep.subr.bf16.mxu1 %v3481_v2 }
 0x177   : > { %2580 = vmatpush1.bf16.msra.mxu0 %v3476_v17 }
 0x178   : > { %2581 = vmatprep.subr.bf16.mxu0 %v3583_v41 }
 0x179   : > { %3242 = vmatpush3.bf16.msra.mxu1 %v3483_v10 }
 0x17a   : > { %3243 = vmatprep.subr.bf16.mxu1 %v3484_v8 }
 0x17b   : > { %2582 = vmatpush1.bf16.msra.mxu0 %v3479_v4 }
 0x17c   : > { %2583 = vmatprep.subr.bf16.mxu0 %v3583_v41 }
 0x17d   : > { %3244 = vmatpush3.bf16.msra.mxu1 %v3485_v37 }
 0x17f   : > { %2584 = vmatpush1.bf16.msra.mxu0 %v3482_v12 }
 0x19e   : > { %v1181_v5 = vpop.permute.xlu1 %1180 }
 0x19f   : > { %v1273_v32 = vsel %vm605_vm0, %v2889_v22, %v1181_v5  ;;  %v1184_v41 = vsel %vm605_vm0, %v1181_v5, %v1183_v19 }
 0x1a0   : > { %2422 = vmatprep.mubr.bf16.mxu1 %v1273_v32  ;;  %2488 = vmatmul.mubr.bf16.gmra.mrb[28].mxu0 %v1184_v41  ;;  %v2910_v41 = vld [vmem:[%s4895_s4] ss:$0 sm:$0xff] }
 0x1a1   : > { %2423 = vmatmul.mubr.bf16.gmra.mrb[44].mxu1 %v2888_v29  ;;  %3019 = vmatprep.mubr.msk.bf16.mxu0 %vm605_vm0, %v2895_v20 }
 0x1a8   : > { %2594 = vmatmul.mubr.bf16.vlgmr.msra.gmra.mrb[32].mxu0 %v4558_v50 }
 0x1a9   : > { %3020 = vmatprep.mubr.msk.bf16.mxu0 %vm605_vm0, %v2897_v16 }
 0x1ab   : > { %v1207_v21 = vpop.permute.xlu1 %1206 }
 0x1ac   : > { %v1277_v14 = vsel %vm605_vm0, %v2893_v9, %v1207_v21  ;;  %v1222_v3 = vsel %vm605_vm0, %v1207_v21, %v1209_v30 }
 0x1ad   : > { %2528 = vmatprep.mubr.bf16.mxu1 %v1222_v3 }
 0x1ae   : > { %2529 = vmatmul.mubr.bf16.vlgmr.msra.gmra.mrb[48].mxu1 %v1277_v14 }
 0x1b0   : > { %2602 = vmatmul.mubr.bf16.gmra.mrb[36].mxu0 %v4599_v28 }
 0x1b1   : > { %3021 = vmatprep.mubr.msk.bf16.mxu0 %vm605_vm0, %v2899_v38 }
 0x1b6   : > { %v1211_v11 = vpop.permute.xlu1 %1210 }
 0x1b7   : > { %v1223_v50 = vsel %vm605_vm0, %v1211_v11, %v1213_v53  ;;  %v1281_v42 = vsel %vm605_vm0, %v2895_v20, %v1211_v11 }
 0x1b8   : > { %2536 = vmatprep.mubr.bf16.mxu1 %v1223_v50  ;;  %2610 = vmatmul.mubr.bf16.gmra.mrb[40].mxu0 %v4633_v56 }
 0x1b9   : > { %2537 = vmatmul.mubr.bf16.gmra.mrb[52].mxu1 %v1281_v42  ;;  %3022 = vmatprep.mubr.msk.bf16.mxu0 %vm605_vm0, %v2909_v24 }
 0x1be   : > { %v1215_v34 = vpop.permute.xlu1 %1214 }
 0x1bf   : > { %v1224_v18 = vsel %vm605_vm0, %v1215_v34, %v1217_v43  ;;  %v1285_v46 = vsel %vm605_vm0, %v2897_v16, %v1215_v34 }
 0x1c0   : > { %2544 = vmatprep.mubr.bf16.mxu1 %v1224_v18 }
 0x1c1   : > { %2545 = vmatmul.mubr.bf16.gmra.mrb[56].mxu1 %v1285_v46 }
 0x1cb   : > { %v1219_v33 = vpop.permute.xlu1 %1218 }
 0x1cc   : > { %v1225_v28 = vsel %vm605_vm0, %v1219_v33, %v1221_v61  ;;  %v1289_v26 = vsel %vm605_vm0, %v2899_v38, %v1219_v33 }
 0x1cd   : > { %2552 = vmatprep.mubr.bf16.mxu1 %v1225_v28 }
 0x1ce   : > { %2553 = vmatmul.mubr.bf16.gmra.mrb[60].mxu1 %v1289_v26 }
 0x1cf   : > { %v1015_v56 = vpop.permute.xlu1 %1014 }
 0x1d0   : > { %v1055_v31 = vsel %vm605_vm0, %v4528_v36, %v1015_v56 }
 0x1d1   : > { %v2908_v39 = vcombine.low %v4581_v44, %v1055_v31 }
 0x1d3   : > { %2618 = vmatmul.mubr.bf16.gmra.mrb[44].mxu0 %v2908_v39 }
 0x1f2   : > { %v3045_v58 = vpop.f32.mrb[0].mxu1 }
 0x1f3   : > { %v3046_v35 = vpop.f32.mrb[1].mxu1 }
 0x1f4   : > { %v3047_v57 = vadd.f32 %v3046_v35, %v3045_v58  ;;  %v3048_v48 = vpop.f32.mrb[2].mxu1 }
 0x1f5   : > { %v3049_v25 = vpop.f32.mrb[3].mxu1 }
 0x1f6   : > { %v3050_v51 = vadd.f32 %v3049_v25, %v3048_v48  ;;  %v2206_v30 = vadd.f32 %v3047_v57, %v2910_v41 }
 0x1f8   : > { %v2209_v53 = vadd.f32 %v3050_v51, %v2910_v41 }
 0x1fa   : > { %v3051_v47 = vpop.f32.mrb[4].mxu1 }
 0x1fb   : > { %v3052_v40 = vpop.f32.mrb[5].mxu1 }
 0x1fc   : > { %v3053_v63 = vadd.f32 %v3052_v40, %v3051_v47  ;;  %v3054_v23 = vpop.f32.mrb[6].mxu1 }
 0x1fd   : > { %v3055_v27 = vpop.f32.mrb[7].mxu1 }
 0x1fe   : > { %v3056_v49 = vadd.f32 %v3055_v27, %v3054_v23  ;;  %v2214_v28 = vadd.f32 %v3053_v63, %v2910_v41 }
 0x200   : > { %v2217_v57 = vadd.f32 %v3056_v49, %v2910_v41 }
 0x202   : > { %v3057_v1 = vpop.f32.mrb[8].mxu1  ;;  %v3125_v6 = vpop.f32.mrb[0].mxu0 }
 0x203   : > { %v3058_v13 = vpop.f32.mrb[9].mxu1  ;;  %v3126_v45 = vpop.f32.mrb[1].mxu0 }
 0x204   : > { %v3059_v36 = vadd.f32 %v3058_v13, %v3057_v1  ;;  %v3127_v55 = vadd.f32 %v3126_v45, %v3125_v6  ;;  %v3060_v44 = vpop.f32.mrb[10].mxu1  ;;  %v3128_v52 = vpop.f32.mrb[2].mxu0 }
 0x205   : > { %v3061_v2 = vpop.f32.mrb[11].mxu1  ;;  %v3129_v17 = vpop.f32.mrb[3].mxu0 }
 0x206   : > { %v3062_v10 = vadd.f32 %v3061_v2, %v3060_v44  ;;  %v3130_v8 = vadd.f32 %v3129_v17, %v3128_v52  ;;  %v2222_v6 = vadd.f32 %v3059_v36, %v2910_v41 }
 0x208   : > { %v2225_v44 = vadd.f32 %v3062_v10, %v2910_v41 }
 0x20a   : > { %v3063_v4 = vpop.f32.mrb[12].mxu1  ;;  %v3131_v37 = vpop.f32.mrb[4].mxu0 }
 0x20b   : > { %v3064_v12 = vpop.f32.mrb[13].mxu1  ;;  %v3132_v54 = vpop.f32.mrb[5].mxu0 }
 0x20c   : > { %v4760_v60 = vadd.f32 %v3064_v12, %v3063_v4  ;;  %v3133_v22 = vadd.f32 %v3132_v54, %v3131_v37  ;;  %v3066_v19 = vpop.f32.mrb[14].mxu1  ;;  %v3134_v20 = vpop.f32.mrb[6].mxu0 }
 0x20d   : > { %v3067_v5 = vpop.f32.mrb[15].mxu1  ;;  %v3135_v7 = vpop.f32.mrb[7].mxu0 }
 0x20e   : > { %v4762_v29 = vadd.f32 %v3067_v5, %v3066_v19  ;;  %v3136_v32 = vadd.f32 %v3135_v7, %v3134_v20  ;;  %v2230_v5 = vadd.f32 %v4760_v60, %v2910_v41 }
 0x210   : > { %v2233_v10 = vadd.f32 %v4762_v29, %v2910_v41 }
 0x212   : > { %v3085_v62 = vpop.f32.mrb[16].mxu1  ;;  %v3137_v16 = vpop.f32.mrb[8].mxu0 }
 0x213   : > { %v3086_v59 = vpop.f32.mrb[17].mxu1  ;;  %v3138_v9 = vpop.f32.mrb[9].mxu0 }
 0x214   : > { %v3087_v21 = vadd.f32 %v3086_v59, %v3085_v62  ;;  %v3139_v14 = vadd.f32 %v3138_v9, %v3137_v16  ;;  %v3088_v3 = vpop.f32.mrb[18].mxu1  ;;  %v3140_v15 = vpop.f32.mrb[10].mxu0 }
 0x215   : > { %v3089_v38 = vpop.f32.mrb[19].mxu1  ;;  %v3141_v0 = vpop.f32.mrb[11].mxu0 }
 0x216   : > { %v2271_v24 = vadd.f32 %v3087_v21, %v2206_v30  ;;  %v3090_v11 = vadd.f32 %v3089_v38, %v3088_v3  ;;  %v3142_v50 = vadd.f32 %v3141_v0, %v3140_v15 }
 0x218   : > { %v2274_v42 = vadd.f32 %v3090_v11, %v2209_v53  ;;  %v2336_v43 = vadd.f32 %v3127_v55, %v2271_v24 }
 0x21a   : > { %v3091_v34 = vpop.f32.mrb[20].mxu1  ;;  %v3143_v18 = vpop.f32.mrb[12].mxu0  ;;  %v4767_v46 = vadd.f32 %v3130_v8, %v2274_v42 }
 0x21b   : > { %v3092_v61 = vpop.f32.mrb[21].mxu1  ;;  %v3144_v33 = vpop.f32.mrb[13].mxu0 }
 0x21c   : > { %v3093_v26 = vadd.f32 %v3092_v61, %v3091_v34  ;;  %v3145_v56 = vadd.f32 %v3144_v33, %v3143_v18  ;;  %v3094_v31 = vpop.f32.mrb[22].mxu1  ;;  %v3146_v39 = vpop.f32.mrb[14].mxu0 }
 0x21d   : > { %v3095_v58 = vpop.f32.mrb[23].mxu1  ;;  %v3147_v35 = vpop.f32.mrb[15].mxu0 }
 0x21e   : > { %v2279_v48 = vadd.f32 %v3093_v26, %v2214_v28  ;;  %v3096_v25 = vadd.f32 %v3095_v58, %v3094_v31  ;;  %v3148_v51 = vadd.f32 %v3147_v35, %v3146_v39 }
 0x220   : > { %v2282_v47 = vadd.f32 %v3096_v25, %v2217_v57  ;;  %v2344_v40 = vadd.f32 %v3133_v22, %v2279_v48 }
 0x222   : > { %v3097_v23 = vpop.f32.mrb[24].mxu1  ;;  %v2347_v27 = vadd.f32 %v3136_v32, %v2282_v47 }
 0x223   : > { %v3098_v1 = vpop.f32.mrb[25].mxu1 }
 0x224   : > { %v3099_v13 = vadd.f32 %v3098_v1, %v3097_v23  ;;  %v3100_v45 = vpop.f32.mrb[26].mxu1 }
 0x225   : > { %v3205_v55 = vpop.f32.mrb[16].mxu0  ;;  %v3101_v63 = vpop.f32.mrb[27].mxu1 }
 0x226   : > { %v2287_v52 = vadd.f32 %v3099_v13, %v2222_v6  ;;  %v3102_v2 = vadd.f32 %v3101_v63, %v3100_v45  ;;  %v3206_v17 = vpop.f32.mrb[17].mxu0 }
 0x227   : > { %v3207_v8 = vadd.f32 %v3206_v17, %v3205_v55  ;;  %v3208_v4 = vpop.f32.mrb[18].mxu0 }
 0x228   : > { %v2290_v49 = vadd.f32 %v3102_v2, %v2225_v44  ;;  %v3209_v37 = vpop.f32.mrb[19].mxu0  ;;  %v2352_v12 = vadd.f32 %v3139_v14, %v2287_v52 }
 0x229   : > { %v3210_v54 = vadd.f32 %v3209_v37, %v3208_v4 }
 0x22a   : > { %v3103_v19 = vpop.f32.mrb[28].mxu1  ;;  %v2355_v22 = vadd.f32 %v3142_v50, %v2290_v49 }
 0x22b   : > { %v3104_v20 = vpop.f32.mrb[29].mxu1 }
 0x22c   : > { %v3105_v36 = vadd.f32 %v3104_v20, %v3103_v19  ;;  %v3106_v7 = vpop.f32.mrb[30].mxu1 }
 0x22d   : > { %v3211_v32 = vpop.f32.mrb[20].mxu0  ;;  %v3107_v62 = vpop.f32.mrb[31].mxu1 }
 0x22e   : > { %v2295_v16 = vadd.f32 %v3105_v36, %v2230_v5  ;;  %v3108_v59 = vadd.f32 %v3107_v62, %v3106_v7  ;;  %v3212_v9 = vpop.f32.mrb[21].mxu0 }
 0x22f   : > { %v3213_v30 = vadd.f32 %v3212_v9, %v3211_v32  ;;  %v3214_v21 = vpop.f32.mrb[22].mxu0 }
 0x230   : > { %v2298_v3 = vadd.f32 %v3108_v59, %v2233_v10  ;;  %v3215_v15 = vpop.f32.mrb[23].mxu0  ;;  %v2360_v14 = vadd.f32 %v3145_v56, %v2295_v16 }
 0x231   : > { %v3216_v38 = vadd.f32 %v3215_v15, %v3214_v21 }
 0x232   : > { %v3165_v0 = vpop.f32.mrb[32].mxu1  ;;  %v2363_v53 = vadd.f32 %v3148_v51, %v2298_v3 }
 0x233   : > { %v3166_v24 = vpop.f32.mrb[33].mxu1 }
 0x234   : > { %v3167_v11 = vadd.f32 %v3166_v24, %v3165_v0  ;;  %v3168_v60 = vpop.f32.mrb[34].mxu1 }
 0x235   : > { %v3217_v50 = vpop.f32.mrb[24].mxu0  ;;  %v3169_v42 = vpop.f32.mrb[35].mxu1 }
 0x236   : > { %v2401_v34 = vadd.f32 %v3167_v11, %v2336_v43  ;;  %v3170_v18 = vadd.f32 %v3169_v42, %v3168_v60  ;;  %v3218_v61 = vpop.f32.mrb[25].mxu0  ;;  %v2626_v11 = vld [vmem:[%s4791_s20] sm:$0xff] }
 0x237   : > { %v3219_v29 = vadd.f32 %v3218_v61, %v3217_v50  ;;  %v3220_v41 = vpop.f32.mrb[26].mxu0 }
 0x238   : > { %v2404_v33 = vadd.f32 %v3170_v18, %v4767_v46  ;;  %v3221_v28 = vpop.f32.mrb[27].mxu0  ;;  %v2466_v26 = vadd.f32 %v3207_v8, %v2401_v34  ;;  %v2627_v34 = vld [vmem:[%s4791_s20 + $0x8] sm:$0xff] }
 0x239   : > { %v3222_v31 = vadd.f32 %v3221_v28, %v3220_v41 }
 0x23a   : > { %v3171_v39 = vpop.f32.mrb[36].mxu1  ;;  %v2469_v56 = vadd.f32 %v3210_v54, %v2404_v33 }
 0x23b   : > { %v3172_v58 = vpop.f32.mrb[37].mxu1 }
 0x23c   : > { %v3173_v35 = vadd.f32 %v3172_v58, %v3171_v39  ;;  %v3174_v57 = vpop.f32.mrb[38].mxu1 }
 0x23d   : > { %v3175_v48 = vpop.f32.mrb[39].mxu1 }
 0x23e   : > { %v2409_v25 = vadd.f32 %v3173_v35, %v2344_v40  ;;  %v3176_v51 = vadd.f32 %v3175_v48, %v3174_v57 }
 0x240   : > { %v2412_v47 = vadd.f32 %v3176_v51, %v2347_v27  ;;  %v4772_v43 = vadd.f32 %v3213_v30, %v2409_v25  ;;  %v2628_v25 = vld [vmem:[%s4791_s20 + $0x10] sm:$0xff] }
 0x242   : > { %v3177_v23 = vpop.f32.mrb[40].mxu1  ;;  %v4774_v1 = vadd.f32 %v3216_v38, %v2412_v47 }
 0x243   : > { %v3178_v6 = vpop.f32.mrb[41].mxu1 }
 0x244   : > { %v3179_v46 = vadd.f32 %v3178_v6, %v3177_v23  ;;  %v3180_v13 = vpop.f32.mrb[42].mxu1  ;;  %v2629_v23 = vld [vmem:[%s4791_s20 + $0x18] sm:$0xff] }
 0x245   : > { %v3181_v45 = vpop.f32.mrb[43].mxu1 }
 0x246   : > { %v2417_v55 = vadd.f32 %v3179_v46, %v2352_v12  ;;  %v3182_v63 = vadd.f32 %v3181_v45, %v3180_v13 }
 0x248   : > { %v2420_v44 = vadd.f32 %v3182_v63, %v2355_v22  ;;  %v4776_v52 = vadd.f32 %v3219_v29, %v2417_v55 }
 0x24a   : > { %v4778_v2 = vadd.f32 %v3222_v31, %v2420_v44 }
 0x273   : > { %v3223_v40 = vpop.f32.mrb[28].mxu0 }
 0x274   : > { %v3183_v27 = vpop.f32.mrb[44].mxu1  ;;  %v3224_v17 = vpop.f32.mrb[29].mxu0 }
 0x275   : > { %v3225_v8 = vadd.f32 %v3224_v17, %v3223_v40  ;;  %v3184_v4 = vpop.f32.mrb[45].mxu1  ;;  %v3226_v49 = vpop.f32.mrb[30].mxu0 }
 0x276   : > { %v3185_v37 = vadd.f32 %v3184_v4, %v3183_v27  ;;  %v3186_v54 = vpop.f32.mrb[46].mxu1  ;;  %v3227_v19 = vpop.f32.mrb[31].mxu0  ;;  %v2630_v27 = vld [vmem:[%s4791_s20 + $0x20] sm:$0xff]  ;;  %v2631_v4 = vld [vmem:[%s4791_s20 + $0x28] sm:$0xff] }
 0x277   : > { %v3228_v20 = vadd.f32 %v3227_v19, %v3226_v49  ;;  %v3187_v12 = vpop.f32.mrb[47].mxu1 }
 0x278   : > { %v2425_v22 = vadd.f32 %v3185_v37, %v2360_v14  ;;  %v3188_v5 = vadd.f32 %v3187_v12, %v3186_v54 }
 0x27a   : > { %v2428_v36 = vadd.f32 %v3188_v5, %v2363_v53  ;;  %v4783_v7 = vadd.f32 %v3225_v8, %v2425_v22 }
 0x27b   : > { %v2595_v32 = vpop.f32.mrb[32].mxu0 }
 0x27c   : > { %v2597_v62 = vpop.f32.mrb[33].mxu0  ;;  %v4785_v10 = vadd.f32 %v3228_v20, %v2428_v36 }
 0x27d   : > { %v2598_v16 = vpop.f32.mrb[34].mxu0 }
 0x27e   : > { %v2600_v59 = vpop.f32.mrb[35].mxu0 }
 0x281   : > { %v3245_v9 = vpop.f32.mrb[48].mxu1 }
 0x282   : > { %v3246_v30 = vpop.f32.mrb[49].mxu1 }
 0x283   : > { %v3247_v21 = vadd.f32 %v3246_v30, %v3245_v9  ;;  %v3248_v3 = vpop.f32.mrb[50].mxu1  ;;  %v2603_v15 = vpop.f32.mrb[36].mxu0  ;;  %v2633_v30 = vld [vmem:[%s4791_s20 + $0x38] sm:$0xff] }
 0x284   : > { %v3249_v14 = vpop.f32.mrb[51].mxu1  ;;  %v2605_v38 = vpop.f32.mrb[37].mxu0 }
 0x285   : > { %v2531_v0 = vadd.f32 %v3247_v21, %v2466_v26  ;;  %v3250_v53 = vadd.f32 %v3249_v14, %v3248_v3  ;;  %v2606_v24 = vpop.f32.mrb[38].mxu0 }
 0x286   : > { %v2608_v60 = vpop.f32.mrb[39].mxu0 }
 0x287   : > { %v2596_v50 = vadd.f32 %v2595_v32, %v2531_v0  ;;  %v2534_v42 = vadd.f32 %v3250_v53, %v2469_v56  ;;  %v2632_v32 = vld [vmem:[%s4791_s20 + $0x30] sm:$0xff] }
 0x289   : > { %v2634_v18 = vadd.f32 %v2626_v11, %v2596_v50  ;;  %v2599_v61 = vadd.f32 %v2598_v16, %v2534_v42 }
 0x28b   : > { %2642 = vst.msk [vmem:[%s4797_s29] sm:$0xff] %vm605_vm0, %v2634_v18  ;;  %v2635_v29 = vadd.f32 %v2627_v34, %v2599_v61  ;;  %v2611_v41 = vpop.f32.mrb[40].mxu0 }
 0x28c   : > { %v3251_v33 = vpop.f32.mrb[52].mxu1  ;;  %v2613_v28 = vpop.f32.mrb[41].mxu0 }
 0x28d   : > { %2643 = vst.msk [vmem:[%s4797_s29 + $0x8] sm:$0xff] %vm605_vm0, %v2635_v29  ;;  %v3252_v26 = vpop.f32.mrb[53].mxu1  ;;  %v2614_v31 = vpop.f32.mrb[42].mxu0 }
 0x28e   : > { %v3253_v39 = vadd.f32 %v3252_v26, %v3251_v33  ;;  %v3254_v56 = vpop.f32.mrb[54].mxu1  ;;  %v2616_v58 = vpop.f32.mrb[43].mxu0 }
 0x28f   : > { %v3255_v35 = vpop.f32.mrb[55].mxu1 }
 0x290   : > { %v2539_v57 = vadd.f32 %v3253_v39, %v4772_v43  ;;  %v3256_v48 = vadd.f32 %v3255_v35, %v3254_v56 }
 0x292   : > { %v2604_v51 = vadd.f32 %v2603_v15, %v2539_v57  ;;  %v2542_v47 = vadd.f32 %v3256_v48, %v4774_v1 }
 0x294   : > { %v2636_v6 = vadd.f32 %v2628_v25, %v2604_v51  ;;  %v2607_v46 = vadd.f32 %v2606_v24, %v2542_v47  ;;  %v3257_v13 = vpop.f32.mrb[56].mxu1 }
 0x295   : > { %v3258_v45 = vpop.f32.mrb[57].mxu1 }
 0x296   : > { %2644 = vst.msk [vmem:[%s4797_s29 + $0x10] sm:$0xff] %vm605_vm0, %v2636_v6  ;;  %v2637_v55 = vadd.f32 %v2629_v23, %v2607_v46  ;;  %v3259_v63 = vadd.f32 %v3258_v45, %v3257_v13  ;;  %v3260_v43 = vpop.f32.mrb[58].mxu1 }
 0x297   : > { %v3261_v44 = vpop.f32.mrb[59].mxu1 }
 0x298   : > { %2645 = vst.msk [vmem:[%s4797_s29 + $0x18] sm:$0xff] %vm605_vm0, %v2637_v55  ;;  %v2547_v1 = vadd.f32 %v3259_v63, %v4776_v52  ;;  %v3262_v40 = vadd.f32 %v3261_v44, %v3260_v43 }
 0x29a   : > { %v2612_v17 = vadd.f32 %v2611_v41, %v2547_v1  ;;  %v2550_v8 = vadd.f32 %v3262_v40, %v4778_v2 }
 0x29c   : > { %v2638_v49 = vadd.f32 %v2630_v27, %v2612_v17  ;;  %v2615_v37 = vadd.f32 %v2614_v31, %v2550_v8 }
 0x29e   : > { %2646 = vst.msk [vmem:[%s4797_s29 + $0x20] sm:$0xff] %vm605_vm0, %v2638_v49  ;;  %v2639_v54 = vadd.f32 %v2631_v4, %v2615_v37 }
 0x2a0   : > { %2647 = vst.msk [vmem:[%s4797_s29 + $0x28] sm:$0xff] %vm605_vm0, %v2639_v54 }
 0x2a1   : > { %v3263_v19 = vpop.f32.mrb[60].mxu1 }
 0x2a2   : > { %v3264_v52 = vpop.f32.mrb[61].mxu1 }
 0x2a3   : > { %v3265_v20 = vadd.f32 %v3264_v52, %v3263_v19  ;;  %v3266_v12 = vpop.f32.mrb[62].mxu1 }
 0x2a4   : > { %v3267_v22 = vpop.f32.mrb[63].mxu1 }
 0x2a5   : > { %v3268_v2 = vadd.f32 %v3267_v22, %v3266_v12  ;;  %v2555_v5 = vadd.f32 %v3265_v20, %v4783_v7 }
 0x2a6   : > { %v2619_v36 = vpop.f32.mrb[44].mxu0 }
 0x2a7   : > { %v2620_v62 = vadd.f32 %v2619_v36, %v2555_v5  ;;  %v2621_v16 = vpop.f32.mrb[45].mxu0  ;;  %v2558_v59 = vadd.f32 %v3268_v2, %v4785_v10 }
 0x2a8   : > { %v2622_v9 = vpop.f32.mrb[46].mxu0 }
 0x2a9   : > { %v2640_v21 = vadd.f32 %v2632_v32, %v2620_v62  ;;  %v2623_v3 = vadd.f32 %v2622_v9, %v2558_v59  ;;  %v2624_v15 = vpop.f32.mrb[47].mxu0 }
 0x2ab   : > { %2648 = vst.msk [vmem:[%s4797_s29 + $0x30] sm:$0xff] %vm605_vm0, %v2640_v21  ;;  %v2641_v7 = vadd.f32 %v2633_v30, %v2623_v3 }
 0x2ad   : > { %2649 = vst.msk [vmem:[%s4797_s29 + $0x38] sm:$0xff] %vm605_vm0, %v2641_v7 }
 0x2ae   : > { %3499 = shalt.err (!%p3496_p11)
}
 0x2af   : > { %s3500_s18 = scalar_lea.hbm %s4829_s0, 1024  ;;  %s3504_s29 = scalar_lea.hbm %s4897_s6, 8192 }
 0x2b0   : > { %p3501_p12 = scmp.ne.s32.totalorder %s4829_s0, %s3500_s18  ;;  %p3505_p1 = scmp.lt.u32.totalorder %s4829_s0, %s4897_s6 }
 0x2b1   : > { %p3506_p2 = scmp.lt.u32.totalorder %s3504_s29, %s3500_s18  ;;  %p3508_p5 = scmp.lt.u32.totalorder %s3500_s18, %s4829_s0 }
 0x2b2   : > { %p3502_p13 = pnand %p3501_p12, %p3673_p3 }
 0x2b3   : > { %p3507_p4 = por %p3506_p2, %p3505_p1 }
 0x2b4   : > { %p3503_p0 = pneg %p3502_p13 }
 0x2b5   : > { %p3509_p6 = por %p3508_p5, %p3507_p4 }
 0x2b7   : > { %p3510_p7 = pnand %p3509_p6, %p3503_p0 }
 0x2b9   : > { %3513 = shalt.err (!%p3510_p7)
}
 0x2ba   : > { %s3585_s12 = smov 128   ;;  %s3586_s24 = smov 8  }
 0x2bb   : > { %3273 = dma.vmem_to_hbm [thread:$0]  (%p3673_p3), %s4831_s25, 1024, %s4829_s0, %s4839_s7, %s3585_s12, %s3585_s12, %s3586_s24  }
 0x2bc PF: > { %p3279_p9 = scmp.ge.s32.totalorder %s3580_s28, 2  ;;  %s2681_s9 = sand.u32 1, %s3552_s21  }
 0x2bd   : > { %s2682_s8 = scalar_lea.sflag [#allocation3], %s2681_s9 }
 0x2be   : > { %p3276_p10 = pnand %p3279_p9, %p3682_p8 }
 0x2c0   : > { %3547 = dma.done.wait (!%p3276_p10), %s2682_s8, 1024  }
 0x2c1   : > { %3549 = vsyncadd (!%p3276_p10), %s2682_s8, 4294966272  ;;  %s19_s28 = sadd.s32 1, %s3580_s28   ;;  %s4971_s10 = sld [smem:[#allocation5_spill]] }
 0x2c2   : > { %p16_p11 = scmp.ge.s32.totalorder %s19_s28, 10   ;;  %s4972_s0 = sld [smem:[#allocation6_spill]] }
 0x2c3   : > { %s4973_s21 = smov %s3556_s22  ;;  %s4974_s22 = smov %s3560_s23 }
 0x2c4   : > { %s4975_s23 = smov %s3691_s15  ;;  %s4976_s24 = smov %s3572_s26 }
 0x2c5   : > { %s4977_s25 = smov %s3576_s27  ;;  %18 = sbr.rel (!%p16_p11) target bundleno = 8 (0x8), region = 88 }
 0x2c7   : > { %s4978_s26 = smov %s4971_s10 }
 0x2c8   : > { %s4979_s27 = smov %s4972_s0 }
 0x2cc   :  { %2687 = vsyncpa [#allocation3], 1 }
 0x2cd   :  { %2689 = vsyncpa [#allocation3 + $0x1], 1 }

</bundles_post_ra>
